<compile_context>
chip_gen: v7x
topology: tpu7x:2x2x1
jax: 0.10.0
libtpu: 0.0.40
codegen_flags: <defaults>
</compile_context>

<pallas_src>
import functools

import jax
import jax.numpy as jnp
from jax.experimental import pallas as pl
from jax.experimental.pallas import tpu as pltpu


LQ_TILE = 256   # query tile at realistic shapes (use 128 on v5e to match its 4x128 MXU)


# ------------------------------ kernel helpers -------------------------------


def _layer_norm(x, gamma, beta, eps=1e-6):
    mu = jnp.mean(x, axis=-1, keepdims=True)
    var = jnp.mean(jnp.square(x - mu), axis=-1, keepdims=True)
    return (x - mu) * jax.lax.rsqrt(var + eps) * gamma + beta


def _mm(a, w_ref):
    """a @ w on the MXU with f32 accumulation; operand dtype follows the weight."""
    w = w_ref[...]
    return jnp.dot(a.astype(w.dtype), w, preferred_element_type=jnp.float32)


def _mask_bias(mask_ref):
    """int8 mask block -> additive f32 bias, computed once per MHA."""
    m = mask_ref[0].astype(jnp.float32)
    return jnp.where(m == 0.0, jnp.float32(-1e9), jnp.float32(0.0))


def _attention_block(x_q, x_kv, bias, wq_ref, wk_ref, wv_ref, wfc_ref,
                     g_ref, b_ref, attn_ref, *, n_head, compute_dtype):
    """One MultiHeadAttention (+ residual + LayerNorm). Returns (Lq, D) f32.

    Weights arrive pre-split per head ((n_head, D, d_k) / (n_head, d_k, D));
    `w_ref[h]` is a leading-axis view, so there are no lane-masked slices of
    the projected activations and no in-kernel relayouts.
    """
    d_k = wq_ref.shape[-1]
    inv_temp = 1.0 / (d_k ** 0.5)
    xq_c = x_q.astype(compute_dtype)
    xkv_c = x_kv.astype(compute_dtype)

    acc = None                               # lane-dense (Lq, D) f32 accumulator
    for h in range(n_head):                  # small static loop, unrolled
        qh = jnp.dot(xq_c, wq_ref[h], preferred_element_type=jnp.float32) * inv_temp
        kh = jnp.dot(xkv_c, wk_ref[h], preferred_element_type=jnp.float32)
        vh = jnp.dot(xkv_c, wv_ref[h], preferred_element_type=jnp.float32)

        # q @ k^T without materializing a transposed k (contract on d_k).
        scores = jax.lax.dot_general(
            qh.astype(compute_dtype), kh.astype(compute_dtype),
            (((1,), (1,)), ((), ())), preferred_element_type=jnp.float32)
        if bias is not None:
            scores = scores + bias           # (Lq, Lk) f32

        m = jnp.max(scores, axis=-1, keepdims=True)
        e = jnp.exp(scores - m)
        s = jnp.sum(e, axis=-1, keepdims=True)
        inv = pl.reciprocal(s, approx=True)  # EUP slot
        inv = inv * (2.0 - s * inv)          # one Newton step -> f32 accuracy
        p = e * inv                          # softmax probs, f32

        if attn_ref is not None:             # per-head lane-dense store, no stack
            attn_ref[0, h] = p.astype(attn_ref.dtype)

        # (attention dropout == identity in eval mode)
        ctx = jnp.dot(p.astype(compute_dtype), vh.astype(compute_dtype),
                      preferred_element_type=jnp.float32)          # (Lq, d_k)
        # Block-decomposed fc projection: accumulate full-width (Lq, D) tiles.
        contrib = jnp.dot(ctx.astype(wfc_ref.dtype), wfc_ref[h],
                          preferred_element_type=jnp.float32)      # (Lq, D)
        acc = contrib if acc is None else acc + contrib

    # (projection dropout == identity in eval mode)
    x = acc + x_q                                                   # residual
    return _layer_norm(x, g_ref[...], b_ref[...])


def _ffn_block(x, w1_ref, b1_ref, w2_ref, b2_ref, g_ref, b_ref):
    h = _mm(x, w1_ref) + b1_ref[...]
    h = jnp.maximum(h, 0.0)                                         # ReLU
    y = _mm(h, w2_ref) + b2_ref[...]
    # (dropout == identity in eval mode)
    y = y + x                                                       # residual
    return _layer_norm(y, g_ref[...], b_ref[...])


# ------------------------------ fused kernel ----------------------------------


def decoder_layer_kernel(*refs, n_head, has_slf_mask, has_enc_mask,
                         return_attns, compute_dtype):
    (dec_q_ref, dec_kv_ref, enc_ref, smask_ref, emask_ref,
     s_wq, s_wk, s_wv, s_wfc, s_g, s_b,
     c_wq, c_wk, c_wv, c_wfc, c_g, c_b,
     f_w1, f_b1, f_w2, f_b2, f_g, f_b) = refs[:23]
    if return_attns:
        out_ref, slf_attn_ref, enc_attn_ref = refs[23:]
    else:
        (out_ref,) = refs[23:]
        slf_attn_ref = enc_attn_ref = None

    x_q = dec_q_ref[0].astype(jnp.float32)    # (block_q, D) query rows of this tile
    x_kv = dec_kv_ref[0].astype(jnp.float32)  # (Ld, D) full decoder seq for K/V
    enc = enc_ref[0].astype(jnp.float32)      # (Le, D)
    sbias = _mask_bias(smask_ref) if has_slf_mask else None
    ebias = _mask_bias(emask_ref) if has_enc_mask else None

    # 1) masked self-attention (+ residual + LN); intermediate stays on-chip.
    x = _attention_block(x_q, x_kv, sbias, s_wq, s_wk, s_wv, s_wfc,
                         s_g, s_b, slf_attn_ref,
                         n_head=n_head, compute_dtype=compute_dtype)
    # 2) decoder-encoder cross-attention (+ residual + LN).
    x = _attention_block(x, enc, ebias, c_wq, c_wk, c_wv, c_wfc,
                         c_g, c_b, enc_attn_ref,
                         n_head=n_head, compute_dtype=compute_dtype)
    # 3) position-wise feed-forward (+ residual + LN).
    x = _ffn_block(x, f_w1, f_b1, f_w2, f_b2, f_g, f_b)

    out_ref[0] = x.astype(out_ref.dtype)


# -------------------------------- wrapper --------------------------------------


def decoder_layer(dec_input, enc_output, params, n_head,
                  slf_attn_mask=None, dec_enc_attn_mask=None,
                  compute_dtype=jnp.bfloat16, attn_dtype=None,
                  return_attns=True, lq_tile=LQ_TILE):
    B, Ld, D = dec_input.shape
    Le = enc_output.shape[1]
    H = params["pos_ffn"][0].shape[1]
    d_k = D // n_head
    if attn_dtype is None:
        attn_dtype = compute_dtype

    block_q = lq_tile if (Ld % lq_tile == 0) else Ld
    nq = Ld // block_q

    def cast_w(w):          # MXU weights follow compute_dtype; LN params/biases stay f32
        return w.astype(compute_dtype)

    def split_qkv(w):       # (D, D) -> (n_head, D, d_k): heads on a leading axis
        return cast_w(w).reshape(D, n_head, d_k).transpose(1, 0, 2)

    def split_fc(w):        # (D, D) -> (n_head, d_k, D)
        return cast_w(w).reshape(n_head, d_k, D)

    s_wq, s_wk, s_wv, s_wfc, s_g, s_b = params["slf_attn"]
    c_wq, c_wk, c_wv, c_wfc, c_g, c_b = params["enc_attn"]
    f_w1, f_b1, f_w2, f_b2, f_g, f_b = params["pos_ffn"]
    s_wq, s_wk, s_wv = map(split_qkv, (s_wq, s_wk, s_wv))
    c_wq, c_wk, c_wv = map(split_qkv, (c_wq, c_wk, c_wv))
    s_wfc, c_wfc = split_fc(s_wfc), split_fc(c_wfc)
    f_w1, f_w2 = cast_w(f_w1), cast_w(f_w2)

    has_smask = slf_attn_mask is not None
    has_emask = dec_enc_attn_mask is not None
    if has_smask:
        smask = (slf_attn_mask != 0).astype(jnp.int8)   # 4x less mask DMA than f32
        smask_shape, smask_map = (1, block_q, Ld), (lambda b, qi: (b, qi, 0))
    else:  # tiny placeholder; never read inside the kernel (no mask DMA / bias)
        smask = jnp.zeros((1, 1, 1), jnp.int8)
        smask_shape, smask_map = (1, 1, 1), (lambda b, qi: (0, 0, 0))
    if has_emask:
        emask = (dec_enc_attn_mask != 0).astype(jnp.int8)
        emask_shape, emask_map = (1, block_q, Le), (lambda b, qi: (b, qi, 0))
    else:
        emask = jnp.zeros((1, 1, 1), jnp.int8)
        emask_shape, emask_map = (1, 1, 1), (lambda b, qi: (0, 0, 0))

    # VMEM budget sized to the working set (cap at 64 MiB so it is v7x-legal).
    bpw = jnp.dtype(compute_dtype).itemsize
    bpa = jnp.dtype(attn_dtype).itemsize
    est = 8 * D * D * bpw + 2 * D * H * bpw                         # weights
    est += (block_q + Ld + Le) * D * 4 * 2 + block_q * D * 4 * 2    # act blocks (2 bufs)
    if return_attns:
        est += n_head * block_q * (Ld + Le) * bpa * 2               # prob blocks
    est += block_q * H * 4 * 2 + block_q * max(Ld, Le) * 4 * 6      # in-kernel temps
    vmem_limit = int(min(max(2 * est, 32 * 2**20), 64 * 2**20))

    kernel = functools.partial(
        decoder_layer_kernel, n_head=n_head,
        has_slf_mask=has_smask, has_enc_mask=has_emask,
        return_attns=return_attns, compute_dtype=compute_dtype)

    out_dtype = dec_input.dtype
    if return_attns:
        out_shape = (jax.ShapeDtypeStruct((B, Ld, D), out_dtype),
                     jax.ShapeDtypeStruct((B, n_head, Ld, Ld), attn_dtype),
                     jax.ShapeDtypeStruct((B, n_head, Ld, Le), attn_dtype))
        out_specs = (
            pl.BlockSpec((1, block_q, D), lambda b, qi: (b, qi, 0)),
            pl.BlockSpec((1, n_head, block_q, Ld), lambda b, qi: (b, 0, qi, 0)),
            pl.BlockSpec((1, n_head, block_q, Le), lambda b, qi: (b, 0, qi, 0)))
    else:
        out_shape = jax.ShapeDtypeStruct((B, Ld, D), out_dtype)
        out_specs = pl.BlockSpec((1, block_q, D), lambda b, qi: (b, qi, 0))

    def build_in_specs(single_buffer_weights):
        def const_spec(shape):
            zeros = (0,) * len(shape)
            if single_buffer_weights:
                # Grid-invariant weights: one VMEM buffer instead of two.
                return pl.BlockSpec(shape, lambda b, qi: zeros,
                                    pipeline_mode=pl.Buffered(buffer_count=1))
            return pl.BlockSpec(shape, lambda b, qi: zeros)

        w3 = const_spec((n_head, D, d_k))
        wfc3 = const_spec((n_head, d_k, D))
        vD = const_spec((1, D))
        vH = const_spec((1, H))
        return [
            pl.BlockSpec((1, block_q, D), lambda b, qi: (b, qi, 0)),  # dec (Q rows)
            pl.BlockSpec((1, Ld, D), lambda b, qi: (b, 0, 0)),        # dec (K/V, full)
            pl.BlockSpec((1, Le, D), lambda b, qi: (b, 0, 0)),        # enc_output
            pl.BlockSpec(smask_shape, smask_map),
            pl.BlockSpec(emask_shape, emask_map),
            w3, w3, w3, wfc3, vD, vD,                                 # self-attn params
            w3, w3, w3, wfc3, vD, vD,                                 # cross-attn params
            const_spec((D, H)), vH, const_spec((H, D)), vD, vD, vD,   # FFN params
        ]

    args = (dec_input, dec_input, enc_output, smask, emask,
            s_wq, s_wk, s_wv, s_wfc, s_g, s_b,
            c_wq, c_wk, c_wv, c_wfc, c_g, c_b,
            f_w1, f_b1, f_w2, f_b2, f_g, f_b)

    def run(single_buffer_weights):
        return pl.pallas_call(
            kernel,
            out_shape=out_shape,
            grid=(B, nq),
            in_specs=build_in_specs(single_buffer_weights),
            out_specs=out_specs,
            compiler_params=pltpu.CompilerParams(
                dimension_semantics=("parallel", "parallel"),
                vmem_limit_bytes=vmem_limit),
        )(*args)

    try:
        result = run(single_buffer_weights=hasattr(pl, "Buffered"))
    except Exception:
        # Graceful fallback for jax versions without Buffered(1) single-buffering.
        result = run(single_buffer_weights=False)

    if return_attns:
        out, slf_attn, enc_attn = result
        return out, slf_attn, enc_attn
    return result, None, None


# --------------------------- pure-JAX reference --------------------------------


def _mha_ref(q, k, v, params, n_head, mask=None):
    wq, wk, wv, wfc, gamma, beta = params
    B, Lq, D = q.shape
    Lk = k.shape[1]
    d_k = D // n_head
    qp = (q @ wq).reshape(B, Lq, n_head, d_k).transpose(0, 2, 1, 3)
    kp = (k @ wk).reshape(B, Lk, n_head, d_k).transpose(0, 2, 1, 3)
    vp = (v @ wv).reshape(B, Lk, n_head, d_k).transpose(0, 2, 1, 3)
    scores = jnp.einsum("bhqd,bhkd->bhqk", qp / (d_k ** 0.5), kp)
    if mask is not None:
        scores = jnp.where(mask[:, None] == 0, -1e9, scores)
    attn = jax.nn.softmax(scores, axis=-1)
    o = jnp.einsum("bhqk,bhkd->bhqd", attn, vp)
    o = o.transpose(0, 2, 1, 3).reshape(B, Lq, D) @ wfc
    x = o + q
    mu = x.mean(-1, keepdims=True)
    var = ((x - mu) ** 2).mean(-1, keepdims=True)
    return (x - mu) / jnp.sqrt(var + 1e-6) * gamma[0] + beta[0], attn


def _ffn_ref(x, params):
    w1, b1, w2, b2, gamma, beta = params
    y = jnp.maximum(x @ w1 + b1[0], 0.0) @ w2 + b2[0] + x
    mu = y.mean(-1, keepdims=True)
    var = ((y - mu) ** 2).mean(-1, keepdims=True)
    return (y - mu) / jnp.sqrt(var + 1e-6) * gamma[0] + beta[0]


def _decoder_ref(dec_input, enc_output, params, n_head,
                 slf_mask=None, enc_mask=None):
    o, a1 = _mha_ref(dec_input, dec_input, dec_input, params["slf_attn"],
                     n_head, slf_mask)
    o, a2 = _mha_ref(o, enc_output, enc_output, params["enc_attn"],
                     n_head, enc_mask)
    return _ffn_ref(o, params["pos_ffn"]), a1, a2


# ---------------------------------- main ---------------------------------------


def _init_params(key, d_model, d_inner):
    ks = jax.random.split(key, 10)

    def lin(k, di, do):
        return 0.05 * jax.random.normal(k, (di, do), jnp.float32)

    def mha_p(k0, k1, k2, k3):
        return (lin(k0, d_model, d_model), lin(k1, d_model, d_model),
                lin(k2, d_model, d_model), lin(k3, d_model, d_model),
                jnp.ones((1, d_model), jnp.float32),
                jnp.zeros((1, d_model), jnp.float32))

    ffn_p = (lin(ks[8], d_model, d_inner),
             0.01 * jax.random.normal(ks[9], (1, d_inner), jnp.float32),
             lin(ks[4], d_inner, d_model),
             0.01 * jax.random.normal(ks[5], (1, d_model), jnp.float32),
             jnp.ones((1, d_model), jnp.float32),
             jnp.zeros((1, d_model), jnp.float32))

    return {"slf_attn": mha_p(ks[0], ks[1], ks[2], ks[3]),
            "enc_attn": mha_p(ks[6], ks[7], ks[2], ks[1]),
            "pos_ffn": ffn_p}


if __name__ == "__main__":
    # NOTE: perf tuning should be judged at D>=128, Lq tile >=128 and >=8 grid
    # steps; these small shapes are for correctness only.
    B, L_dec, L_enc = 2, 8, 8
    d_model, d_inner, n_head = 32, 64, 4

    key = jax.random.PRNGKey(0)
    k_in, k_enc, k_par = jax.random.split(key, 3)
    dec_input = jax.random.normal(k_in, (B, L_dec, d_model), jnp.float32)
    enc_output = jax.random.normal(k_enc, (B, L_enc, d_model), jnp.float32)
    params = _init_params(k_par, d_model, d_inner)

    # Causal mask for self-attention; cross-attention unmasked (mask=None path).
    slf_mask = jnp.broadcast_to(
        jnp.tril(jnp.ones((L_dec, L_dec), jnp.float32)), (B, L_dec, L_dec))

    # f32 path: tight correctness check vs. pure-JAX reference (dropout == id).
    dec_out, slf_attn, enc_attn = decoder_layer(
        dec_input, enc_output, params, n_head, slf_attn_mask=slf_mask,
        compute_dtype=jnp.float32)
    jax.block_until_ready((dec_out, slf_attn, enc_attn))

    ref_out, ref_slf, ref_enc = _decoder_ref(
        dec_input, enc_output, params, n_head, slf_mask=slf_mask)
    assert jnp.allclose(dec_out, ref_out, rtol=1e-4, atol=1e-4)
    assert jnp.allclose(slf_attn, ref_slf, rtol=1e-4, atol=1e-4)
    assert jnp.allclose(enc_attn, ref_enc, rtol=1e-4, atol=1e-4)

    # Default bf16 MXU path (recommended on v5e/v6e/v7x); loose check vs. f32 ref.
    out_bf16, _, _ = decoder_layer(
        dec_input, enc_output, params, n_head, slf_attn_mask=slf_mask)
    jax.block_until_ready(out_bf16)
    assert jnp.allclose(out_bf16.astype(jnp.float32), ref_out, rtol=1e-1, atol=1e-1)

    # Attention-prob-free path (skips the dominant HBM writeback entirely).
    out_np, _, _ = decoder_layer(
        dec_input, enc_output, params, n_head, slf_attn_mask=slf_mask,
        compute_dtype=jnp.float32, return_attns=False)
    jax.block_until_ready(out_np)
    assert jnp.allclose(out_np, ref_out, rtol=1e-4, atol=1e-4)

    print("KERNEL_OK")
</pallas_src>

<mosaic_0001>
module attributes {stable_mosaic.version = 11 : i64} {
  func.func @decoder_layer_kernel(%arg0: i32, %arg1: i32, %arg2: memref<1x8x32xf32, #tpu.memory_space<vmem>>, %arg3: memref<1x8x32xf32, #tpu.memory_space<vmem>>, %arg4: memref<1x8x32xf32, #tpu.memory_space<vmem>>, %arg5: memref<1x8x8xi8, #tpu.memory_space<vmem>>, %arg6: memref<1x1x1xi8, #tpu.memory_space<vmem>>, %arg7: memref<4x32x8xf32, #tpu.memory_space<vmem>>, %arg8: memref<4x32x8xf32, #tpu.memory_space<vmem>>, %arg9: memref<4x32x8xf32, #tpu.memory_space<vmem>>, %arg10: memref<4x8x32xf32, #tpu.memory_space<vmem>>, %arg11: memref<1x32xf32, #tpu.memory_space<vmem>>, %arg12: memref<1x32xf32, #tpu.memory_space<vmem>>, %arg13: memref<4x32x8xf32, #tpu.memory_space<vmem>>, %arg14: memref<4x32x8xf32, #tpu.memory_space<vmem>>, %arg15: memref<4x32x8xf32, #tpu.memory_space<vmem>>, %arg16: memref<4x8x32xf32, #tpu.memory_space<vmem>>, %arg17: memref<1x32xf32, #tpu.memory_space<vmem>>, %arg18: memref<1x32xf32, #tpu.memory_space<vmem>>, %arg19: memref<32x64xf32, #tpu.memory_space<vmem>>, %arg20: memref<1x64xf32, #tpu.memory_space<vmem>>, %arg21: memref<64x32xf32, #tpu.memory_space<vmem>>, %arg22: memref<1x32xf32, #tpu.memory_space<vmem>>, %arg23: memref<1x32xf32, #tpu.memory_space<vmem>>, %arg24: memref<1x32xf32, #tpu.memory_space<vmem>>, %arg25: memref<1x8x32xf32, #tpu.memory_space<vmem>>, %arg26: memref<1x4x8x8xf32, #tpu.memory_space<vmem>>, %arg27: memref<1x4x8x8xf32, #tpu.memory_space<vmem>>) attributes {dimension_semantics = [#tpu.dimension_semantics<parallel>, #tpu.dimension_semantics<parallel>], iteration_bounds = array<i64: 2, 1>, scalar_prefetch = 0 : i64, scratch_operands = 0 : i64, tpu.core_type = #tpu.core_type<tc>, window_params = [{transform_indices = @transform_0, window_bounds = array<i64: 1, 8, 32>}, {transform_indices = @transform_1, window_bounds = array<i64: 1, 8, 32>}, {transform_indices = @transform_2, window_bounds = array<i64: 1, 8, 32>}, {transform_indices = @transform_3, window_bounds = array<i64: 1, 8, 8>}, {pipeline_mode = #tpu.pipeline_mode<synchronous>, transform_indices = @transform_4, window_bounds = array<i64: 1, 1, 1>}, {pipeline_mode = #tpu.pipeline_mode<synchronous>, transform_indices = @transform_5, window_bounds = array<i64: 4, 32, 8>}, {pipeline_mode = #tpu.pipeline_mode<synchronous>, transform_indices = @transform_6, window_bounds = array<i64: 4, 32, 8>}, {pipeline_mode = #tpu.pipeline_mode<synchronous>, transform_indices = @transform_7, window_bounds = array<i64: 4, 32, 8>}, {pipeline_mode = #tpu.pipeline_mode<synchronous>, transform_indices = @transform_8, window_bounds = array<i64: 4, 8, 32>}, {pipeline_mode = #tpu.pipeline_mode<synchronous>, transform_indices = @transform_9, window_bounds = array<i64: 1, 32>}, {pipeline_mode = #tpu.pipeline_mode<synchronous>, transform_indices = @transform_10, window_bounds = array<i64: 1, 32>}, {pipeline_mode = #tpu.pipeline_mode<synchronous>, transform_indices = @transform_11, window_bounds = array<i64: 4, 32, 8>}, {pipeline_mode = #tpu.pipeline_mode<synchronous>, transform_indices = @transform_12, window_bounds = array<i64: 4, 32, 8>}, {pipeline_mode = #tpu.pipeline_mode<synchronous>, transform_indices = @transform_13, window_bounds = array<i64: 4, 32, 8>}, {pipeline_mode = #tpu.pipeline_mode<synchronous>, transform_indices = @transform_14, window_bounds = array<i64: 4, 8, 32>}, {pipeline_mode = #tpu.pipeline_mode<synchronous>, transform_indices = @transform_15, window_bounds = array<i64: 1, 32>}, {pipeline_mode = #tpu.pipeline_mode<synchronous>, transform_indices = @transform_16, window_bounds = array<i64: 1, 32>}, {pipeline_mode = #tpu.pipeline_mode<synchronous>, transform_indices = @transform_17, window_bounds = array<i64: 32, 64>}, {pipeline_mode = #tpu.pipeline_mode<synchronous>, transform_indices = @transform_18, window_bounds = array<i64: 1, 64>}, {pipeline_mode = #tpu.pipeline_mode<synchronous>, transform_indices = @transform_19, window_bounds = array<i64: 64, 32>}, {pipeline_mode = #tpu.pipeline_mode<synchronous>, transform_indices = @transform_20, window_bounds = array<i64: 1, 32>}, {pipeline_mode = #tpu.pipeline_mode<synchronous>, transform_indices = @transform_21, window_bounds = array<i64: 1, 32>}, {pipeline_mode = #tpu.pipeline_mode<synchronous>, transform_indices = @transform_22, window_bounds = array<i64: 1, 32>}, {transform_indices = @transform_23, window_bounds = array<i64: 1, 8, 32>}, {transform_indices = @transform_24, window_bounds = array<i64: 1, 4, 8, 8>}, {transform_indices = @transform_25, window_bounds = array<i64: 1, 4, 8, 8>}]} {
    %c0 = arith.constant 0 : index
    %c0_0 = arith.constant 0 : index
    %c0_1 = arith.constant 0 : index
    %0 = vector.load %arg2[%c0, %c0_0, %c0_1] : memref<1x8x32xf32, #tpu.memory_space<vmem>>, vector<1x8x32xf32>
    %1 = vector.shape_cast %0 : vector<1x8x32xf32> to vector<8x32xf32>
    %c0_2 = arith.constant 0 : index
    %c0_3 = arith.constant 0 : index
    %c0_4 = arith.constant 0 : index
    %2 = vector.load %arg3[%c0_2, %c0_3, %c0_4] : memref<1x8x32xf32, #tpu.memory_space<vmem>>, vector<1x8x32xf32>
    %3 = vector.shape_cast %2 : vector<1x8x32xf32> to vector<8x32xf32>
    %c0_5 = arith.constant 0 : index
    %c0_6 = arith.constant 0 : index
    %c0_7 = arith.constant 0 : index
    %4 = vector.load %arg4[%c0_5, %c0_6, %c0_7] : memref<1x8x32xf32, #tpu.memory_space<vmem>>, vector<1x8x32xf32>
    %5 = vector.shape_cast %4 : vector<1x8x32xf32> to vector<8x32xf32>
    %c0_8 = arith.constant 0 : index
    %c0_9 = arith.constant 0 : index
    %c0_10 = arith.constant 0 : index
    %6 = vector.load %arg5[%c0_8, %c0_9, %c0_10] : memref<1x8x8xi8, #tpu.memory_space<vmem>>, vector<1x8x8xi8>
    %7 = vector.shape_cast %6 : vector<1x8x8xi8> to vector<8x8xi8>
    %8 = arith.sitofp %7 : vector<8x8xi8> to vector<8x8xf32>
    %cst = arith.constant 0.000000e+00 : f32
    %9 = vector.broadcast %cst : f32 to vector<8x8xf32>
    %10 = arith.cmpf oeq, %8, %9 : vector<8x8xf32>
    %cst_11 = arith.constant -1.000000e+09 : f32
    %cst_12 = arith.constant 0.000000e+00 : f32
    %11 = vector.broadcast %cst_11 : f32 to vector<8x8xf32>
    %12 = vector.broadcast %cst_12 : f32 to vector<8x8xf32>
    %13 = arith.select %10, %11, %12 : vector<8x8xi1>, vector<8x8xf32>
    %c0_13 = arith.constant 0 : index
    %c0_14 = arith.constant 0 : index
    %c0_15 = arith.constant 0 : index
    %14 = vector.load %arg7[%c0_13, %c0_14, %c0_15] : memref<4x32x8xf32, #tpu.memory_space<vmem>>, vector<1x32x8xf32>
    %15 = vector.shape_cast %14 : vector<1x32x8xf32> to vector<32x8xf32>
    %cst_16 = arith.constant dense<0.000000e+00> : vector<8x8xf32>
    %16 = tpu.matmul %1, %15, %cst_16 {dimension_numbers = #tpu.dot_dimension_numbers<[1], [0], [0], [1], [0, 0, 1, 1], [], []>} : vector<8x32xf32>, vector<32x8xf32>, vector<8x8xf32> -> vector<8x8xf32>
    %cst_17 = arith.constant 0.353553385 : f32
    %17 = vector.broadcast %cst_17 : f32 to vector<8x8xf32>
    %18 = arith.mulf %16, %17 : vector<8x8xf32>
    %c0_18 = arith.constant 0 : index
    %c0_19 = arith.constant 0 : index
    %c0_20 = arith.constant 0 : index
    %19 = vector.load %arg8[%c0_18, %c0_19, %c0_20] : memref<4x32x8xf32, #tpu.memory_space<vmem>>, vector<1x32x8xf32>
    %20 = vector.shape_cast %19 : vector<1x32x8xf32> to vector<32x8xf32>
    %cst_21 = arith.constant dense<0.000000e+00> : vector<8x8xf32>
    %21 = tpu.matmul %3, %20, %cst_21 {dimension_numbers = #tpu.dot_dimension_numbers<[1], [0], [0], [1], [0, 0, 1, 1], [], []>} : vector<8x32xf32>, vector<32x8xf32>, vector<8x8xf32> -> vector<8x8xf32>
    %c0_22 = arith.constant 0 : index
    %c0_23 = arith.constant 0 : index
    %c0_24 = arith.constant 0 : index
    %22 = vector.load %arg9[%c0_22, %c0_23, %c0_24] : memref<4x32x8xf32, #tpu.memory_space<vmem>>, vector<1x32x8xf32>
    %23 = vector.shape_cast %22 : vector<1x32x8xf32> to vector<32x8xf32>
    %cst_25 = arith.constant dense<0.000000e+00> : vector<8x8xf32>
    %24 = tpu.matmul %3, %23, %cst_25 {dimension_numbers = #tpu.dot_dimension_numbers<[1], [0], [0], [1], [0, 0, 1, 1], [], []>} : vector<8x32xf32>, vector<32x8xf32>, vector<8x8xf32> -> vector<8x8xf32>
    %cst_26 = arith.constant dense<0.000000e+00> : vector<8x8xf32>
    %25 = tpu.matmul %18, %21, %cst_26 {dimension_numbers = #tpu.dot_dimension_numbers<[1], [1], [0], [0], [0, 0, 1, 0], [], []>} : vector<8x8xf32>, vector<8x8xf32>, vector<8x8xf32> -> vector<8x8xf32>
    %26 = arith.addf %25, %13 : vector<8x8xf32>
    %cst_27 = arith.constant dense<0xFF800000> : vector<8xf32>
    %27 = vector.multi_reduction <maximumf>, %26, %cst_27 [1] : vector<8x8xf32> to vector<8xf32>
    %28 = vector.shape_cast %27 : vector<8xf32> to vector<8x1xf32>
    %29 = vector.broadcast %28 : vector<8x1xf32> to vector<8x8xf32>
    %30 = arith.subf %26, %29 : vector<8x8xf32>
    %31 = math.exp %30 : vector<8x8xf32>
    %cst_28 = arith.constant dense<0.000000e+00> : vector<8xf32>
    %32 = vector.multi_reduction <add>, %31, %cst_28 [1] : vector<8x8xf32> to vector<8xf32>
    %33 = vector.shape_cast %32 : vector<8xf32> to vector<8x1xf32>
    %34 = tpu.reciprocal %33 {approx = true} : vector<8x1xf32> -> vector<8x1xf32>
    %35 = arith.mulf %33, %34 : vector<8x1xf32>
    %cst_29 = arith.constant 2.000000e+00 : f32
    %36 = vector.broadcast %cst_29 : f32 to vector<8x1xf32>
    %37 = arith.subf %36, %35 : vector<8x1xf32>
    %38 = arith.mulf %34, %37 : vector<8x1xf32>
    %39 = vector.broadcast %38 : vector<8x1xf32> to vector<8x8xf32>
    %40 = arith.mulf %31, %39 : vector<8x8xf32>
    %c0_30 = arith.constant 0 : index
    %c0_31 = arith.constant 0 : index
    %c0_32 = arith.constant 0 : index
    %c0_33 = arith.constant 0 : index
    %41 = vector.load %arg26[%c0_30, %c0_31, %c0_32, %c0_33] : memref<1x4x8x8xf32, #tpu.memory_space<vmem>>, vector<1x1x8x8xf32>
    %42 = vector.shape_cast %41 : vector<1x1x8x8xf32> to vector<8x8xf32>
    %43 = vector.shape_cast %40 : vector<8x8xf32> to vector<1x1x8x8xf32>
    tpu.vector_store %arg26[%c0_30, %c0_31, %c0_32, %c0_33], %43 {strides = array<i32>} : memref<1x4x8x8xf32, #tpu.memory_space<vmem>>, vector<1x1x8x8xf32>,
    %cst_34 = arith.constant dense<0.000000e+00> : vector<8x8xf32>
    %44 = tpu.matmul %40, %24, %cst_34 {dimension_numbers = #tpu.dot_dimension_numbers<[1], [0], [0], [1], [0, 0, 1, 1], [], []>} : vector<8x8xf32>, vector<8x8xf32>, vector<8x8xf32> -> vector<8x8xf32>
    %c0_35 = arith.constant 0 : index
    %c0_36 = arith.constant 0 : index
    %c0_37 = arith.constant 0 : index
    %45 = vector.load %arg10[%c0_35, %c0_36, %c0_37] : memref<4x8x32xf32, #tpu.memory_space<vmem>>, vector<1x8x32xf32>
    %46 = vector.shape_cast %45 : vector<1x8x32xf32> to vector<8x32xf32>
    %cst_38 = arith.constant dense<0.000000e+00> : vector<8x32xf32>
    %47 = tpu.matmul %44, %46, %cst_38 {dimension_numbers = #tpu.dot_dimension_numbers<[1], [0], [0], [1], [0, 0, 1, 1], [], []>} : vector<8x8xf32>, vector<8x32xf32>, vector<8x32xf32> -> vector<8x32xf32>
    %c1 = arith.constant 1 : index
    %c0_39 = arith.constant 0 : index
    %c0_40 = arith.constant 0 : index
    %48 = vector.load %arg7[%c1, %c0_39, %c0_40] : memref<4x32x8xf32, #tpu.memory_space<vmem>>, vector<1x32x8xf32>
    %49 = vector.shape_cast %48 : vector<1x32x8xf32> to vector<32x8xf32>
    %cst_41 = arith.constant dense<0.000000e+00> : vector<8x8xf32>
    %50 = tpu.matmul %1, %49, %cst_41 {dimension_numbers = #tpu.dot_dimension_numbers<[1], [0], [0], [1], [0, 0, 1, 1], [], []>} : vector<8x32xf32>, vector<32x8xf32>, vector<8x8xf32> -> vector<8x8xf32>
    %cst_42 = arith.constant 0.353553385 : f32
    %51 = vector.broadcast %cst_42 : f32 to vector<8x8xf32>
    %52 = arith.mulf %50, %51 : vector<8x8xf32>
    %c1_43 = arith.constant 1 : index
    %c0_44 = arith.constant 0 : index
    %c0_45 = arith.constant 0 : index
    %53 = vector.load %arg8[%c1_43, %c0_44, %c0_45] : memref<4x32x8xf32, #tpu.memory_space<vmem>>, vector<1x32x8xf32>
    %54 = vector.shape_cast %53 : vector<1x32x8xf32> to vector<32x8xf32>
    %cst_46 = arith.constant dense<0.000000e+00> : vector<8x8xf32>
    %55 = tpu.matmul %3, %54, %cst_46 {dimension_numbers = #tpu.dot_dimension_numbers<[1], [0], [0], [1], [0, 0, 1, 1], [], []>} : vector<8x32xf32>, vector<32x8xf32>, vector<8x8xf32> -> vector<8x8xf32>
    %c1_47 = arith.constant 1 : index
    %c0_48 = arith.constant 0 : index
    %c0_49 = arith.constant 0 : index
    %56 = vector.load %arg9[%c1_47, %c0_48, %c0_49] : memref<4x32x8xf32, #tpu.memory_space<vmem>>, vector<1x32x8xf32>
    %57 = vector.shape_cast %56 : vector<1x32x8xf32> to vector<32x8xf32>
    %cst_50 = arith.constant dense<0.000000e+00> : vector<8x8xf32>
    %58 = tpu.matmul %3, %57, %cst_50 {dimension_numbers = #tpu.dot_dimension_numbers<[1], [0], [0], [1], [0, 0, 1, 1], [], []>} : vector<8x32xf32>, vector<32x8xf32>, vector<8x8xf32> -> vector<8x8xf32>
    %cst_51 = arith.constant dense<0.000000e+00> : vector<8x8xf32>
    %59 = tpu.matmul %52, %55, %cst_51 {dimension_numbers = #tpu.dot_dimension_numbers<[1], [1], [0], [0], [0, 0, 1, 0], [], []>} : vector<8x8xf32>, vector<8x8xf32>, vector<8x8xf32> -> vector<8x8xf32>
    %60 = arith.addf %59, %13 : vector<8x8xf32>
    %cst_52 = arith.constant dense<0xFF800000> : vector<8xf32>
    %61 = vector.multi_reduction <maximumf>, %60, %cst_52 [1] : vector<8x8xf32> to vector<8xf32>
    %62 = vector.shape_cast %61 : vector<8xf32> to vector<8x1xf32>
    %63 = vector.broadcast %62 : vector<8x1xf32> to vector<8x8xf32>
    %64 = arith.subf %60, %63 : vector<8x8xf32>
    %65 = math.exp %64 : vector<8x8xf32>
    %cst_53 = arith.constant dense<0.000000e+00> : vector<8xf32>
    %66 = vector.multi_reduction <add>, %65, %cst_53 [1] : vector<8x8xf32> to vector<8xf32>
    %67 = vector.shape_cast %66 : vector<8xf32> to vector<8x1xf32>
    %68 = tpu.reciprocal %67 {approx = true} : vector<8x1xf32> -> vector<8x1xf32>
    %69 = arith.mulf %67, %68 : vector<8x1xf32>
    %cst_54 = arith.constant 2.000000e+00 : f32
    %70 = vector.broadcast %cst_54 : f32 to vector<8x1xf32>
    %71 = arith.subf %70, %69 : vector<8x1xf32>
    %72 = arith.mulf %68, %71 : vector<8x1xf32>
    %73 = vector.broadcast %72 : vector<8x1xf32> to vector<8x8xf32>
    %74 = arith.mulf %65, %73 : vector<8x8xf32>
    %c0_55 = arith.constant 0 : index
    %c1_56 = arith.constant 1 : index
    %c0_57 = arith.constant 0 : index
    %c0_58 = arith.constant 0 : index
    %75 = vector.load %arg26[%c0_55, %c1_56, %c0_57, %c0_58] : memref<1x4x8x8xf32, #tpu.memory_space<vmem>>, vector<1x1x8x8xf32>
    %76 = vector.shape_cast %75 : vector<1x1x8x8xf32> to vector<8x8xf32>
    %77 = vector.shape_cast %74 : vector<8x8xf32> to vector<1x1x8x8xf32>
    tpu.vector_store %arg26[%c0_55, %c1_56, %c0_57, %c0_58], %77 {strides = array<i32>} : memref<1x4x8x8xf32, #tpu.memory_space<vmem>>, vector<1x1x8x8xf32>,
    %cst_59 = arith.constant dense<0.000000e+00> : vector<8x8xf32>
    %78 = tpu.matmul %74, %58, %cst_59 {dimension_numbers = #tpu.dot_dimension_numbers<[1], [0], [0], [1], [0, 0, 1, 1], [], []>} : vector<8x8xf32>, vector<8x8xf32>, vector<8x8xf32> -> vector<8x8xf32>
    %c1_60 = arith.constant 1 : index
    %c0_61 = arith.constant 0 : index
    %c0_62 = arith.constant 0 : index
    %79 = vector.load %arg10[%c1_60, %c0_61, %c0_62] : memref<4x8x32xf32, #tpu.memory_space<vmem>>, vector<1x8x32xf32>
    %80 = vector.shape_cast %79 : vector<1x8x32xf32> to vector<8x32xf32>
    %cst_63 = arith.constant dense<0.000000e+00> : vector<8x32xf32>
    %81 = tpu.matmul %78, %80, %cst_63 {dimension_numbers = #tpu.dot_dimension_numbers<[1], [0], [0], [1], [0, 0, 1, 1], [], []>} : vector<8x8xf32>, vector<8x32xf32>, vector<8x32xf32> -> vector<8x32xf32>
    %82 = arith.addf %47, %81 : vector<8x32xf32>
    %c2 = arith.constant 2 : index
    %c0_64 = arith.constant 0 : index
    %c0_65 = arith.constant 0 : index
    %83 = vector.load %arg7[%c2, %c0_64, %c0_65] : memref<4x32x8xf32, #tpu.memory_space<vmem>>, vector<1x32x8xf32>
    %84 = vector.shape_cast %83 : vector<1x32x8xf32> to vector<32x8xf32>
    %cst_66 = arith.constant dense<0.000000e+00> : vector<8x8xf32>
    %85 = tpu.matmul %1, %84, %cst_66 {dimension_numbers = #tpu.dot_dimension_numbers<[1], [0], [0], [1], [0, 0, 1, 1], [], []>} : vector<8x32xf32>, vector<32x8xf32>, vector<8x8xf32> -> vector<8x8xf32>
    %cst_67 = arith.constant 0.353553385 : f32
    %86 = vector.broadcast %cst_67 : f32 to vector<8x8xf32>
    %87 = arith.mulf %85, %86 : vector<8x8xf32>
    %c2_68 = arith.constant 2 : index
    %c0_69 = arith.constant 0 : index
    %c0_70 = arith.constant 0 : index
    %88 = vector.load %arg8[%c2_68, %c0_69, %c0_70] : memref<4x32x8xf32, #tpu.memory_space<vmem>>, vector<1x32x8xf32>
    %89 = vector.shape_cast %88 : vector<1x32x8xf32> to vector<32x8xf32>
    %cst_71 = arith.constant dense<0.000000e+00> : vector<8x8xf32>
    %90 = tpu.matmul %3, %89, %cst_71 {dimension_numbers = #tpu.dot_dimension_numbers<[1], [0], [0], [1], [0, 0, 1, 1], [], []>} : vector<8x32xf32>, vector<32x8xf32>, vector<8x8xf32> -> vector<8x8xf32>
    %c2_72 = arith.constant 2 : index
    %c0_73 = arith.constant 0 : index
    %c0_74 = arith.constant 0 : index
    %91 = vector.load %arg9[%c2_72, %c0_73, %c0_74] : memref<4x32x8xf32, #tpu.memory_space<vmem>>, vector<1x32x8xf32>
    %92 = vector.shape_cast %91 : vector<1x32x8xf32> to vector<32x8xf32>
    %cst_75 = arith.constant dense<0.000000e+00> : vector<8x8xf32>
    %93 = tpu.matmul %3, %92, %cst_75 {dimension_numbers = #tpu.dot_dimension_numbers<[1], [0], [0], [1], [0, 0, 1, 1], [], []>} : vector<8x32xf32>, vector<32x8xf32>, vector<8x8xf32> -> vector<8x8xf32>
    %cst_76 = arith.constant dense<0.000000e+00> : vector<8x8xf32>
    %94 = tpu.matmul %87, %90, %cst_76 {dimension_numbers = #tpu.dot_dimension_numbers<[1], [1], [0], [0], [0, 0, 1, 0], [], []>} : vector<8x8xf32>, vector<8x8xf32>, vector<8x8xf32> -> vector<8x8xf32>
    %95 = arith.addf %94, %13 : vector<8x8xf32>
    %cst_77 = arith.constant dense<0xFF800000> : vector<8xf32>
    %96 = vector.multi_reduction <maximumf>, %95, %cst_77 [1] : vector<8x8xf32> to vector<8xf32>
    %97 = vector.shape_cast %96 : vector<8xf32> to vector<8x1xf32>
    %98 = vector.broadcast %97 : vector<8x1xf32> to vector<8x8xf32>
    %99 = arith.subf %95, %98 : vector<8x8xf32>
    %100 = math.exp %99 : vector<8x8xf32>
    %cst_78 = arith.constant dense<0.000000e+00> : vector<8xf32>
    %101 = vector.multi_reduction <add>, %100, %cst_78 [1] : vector<8x8xf32> to vector<8xf32>
    %102 = vector.shape_cast %101 : vector<8xf32> to vector<8x1xf32>
    %103 = tpu.reciprocal %102 {approx = true} : vector<8x1xf32> -> vector<8x1xf32>
    %104 = arith.mulf %102, %103 : vector<8x1xf32>
    %cst_79 = arith.constant 2.000000e+00 : f32
    %105 = vector.broadcast %cst_79 : f32 to vector<8x1xf32>
    %106 = arith.subf %105, %104 : vector<8x1xf32>
    %107 = arith.mulf %103, %106 : vector<8x1xf32>
    %108 = vector.broadcast %107 : vector<8x1xf32> to vector<8x8xf32>
    %109 = arith.mulf %100, %108 : vector<8x8xf32>
    %c0_80 = arith.constant 0 : index
    %c2_81 = arith.constant 2 : index
    %c0_82 = arith.constant 0 : index
    %c0_83 = arith.constant 0 : index
    %110 = vector.load %arg26[%c0_80, %c2_81, %c0_82, %c0_83] : memref<1x4x8x8xf32, #tpu.memory_space<vmem>>, vector<1x1x8x8xf32>
    %111 = vector.shape_cast %110 : vector<1x1x8x8xf32> to vector<8x8xf32>
    %112 = vector.shape_cast %109 : vector<8x8xf32> to vector<1x1x8x8xf32>
    tpu.vector_store %arg26[%c0_80, %c2_81, %c0_82, %c0_83], %112 {strides = array<i32>} : memref<1x4x8x8xf32, #tpu.memory_space<vmem>>, vector<1x1x8x8xf32>,
    %cst_84 = arith.constant dense<0.000000e+00> : vector<8x8xf32>
    %113 = tpu.matmul %109, %93, %cst_84 {dimension_numbers = #tpu.dot_dimension_numbers<[1], [0], [0], [1], [0, 0, 1, 1], [], []>} : vector<8x8xf32>, vector<8x8xf32>, vector<8x8xf32> -> vector<8x8xf32>
    %c2_85 = arith.constant 2 : index
    %c0_86 = arith.constant 0 : index
    %c0_87 = arith.constant 0 : index
    %114 = vector.load %arg10[%c2_85, %c0_86, %c0_87] : memref<4x8x32xf32, #tpu.memory_space<vmem>>, vector<1x8x32xf32>
    %115 = vector.shape_cast %114 : vector<1x8x32xf32> to vector<8x32xf32>
    %cst_88 = arith.constant dense<0.000000e+00> : vector<8x32xf32>
    %116 = tpu.matmul %113, %115, %cst_88 {dimension_numbers = #tpu.dot_dimension_numbers<[1], [0], [0], [1], [0, 0, 1, 1], [], []>} : vector<8x8xf32>, vector<8x32xf32>, vector<8x32xf32> -> vector<8x32xf32>
    %117 = arith.addf %82, %116 : vector<8x32xf32>
    %c3 = arith.constant 3 : index
    %c0_89 = arith.constant 0 : index
    %c0_90 = arith.constant 0 : index
    %118 = vector.load %arg7[%c3, %c0_89, %c0_90] : memref<4x32x8xf32, #tpu.memory_space<vmem>>, vector<1x32x8xf32>
    %119 = vector.shape_cast %118 : vector<1x32x8xf32> to vector<32x8xf32>
    %cst_91 = arith.constant dense<0.000000e+00> : vector<8x8xf32>
    %120 = tpu.matmul %1, %119, %cst_91 {dimension_numbers = #tpu.dot_dimension_numbers<[1], [0], [0], [1], [0, 0, 1, 1], [], []>} : vector<8x32xf32>, vector<32x8xf32>, vector<8x8xf32> -> vector<8x8xf32>
    %cst_92 = arith.constant 0.353553385 : f32
    %121 = vector.broadcast %cst_92 : f32 to vector<8x8xf32>
    %122 = arith.mulf %120, %121 : vector<8x8xf32>
    %c3_93 = arith.constant 3 : index
    %c0_94 = arith.constant 0 : index
    %c0_95 = arith.constant 0 : index
    %123 = vector.load %arg8[%c3_93, %c0_94, %c0_95] : memref<4x32x8xf32, #tpu.memory_space<vmem>>, vector<1x32x8xf32>
    %124 = vector.shape_cast %123 : vector<1x32x8xf32> to vector<32x8xf32>
    %cst_96 = arith.constant dense<0.000000e+00> : vector<8x8xf32>
    %125 = tpu.matmul %3, %124, %cst_96 {dimension_numbers = #tpu.dot_dimension_numbers<[1], [0], [0], [1], [0, 0, 1, 1], [], []>} : vector<8x32xf32>, vector<32x8xf32>, vector<8x8xf32> -> vector<8x8xf32>
    %c3_97 = arith.constant 3 : index
    %c0_98 = arith.constant 0 : index
    %c0_99 = arith.constant 0 : index
    %126 = vector.load %arg9[%c3_97, %c0_98, %c0_99] : memref<4x32x8xf32, #tpu.memory_space<vmem>>, vector<1x32x8xf32>
    %127 = vector.shape_cast %126 : vector<1x32x8xf32> to vector<32x8xf32>
    %cst_100 = arith.constant dense<0.000000e+00> : vector<8x8xf32>
    %128 = tpu.matmul %3, %127, %cst_100 {dimension_numbers = #tpu.dot_dimension_numbers<[1], [0], [0], [1], [0, 0, 1, 1], [], []>} : vector<8x32xf32>, vector<32x8xf32>, vector<8x8xf32> -> vector<8x8xf32>
    %cst_101 = arith.constant dense<0.000000e+00> : vector<8x8xf32>
    %129 = tpu.matmul %122, %125, %cst_101 {dimension_numbers = #tpu.dot_dimension_numbers<[1], [1], [0], [0], [0, 0, 1, 0], [], []>} : vector<8x8xf32>, vector<8x8xf32>, vector<8x8xf32> -> vector<8x8xf32>
    %130 = arith.addf %129, %13 : vector<8x8xf32>
    %cst_102 = arith.constant dense<0xFF800000> : vector<8xf32>
    %131 = vector.multi_reduction <maximumf>, %130, %cst_102 [1] : vector<8x8xf32> to vector<8xf32>
    %132 = vector.shape_cast %131 : vector<8xf32> to vector<8x1xf32>
    %133 = vector.broadcast %132 : vector<8x1xf32> to vector<8x8xf32>
    %134 = arith.subf %130, %133 : vector<8x8xf32>
    %135 = math.exp %134 : vector<8x8xf32>
    %cst_103 = arith.constant dense<0.000000e+00> : vector<8xf32>
    %136 = vector.multi_reduction <add>, %135, %cst_103 [1] : vector<8x8xf32> to vector<8xf32>
    %137 = vector.shape_cast %136 : vector<8xf32> to vector<8x1xf32>
    %138 = tpu.reciprocal %137 {approx = true} : vector<8x1xf32> -> vector<8x1xf32>
    %139 = arith.mulf %137, %138 : vector<8x1xf32>
    %cst_104 = arith.constant 2.000000e+00 : f32
    %140 = vector.broadcast %cst_104 : f32 to vector<8x1xf32>
    %141 = arith.subf %140, %139 : vector<8x1xf32>
    %142 = arith.mulf %138, %141 : vector<8x1xf32>
    %143 = vector.broadcast %142 : vector<8x1xf32> to vector<8x8xf32>
    %144 = arith.mulf %135, %143 : vector<8x8xf32>
    %c0_105 = arith.constant 0 : index
    %c3_106 = arith.constant 3 : index
    %c0_107 = arith.constant 0 : index
    %c0_108 = arith.constant 0 : index
    %145 = vector.load %arg26[%c0_105, %c3_106, %c0_107, %c0_108] : memref<1x4x8x8xf32, #tpu.memory_space<vmem>>, vector<1x1x8x8xf32>
    %146 = vector.shape_cast %145 : vector<1x1x8x8xf32> to vector<8x8xf32>
    %147 = vector.shape_cast %144 : vector<8x8xf32> to vector<1x1x8x8xf32>
    tpu.vector_store %arg26[%c0_105, %c3_106, %c0_107, %c0_108], %147 {strides = array<i32>} : memref<1x4x8x8xf32, #tpu.memory_space<vmem>>, vector<1x1x8x8xf32>,
    %cst_109 = arith.constant dense<0.000000e+00> : vector<8x8xf32>
    %148 = tpu.matmul %144, %128, %cst_109 {dimension_numbers = #tpu.dot_dimension_numbers<[1], [0], [0], [1], [0, 0, 1, 1], [], []>} : vector<8x8xf32>, vector<8x8xf32>, vector<8x8xf32> -> vector<8x8xf32>
    %c3_110 = arith.constant 3 : index
    %c0_111 = arith.constant 0 : index
    %c0_112 = arith.constant 0 : index
    %149 = vector.load %arg10[%c3_110, %c0_111, %c0_112] : memref<4x8x32xf32, #tpu.memory_space<vmem>>, vector<1x8x32xf32>
    %150 = vector.shape_cast %149 : vector<1x8x32xf32> to vector<8x32xf32>
    %cst_113 = arith.constant dense<0.000000e+00> : vector<8x32xf32>
    %151 = tpu.matmul %148, %150, %cst_113 {dimension_numbers = #tpu.dot_dimension_numbers<[1], [0], [0], [1], [0, 0, 1, 1], [], []>} : vector<8x8xf32>, vector<8x32xf32>, vector<8x32xf32> -> vector<8x32xf32>
    %152 = arith.addf %117, %151 : vector<8x32xf32>
    %153 = arith.addf %152, %1 : vector<8x32xf32>
    %c0_114 = arith.constant 0 : index
    %c0_115 = arith.constant 0 : index
    %154 = vector.load %arg11[%c0_114, %c0_115] : memref<1x32xf32, #tpu.memory_space<vmem>>, vector<1x32xf32>
    %c0_116 = arith.constant 0 : index
    %c0_117 = arith.constant 0 : index
    %155 = vector.load %arg12[%c0_116, %c0_117] : memref<1x32xf32, #tpu.memory_space<vmem>>, vector<1x32xf32>
    %cst_118 = arith.constant dense<0.000000e+00> : vector<8xf32>
    %156 = vector.multi_reduction <add>, %153, %cst_118 [1] : vector<8x32xf32> to vector<8xf32>
    %157 = vector.shape_cast %156 : vector<8xf32> to vector<8x1xf32>
    %cst_119 = arith.constant 3.200000e+01 : f32
    %158 = vector.broadcast %cst_119 : f32 to vector<8x1xf32>
    %159 = arith.divf %157, %158 : vector<8x1xf32>
    %160 = vector.broadcast %159 : vector<8x1xf32> to vector<8x32xf32>
    %161 = arith.subf %153, %160 : vector<8x32xf32>
    %162 = arith.mulf %161, %161 : vector<8x32xf32>
    %cst_120 = arith.constant dense<0.000000e+00> : vector<8xf32>
    %163 = vector.multi_reduction <add>, %162, %cst_120 [1] : vector<8x32xf32> to vector<8xf32>
    %164 = vector.shape_cast %163 : vector<8xf32> to vector<8x1xf32>
    %cst_121 = arith.constant 3.200000e+01 : f32
    %165 = vector.broadcast %cst_121 : f32 to vector<8x1xf32>
    %166 = arith.divf %164, %165 : vector<8x1xf32>
    %167 = vector.broadcast %159 : vector<8x1xf32> to vector<8x32xf32>
    %168 = arith.subf %153, %167 : vector<8x32xf32>
    %cst_122 = arith.constant 9.99999997E-7 : f32
    %169 = vector.broadcast %cst_122 : f32 to vector<8x1xf32>
    %170 = arith.addf %166, %169 : vector<8x1xf32>
    %171 = math.rsqrt %170 : vector<8x1xf32>
    %172 = vector.broadcast %171 : vector<8x1xf32> to vector<8x32xf32>
    %173 = arith.mulf %168, %172 : vector<8x32xf32>
    %174 = vector.broadcast %154 : vector<1x32xf32> to vector<8x32xf32>
    %175 = arith.mulf %173, %174 : vector<8x32xf32>
    %176 = vector.broadcast %155 : vector<1x32xf32> to vector<8x32xf32>
    %177 = arith.addf %175, %176 : vector<8x32xf32>
    %c0_123 = arith.constant 0 : index
    %c0_124 = arith.constant 0 : index
    %c0_125 = arith.constant 0 : index
    %178 = vector.load %arg13[%c0_123, %c0_124, %c0_125] : memref<4x32x8xf32, #tpu.memory_space<vmem>>, vector<1x32x8xf32>
    %179 = vector.shape_cast %178 : vector<1x32x8xf32> to vector<32x8xf32>
    %cst_126 = arith.constant dense<0.000000e+00> : vector<8x8xf32>
    %180 = tpu.matmul %177, %179, %cst_126 {dimension_numbers = #tpu.dot_dimension_numbers<[1], [0], [0], [1], [0, 0, 1, 1], [], []>} : vector<8x32xf32>, vector<32x8xf32>, vector<8x8xf32> -> vector<8x8xf32>
    %cst_127 = arith.constant 0.353553385 : f32
    %181 = vector.broadcast %cst_127 : f32 to vector<8x8xf32>
    %182 = arith.mulf %180, %181 : vector<8x8xf32>
    %c0_128 = arith.constant 0 : index
    %c0_129 = arith.constant 0 : index
    %c0_130 = arith.constant 0 : index
    %183 = vector.load %arg14[%c0_128, %c0_129, %c0_130] : memref<4x32x8xf32, #tpu.memory_space<vmem>>, vector<1x32x8xf32>
    %184 = vector.shape_cast %183 : vector<1x32x8xf32> to vector<32x8xf32>
    %cst_131 = arith.constant dense<0.000000e+00> : vector<8x8xf32>
    %185 = tpu.matmul %5, %184, %cst_131 {dimension_numbers = #tpu.dot_dimension_numbers<[1], [0], [0], [1], [0, 0, 1, 1], [], []>} : vector<8x32xf32>, vector<32x8xf32>, vector<8x8xf32> -> vector<8x8xf32>
    %c0_132 = arith.constant 0 : index
    %c0_133 = arith.constant 0 : index
    %c0_134 = arith.constant 0 : index
    %186 = vector.load %arg15[%c0_132, %c0_133, %c0_134] : memref<4x32x8xf32, #tpu.memory_space<vmem>>, vector<1x32x8xf32>
    %187 = vector.shape_cast %186 : vector<1x32x8xf32> to vector<32x8xf32>
    %cst_135 = arith.constant dense<0.000000e+00> : vector<8x8xf32>
    %188 = tpu.matmul %5, %187, %cst_135 {dimension_numbers = #tpu.dot_dimension_numbers<[1], [0], [0], [1], [0, 0, 1, 1], [], []>} : vector<8x32xf32>, vector<32x8xf32>, vector<8x8xf32> -> vector<8x8xf32>
    %cst_136 = arith.constant dense<0.000000e+00> : vector<8x8xf32>
    %189 = tpu.matmul %182, %185, %cst_136 {dimension_numbers = #tpu.dot_dimension_numbers<[1], [1], [0], [0], [0, 0, 1, 0], [], []>} : vector<8x8xf32>, vector<8x8xf32>, vector<8x8xf32> -> vector<8x8xf32>
    %cst_137 = arith.constant dense<0xFF800000> : vector<8xf32>
    %190 = vector.multi_reduction <maximumf>, %189, %cst_137 [1] : vector<8x8xf32> to vector<8xf32>
    %191 = vector.shape_cast %190 : vector<8xf32> to vector<8x1xf32>
    %192 = vector.broadcast %191 : vector<8x1xf32> to vector<8x8xf32>
    %193 = arith.subf %189, %192 : vector<8x8xf32>
    %194 = math.exp %193 : vector<8x8xf32>
    %cst_138 = arith.constant dense<0.000000e+00> : vector<8xf32>
    %195 = vector.multi_reduction <add>, %194, %cst_138 [1] : vector<8x8xf32> to vector<8xf32>
    %196 = vector.shape_cast %195 : vector<8xf32> to vector<8x1xf32>
    %197 = tpu.reciprocal %196 {approx = true} : vector<8x1xf32> -> vector<8x1xf32>
    %198 = arith.mulf %196, %197 : vector<8x1xf32>
    %cst_139 = arith.constant 2.000000e+00 : f32
    %199 = vector.broadcast %cst_139 : f32 to vector<8x1xf32>
    %200 = arith.subf %199, %198 : vector<8x1xf32>
    %201 = arith.mulf %197, %200 : vector<8x1xf32>
    %202 = vector.broadcast %201 : vector<8x1xf32> to vector<8x8xf32>
    %203 = arith.mulf %194, %202 : vector<8x8xf32>
    %c0_140 = arith.constant 0 : index
    %c0_141 = arith.constant 0 : index
    %c0_142 = arith.constant 0 : index
    %c0_143 = arith.constant 0 : index
    %204 = vector.load %arg27[%c0_140, %c0_141, %c0_142, %c0_143] : memref<1x4x8x8xf32, #tpu.memory_space<vmem>>, vector<1x1x8x8xf32>
    %205 = vector.shape_cast %204 : vector<1x1x8x8xf32> to vector<8x8xf32>
    %206 = vector.shape_cast %203 : vector<8x8xf32> to vector<1x1x8x8xf32>
    tpu.vector_store %arg27[%c0_140, %c0_141, %c0_142, %c0_143], %206 {strides = array<i32>} : memref<1x4x8x8xf32, #tpu.memory_space<vmem>>, vector<1x1x8x8xf32>,
    %cst_144 = arith.constant dense<0.000000e+00> : vector<8x8xf32>
    %207 = tpu.matmul %203, %188, %cst_144 {dimension_numbers = #tpu.dot_dimension_numbers<[1], [0], [0], [1], [0, 0, 1, 1], [], []>} : vector<8x8xf32>, vector<8x8xf32>, vector<8x8xf32> -> vector<8x8xf32>
    %c0_145 = arith.constant 0 : index
    %c0_146 = arith.constant 0 : index
    %c0_147 = arith.constant 0 : index
    %208 = vector.load %arg16[%c0_145, %c0_146, %c0_147] : memref<4x8x32xf32, #tpu.memory_space<vmem>>, vector<1x8x32xf32>
    %209 = vector.shape_cast %208 : vector<1x8x32xf32> to vector<8x32xf32>
    %cst_148 = arith.constant dense<0.000000e+00> : vector<8x32xf32>
    %210 = tpu.matmul %207, %209, %cst_148 {dimension_numbers = #tpu.dot_dimension_numbers<[1], [0], [0], [1], [0, 0, 1, 1], [], []>} : vector<8x8xf32>, vector<8x32xf32>, vector<8x32xf32> -> vector<8x32xf32>
    %c1_149 = arith.constant 1 : index
    %c0_150 = arith.constant 0 : index
    %c0_151 = arith.constant 0 : index
    %211 = vector.load %arg13[%c1_149, %c0_150, %c0_151] : memref<4x32x8xf32, #tpu.memory_space<vmem>>, vector<1x32x8xf32>
    %212 = vector.shape_cast %211 : vector<1x32x8xf32> to vector<32x8xf32>
    %cst_152 = arith.constant dense<0.000000e+00> : vector<8x8xf32>
    %213 = tpu.matmul %177, %212, %cst_152 {dimension_numbers = #tpu.dot_dimension_numbers<[1], [0], [0], [1], [0, 0, 1, 1], [], []>} : vector<8x32xf32>, vector<32x8xf32>, vector<8x8xf32> -> vector<8x8xf32>
    %cst_153 = arith.constant 0.353553385 : f32
    %214 = vector.broadcast %cst_153 : f32 to vector<8x8xf32>
    %215 = arith.mulf %213, %214 : vector<8x8xf32>
    %c1_154 = arith.constant 1 : index
    %c0_155 = arith.constant 0 : index
    %c0_156 = arith.constant 0 : index
    %216 = vector.load %arg14[%c1_154, %c0_155, %c0_156] : memref<4x32x8xf32, #tpu.memory_space<vmem>>, vector<1x32x8xf32>
    %217 = vector.shape_cast %216 : vector<1x32x8xf32> to vector<32x8xf32>
    %cst_157 = arith.constant dense<0.000000e+00> : vector<8x8xf32>
    %218 = tpu.matmul %5, %217, %cst_157 {dimension_numbers = #tpu.dot_dimension_numbers<[1], [0], [0], [1], [0, 0, 1, 1], [], []>} : vector<8x32xf32>, vector<32x8xf32>, vector<8x8xf32> -> vector<8x8xf32>
    %c1_158 = arith.constant 1 : index
    %c0_159 = arith.constant 0 : index
    %c0_160 = arith.constant 0 : index
    %219 = vector.load %arg15[%c1_158, %c0_159, %c0_160] : memref<4x32x8xf32, #tpu.memory_space<vmem>>, vector<1x32x8xf32>
    %220 = vector.shape_cast %219 : vector<1x32x8xf32> to vector<32x8xf32>
    %cst_161 = arith.constant dense<0.000000e+00> : vector<8x8xf32>
    %221 = tpu.matmul %5, %220, %cst_161 {dimension_numbers = #tpu.dot_dimension_numbers<[1], [0], [0], [1], [0, 0, 1, 1], [], []>} : vector<8x32xf32>, vector<32x8xf32>, vector<8x8xf32> -> vector<8x8xf32>
    %cst_162 = arith.constant dense<0.000000e+00> : vector<8x8xf32>
    %222 = tpu.matmul %215, %218, %cst_162 {dimension_numbers = #tpu.dot_dimension_numbers<[1], [1], [0], [0], [0, 0, 1, 0], [], []>} : vector<8x8xf32>, vector<8x8xf32>, vector<8x8xf32> -> vector<8x8xf32>
    %cst_163 = arith.constant dense<0xFF800000> : vector<8xf32>
    %223 = vector.multi_reduction <maximumf>, %222, %cst_163 [1] : vector<8x8xf32> to vector<8xf32>
    %224 = vector.shape_cast %223 : vector<8xf32> to vector<8x1xf32>
    %225 = vector.broadcast %224 : vector<8x1xf32> to vector<8x8xf32>
    %226 = arith.subf %222, %225 : vector<8x8xf32>
    %227 = math.exp %226 : vector<8x8xf32>
    %cst_164 = arith.constant dense<0.000000e+00> : vector<8xf32>
    %228 = vector.multi_reduction <add>, %227, %cst_164 [1] : vector<8x8xf32> to vector<8xf32>
    %229 = vector.shape_cast %228 : vector<8xf32> to vector<8x1xf32>
    %230 = tpu.reciprocal %229 {approx = true} : vector<8x1xf32> -> vector<8x1xf32>
    %231 = arith.mulf %229, %230 : vector<8x1xf32>
    %cst_165 = arith.constant 2.000000e+00 : f32
    %232 = vector.broadcast %cst_165 : f32 to vector<8x1xf32>
    %233 = arith.subf %232, %231 : vector<8x1xf32>
    %234 = arith.mulf %230, %233 : vector<8x1xf32>
    %235 = vector.broadcast %234 : vector<8x1xf32> to vector<8x8xf32>
    %236 = arith.mulf %227, %235 : vector<8x8xf32>
    %c0_166 = arith.constant 0 : index
    %c1_167 = arith.constant 1 : index
    %c0_168 = arith.constant 0 : index
    %c0_169 = arith.constant 0 : index
    %237 = vector.load %arg27[%c0_166, %c1_167, %c0_168, %c0_169] : memref<1x4x8x8xf32, #tpu.memory_space<vmem>>, vector<1x1x8x8xf32>
    %238 = vector.shape_cast %237 : vector<1x1x8x8xf32> to vector<8x8xf32>
    %239 = vector.shape_cast %236 : vector<8x8xf32> to vector<1x1x8x8xf32>
    tpu.vector_store %arg27[%c0_166, %c1_167, %c0_168, %c0_169], %239 {strides = array<i32>} : memref<1x4x8x8xf32, #tpu.memory_space<vmem>>, vector<1x1x8x8xf32>,
    %cst_170 = arith.constant dense<0.000000e+00> : vector<8x8xf32>
    %240 = tpu.matmul %236, %221, %cst_170 {dimension_numbers = #tpu.dot_dimension_numbers<[1], [0], [0], [1], [0, 0, 1, 1], [], []>} : vector<8x8xf32>, vector<8x8xf32>, vector<8x8xf32> -> vector<8x8xf32>
    %c1_171 = arith.constant 1 : index
    %c0_172 = arith.constant 0 : index
    %c0_173 = arith.constant 0 : index
    %241 = vector.load %arg16[%c1_171, %c0_172, %c0_173] : memref<4x8x32xf32, #tpu.memory_space<vmem>>, vector<1x8x32xf32>
    %242 = vector.shape_cast %241 : vector<1x8x32xf32> to vector<8x32xf32>
    %cst_174 = arith.constant dense<0.000000e+00> : vector<8x32xf32>
    %243 = tpu.matmul %240, %242, %cst_174 {dimension_numbers = #tpu.dot_dimension_numbers<[1], [0], [0], [1], [0, 0, 1, 1], [], []>} : vector<8x8xf32>, vector<8x32xf32>, vector<8x32xf32> -> vector<8x32xf32>
    %244 = arith.addf %210, %243 : vector<8x32xf32>
    %c2_175 = arith.constant 2 : index
    %c0_176 = arith.constant 0 : index
    %c0_177 = arith.constant 0 : index
    %245 = vector.load %arg13[%c2_175, %c0_176, %c0_177] : memref<4x32x8xf32, #tpu.memory_space<vmem>>, vector<1x32x8xf32>
    %246 = vector.shape_cast %245 : vector<1x32x8xf32> to vector<32x8xf32>
    %cst_178 = arith.constant dense<0.000000e+00> : vector<8x8xf32>
    %247 = tpu.matmul %177, %246, %cst_178 {dimension_numbers = #tpu.dot_dimension_numbers<[1], [0], [0], [1], [0, 0, 1, 1], [], []>} : vector<8x32xf32>, vector<32x8xf32>, vector<8x8xf32> -> vector<8x8xf32>
    %cst_179 = arith.constant 0.353553385 : f32
    %248 = vector.broadcast %cst_179 : f32 to vector<8x8xf32>
    %249 = arith.mulf %247, %248 : vector<8x8xf32>
    %c2_180 = arith.constant 2 : index
    %c0_181 = arith.constant 0 : index
    %c0_182 = arith.constant 0 : index
    %250 = vector.load %arg14[%c2_180, %c0_181, %c0_182] : memref<4x32x8xf32, #tpu.memory_space<vmem>>, vector<1x32x8xf32>
    %251 = vector.shape_cast %250 : vector<1x32x8xf32> to vector<32x8xf32>
    %cst_183 = arith.constant dense<0.000000e+00> : vector<8x8xf32>
    %252 = tpu.matmul %5, %251, %cst_183 {dimension_numbers = #tpu.dot_dimension_numbers<[1], [0], [0], [1], [0, 0, 1, 1], [], []>} : vector<8x32xf32>, vector<32x8xf32>, vector<8x8xf32> -> vector<8x8xf32>
    %c2_184 = arith.constant 2 : index
    %c0_185 = arith.constant 0 : index
    %c0_186 = arith.constant 0 : index
    %253 = vector.load %arg15[%c2_184, %c0_185, %c0_186] : memref<4x32x8xf32, #tpu.memory_space<vmem>>, vector<1x32x8xf32>
    %254 = vector.shape_cast %253 : vector<1x32x8xf32> to vector<32x8xf32>
    %cst_187 = arith.constant dense<0.000000e+00> : vector<8x8xf32>
    %255 = tpu.matmul %5, %254, %cst_187 {dimension_numbers = #tpu.dot_dimension_numbers<[1], [0], [0], [1], [0, 0, 1, 1], [], []>} : vector<8x32xf32>, vector<32x8xf32>, vector<8x8xf32> -> vector<8x8xf32>
    %cst_188 = arith.constant dense<0.000000e+00> : vector<8x8xf32>
    %256 = tpu.matmul %249, %252, %cst_188 {dimension_numbers = #tpu.dot_dimension_numbers<[1], [1], [0], [0], [0, 0, 1, 0], [], []>} : vector<8x8xf32>, vector<8x8xf32>, vector<8x8xf32> -> vector<8x8xf32>
    %cst_189 = arith.constant dense<0xFF800000> : vector<8xf32>
    %257 = vector.multi_reduction <maximumf>, %256, %cst_189 [1] : vector<8x8xf32> to vector<8xf32>
    %258 = vector.shape_cast %257 : vector<8xf32> to vector<8x1xf32>
    %259 = vector.broadcast %258 : vector<8x1xf32> to vector<8x8xf32>
    %260 = arith.subf %256, %259 : vector<8x8xf32>
    %261 = math.exp %260 : vector<8x8xf32>
    %cst_190 = arith.constant dense<0.000000e+00> : vector<8xf32>
    %262 = vector.multi_reduction <add>, %261, %cst_190 [1] : vector<8x8xf32> to vector<8xf32>
    %263 = vector.shape_cast %262 : vector<8xf32> to vector<8x1xf32>
    %264 = tpu.reciprocal %263 {approx = true} : vector<8x1xf32> -> vector<8x1xf32>
    %265 = arith.mulf %263, %264 : vector<8x1xf32>
    %cst_191 = arith.constant 2.000000e+00 : f32
    %266 = vector.broadcast %cst_191 : f32 to vector<8x1xf32>
    %267 = arith.subf %266, %265 : vector<8x1xf32>
    %268 = arith.mulf %264, %267 : vector<8x1xf32>
    %269 = vector.broadcast %268 : vector<8x1xf32> to vector<8x8xf32>
    %270 = arith.mulf %261, %269 : vector<8x8xf32>
    %c0_192 = arith.constant 0 : index
    %c2_193 = arith.constant 2 : index
    %c0_194 = arith.constant 0 : index
    %c0_195 = arith.constant 0 : index
    %271 = vector.load %arg27[%c0_192, %c2_193, %c0_194, %c0_195] : memref<1x4x8x8xf32, #tpu.memory_space<vmem>>, vector<1x1x8x8xf32>
    %272 = vector.shape_cast %271 : vector<1x1x8x8xf32> to vector<8x8xf32>
    %273 = vector.shape_cast %270 : vector<8x8xf32> to vector<1x1x8x8xf32>
    tpu.vector_store %arg27[%c0_192, %c2_193, %c0_194, %c0_195], %273 {strides = array<i32>} : memref<1x4x8x8xf32, #tpu.memory_space<vmem>>, vector<1x1x8x8xf32>,
    %cst_196 = arith.constant dense<0.000000e+00> : vector<8x8xf32>
    %274 = tpu.matmul %270, %255, %cst_196 {dimension_numbers = #tpu.dot_dimension_numbers<[1], [0], [0], [1], [0, 0, 1, 1], [], []>} : vector<8x8xf32>, vector<8x8xf32>, vector<8x8xf32> -> vector<8x8xf32>
    %c2_197 = arith.constant 2 : index
    %c0_198 = arith.constant 0 : index
    %c0_199 = arith.constant 0 : index
    %275 = vector.load %arg16[%c2_197, %c0_198, %c0_199] : memref<4x8x32xf32, #tpu.memory_space<vmem>>, vector<1x8x32xf32>
    %276 = vector.shape_cast %275 : vector<1x8x32xf32> to vector<8x32xf32>
    %cst_200 = arith.constant dense<0.000000e+00> : vector<8x32xf32>
    %277 = tpu.matmul %274, %276, %cst_200 {dimension_numbers = #tpu.dot_dimension_numbers<[1], [0], [0], [1], [0, 0, 1, 1], [], []>} : vector<8x8xf32>, vector<8x32xf32>, vector<8x32xf32> -> vector<8x32xf32>
    %278 = arith.addf %244, %277 : vector<8x32xf32>
    %c3_201 = arith.constant 3 : index
    %c0_202 = arith.constant 0 : index
    %c0_203 = arith.constant 0 : index
    %279 = vector.load %arg13[%c3_201, %c0_202, %c0_203] : memref<4x32x8xf32, #tpu.memory_space<vmem>>, vector<1x32x8xf32>
    %280 = vector.shape_cast %279 : vector<1x32x8xf32> to vector<32x8xf32>
    %cst_204 = arith.constant dense<0.000000e+00> : vector<8x8xf32>
    %281 = tpu.matmul %177, %280, %cst_204 {dimension_numbers = #tpu.dot_dimension_numbers<[1], [0], [0], [1], [0, 0, 1, 1], [], []>} : vector<8x32xf32>, vector<32x8xf32>, vector<8x8xf32> -> vector<8x8xf32>
    %cst_205 = arith.constant 0.353553385 : f32
    %282 = vector.broadcast %cst_205 : f32 to vector<8x8xf32>
    %283 = arith.mulf %281, %282 : vector<8x8xf32>
    %c3_206 = arith.constant 3 : index
    %c0_207 = arith.constant 0 : index
    %c0_208 = arith.constant 0 : index
    %284 = vector.load %arg14[%c3_206, %c0_207, %c0_208] : memref<4x32x8xf32, #tpu.memory_space<vmem>>, vector<1x32x8xf32>
    %285 = vector.shape_cast %284 : vector<1x32x8xf32> to vector<32x8xf32>
    %cst_209 = arith.constant dense<0.000000e+00> : vector<8x8xf32>
    %286 = tpu.matmul %5, %285, %cst_209 {dimension_numbers = #tpu.dot_dimension_numbers<[1], [0], [0], [1], [0, 0, 1, 1], [], []>} : vector<8x32xf32>, vector<32x8xf32>, vector<8x8xf32> -> vector<8x8xf32>
    %c3_210 = arith.constant 3 : index
    %c0_211 = arith.constant 0 : index
    %c0_212 = arith.constant 0 : index
    %287 = vector.load %arg15[%c3_210, %c0_211, %c0_212] : memref<4x32x8xf32, #tpu.memory_space<vmem>>, vector<1x32x8xf32>
    %288 = vector.shape_cast %287 : vector<1x32x8xf32> to vector<32x8xf32>
    %cst_213 = arith.constant dense<0.000000e+00> : vector<8x8xf32>
    %289 = tpu.matmul %5, %288, %cst_213 {dimension_numbers = #tpu.dot_dimension_numbers<[1], [0], [0], [1], [0, 0, 1, 1], [], []>} : vector<8x32xf32>, vector<32x8xf32>, vector<8x8xf32> -> vector<8x8xf32>
    %cst_214 = arith.constant dense<0.000000e+00> : vector<8x8xf32>
    %290 = tpu.matmul %283, %286, %cst_214 {dimension_numbers = #tpu.dot_dimension_numbers<[1], [1], [0], [0], [0, 0, 1, 0], [], []>} : vector<8x8xf32>, vector<8x8xf32>, vector<8x8xf32> -> vector<8x8xf32>
    %cst_215 = arith.constant dense<0xFF800000> : vector<8xf32>
    %291 = vector.multi_reduction <maximumf>, %290, %cst_215 [1] : vector<8x8xf32> to vector<8xf32>
    %292 = vector.shape_cast %291 : vector<8xf32> to vector<8x1xf32>
    %293 = vector.broadcast %292 : vector<8x1xf32> to vector<8x8xf32>
    %294 = arith.subf %290, %293 : vector<8x8xf32>
    %295 = math.exp %294 : vector<8x8xf32>
    %cst_216 = arith.constant dense<0.000000e+00> : vector<8xf32>
    %296 = vector.multi_reduction <add>, %295, %cst_216 [1] : vector<8x8xf32> to vector<8xf32>
    %297 = vector.shape_cast %296 : vector<8xf32> to vector<8x1xf32>
    %298 = tpu.reciprocal %297 {approx = true} : vector<8x1xf32> -> vector<8x1xf32>
    %299 = arith.mulf %297, %298 : vector<8x1xf32>
    %cst_217 = arith.constant 2.000000e+00 : f32
    %300 = vector.broadcast %cst_217 : f32 to vector<8x1xf32>
    %301 = arith.subf %300, %299 : vector<8x1xf32>
    %302 = arith.mulf %298, %301 : vector<8x1xf32>
    %303 = vector.broadcast %302 : vector<8x1xf32> to vector<8x8xf32>
    %304 = arith.mulf %295, %303 : vector<8x8xf32>
    %c0_218 = arith.constant 0 : index
    %c3_219 = arith.constant 3 : index
    %c0_220 = arith.constant 0 : index
    %c0_221 = arith.constant 0 : index
    %305 = vector.load %arg27[%c0_218, %c3_219, %c0_220, %c0_221] : memref<1x4x8x8xf32, #tpu.memory_space<vmem>>, vector<1x1x8x8xf32>
    %306 = vector.shape_cast %305 : vector<1x1x8x8xf32> to vector<8x8xf32>
    %307 = vector.shape_cast %304 : vector<8x8xf32> to vector<1x1x8x8xf32>
    tpu.vector_store %arg27[%c0_218, %c3_219, %c0_220, %c0_221], %307 {strides = array<i32>} : memref<1x4x8x8xf32, #tpu.memory_space<vmem>>, vector<1x1x8x8xf32>,
    %cst_222 = arith.constant dense<0.000000e+00> : vector<8x8xf32>
    %308 = tpu.matmul %304, %289, %cst_222 {dimension_numbers = #tpu.dot_dimension_numbers<[1], [0], [0], [1], [0, 0, 1, 1], [], []>} : vector<8x8xf32>, vector<8x8xf32>, vector<8x8xf32> -> vector<8x8xf32>
    %c3_223 = arith.constant 3 : index
    %c0_224 = arith.constant 0 : index
    %c0_225 = arith.constant 0 : index
    %309 = vector.load %arg16[%c3_223, %c0_224, %c0_225] : memref<4x8x32xf32, #tpu.memory_space<vmem>>, vector<1x8x32xf32>
    %310 = vector.shape_cast %309 : vector<1x8x32xf32> to vector<8x32xf32>
    %cst_226 = arith.constant dense<0.000000e+00> : vector<8x32xf32>
    %311 = tpu.matmul %308, %310, %cst_226 {dimension_numbers = #tpu.dot_dimension_numbers<[1], [0], [0], [1], [0, 0, 1, 1], [], []>} : vector<8x8xf32>, vector<8x32xf32>, vector<8x32xf32> -> vector<8x32xf32>
    %312 = arith.addf %278, %311 : vector<8x32xf32>
    %313 = arith.addf %312, %177 : vector<8x32xf32>
    %c0_227 = arith.constant 0 : index
    %c0_228 = arith.constant 0 : index
    %314 = vector.load %arg17[%c0_227, %c0_228] : memref<1x32xf32, #tpu.memory_space<vmem>>, vector<1x32xf32>
    %c0_229 = arith.constant 0 : index
    %c0_230 = arith.constant 0 : index
    %315 = vector.load %arg18[%c0_229, %c0_230] : memref<1x32xf32, #tpu.memory_space<vmem>>, vector<1x32xf32>
    %cst_231 = arith.constant dense<0.000000e+00> : vector<8xf32>
    %316 = vector.multi_reduction <add>, %313, %cst_231 [1] : vector<8x32xf32> to vector<8xf32>
    %317 = vector.shape_cast %316 : vector<8xf32> to vector<8x1xf32>
    %cst_232 = arith.constant 3.200000e+01 : f32
    %318 = vector.broadcast %cst_232 : f32 to vector<8x1xf32>
    %319 = arith.divf %317, %318 : vector<8x1xf32>
    %320 = vector.broadcast %319 : vector<8x1xf32> to vector<8x32xf32>
    %321 = arith.subf %313, %320 : vector<8x32xf32>
    %322 = arith.mulf %321, %321 : vector<8x32xf32>
    %cst_233 = arith.constant dense<0.000000e+00> : vector<8xf32>
    %323 = vector.multi_reduction <add>, %322, %cst_233 [1] : vector<8x32xf32> to vector<8xf32>
    %324 = vector.shape_cast %323 : vector<8xf32> to vector<8x1xf32>
    %cst_234 = arith.constant 3.200000e+01 : f32
    %325 = vector.broadcast %cst_234 : f32 to vector<8x1xf32>
    %326 = arith.divf %324, %325 : vector<8x1xf32>
    %327 = vector.broadcast %319 : vector<8x1xf32> to vector<8x32xf32>
    %328 = arith.subf %313, %327 : vector<8x32xf32>
    %cst_235 = arith.constant 9.99999997E-7 : f32
    %329 = vector.broadcast %cst_235 : f32 to vector<8x1xf32>
    %330 = arith.addf %326, %329 : vector<8x1xf32>
    %331 = math.rsqrt %330 : vector<8x1xf32>
    %332 = vector.broadcast %331 : vector<8x1xf32> to vector<8x32xf32>
    %333 = arith.mulf %328, %332 : vector<8x32xf32>
    %334 = vector.broadcast %314 : vector<1x32xf32> to vector<8x32xf32>
    %335 = arith.mulf %333, %334 : vector<8x32xf32>
    %336 = vector.broadcast %315 : vector<1x32xf32> to vector<8x32xf32>
    %337 = arith.addf %335, %336 : vector<8x32xf32>
    %c0_236 = arith.constant 0 : index
    %c0_237 = arith.constant 0 : index
    %338 = vector.load %arg19[%c0_236, %c0_237] : memref<32x64xf32, #tpu.memory_space<vmem>>, vector<32x64xf32>
    %cst_238 = arith.constant dense<0.000000e+00> : vector<8x64xf32>
    %339 = tpu.matmul %337, %338, %cst_238 {dimension_numbers = #tpu.dot_dimension_numbers<[1], [0], [0], [1], [0, 0, 1, 1], [], []>} : vector<8x32xf32>, vector<32x64xf32>, vector<8x64xf32> -> vector<8x64xf32>
    %c0_239 = arith.constant 0 : index
    %c0_240 = arith.constant 0 : index
    %340 = vector.load %arg20[%c0_239, %c0_240] : memref<1x64xf32, #tpu.memory_space<vmem>>, vector<1x64xf32>
    %341 = vector.broadcast %340 : vector<1x64xf32> to vector<8x64xf32>
    %342 = arith.addf %339, %341 : vector<8x64xf32>
    %cst_241 = arith.constant 0.000000e+00 : f32
    %343 = vector.broadcast %cst_241 : f32 to vector<8x64xf32>
    %344 = arith.maximumf %342, %343 : vector<8x64xf32>
    %c0_242 = arith.constant 0 : index
    %c0_243 = arith.constant 0 : index
    %345 = vector.load %arg21[%c0_242, %c0_243] : memref<64x32xf32, #tpu.memory_space<vmem>>, vector<64x32xf32>
    %cst_244 = arith.constant dense<0.000000e+00> : vector<8x32xf32>
    %346 = tpu.matmul %344, %345, %cst_244 {dimension_numbers = #tpu.dot_dimension_numbers<[1], [0], [0], [1], [0, 0, 1, 1], [], []>} : vector<8x64xf32>, vector<64x32xf32>, vector<8x32xf32> -> vector<8x32xf32>
    %c0_245 = arith.constant 0 : index
    %c0_246 = arith.constant 0 : index
    %347 = vector.load %arg22[%c0_245, %c0_246] : memref<1x32xf32, #tpu.memory_space<vmem>>, vector<1x32xf32>
    %348 = vector.broadcast %347 : vector<1x32xf32> to vector<8x32xf32>
    %349 = arith.addf %346, %348 : vector<8x32xf32>
    %350 = arith.addf %349, %337 : vector<8x32xf32>
    %c0_247 = arith.constant 0 : index
    %c0_248 = arith.constant 0 : index
    %351 = vector.load %arg23[%c0_247, %c0_248] : memref<1x32xf32, #tpu.memory_space<vmem>>, vector<1x32xf32>
    %c0_249 = arith.constant 0 : index
    %c0_250 = arith.constant 0 : index
    %352 = vector.load %arg24[%c0_249, %c0_250] : memref<1x32xf32, #tpu.memory_space<vmem>>, vector<1x32xf32>
    %cst_251 = arith.constant dense<0.000000e+00> : vector<8xf32>
    %353 = vector.multi_reduction <add>, %350, %cst_251 [1] : vector<8x32xf32> to vector<8xf32>
    %354 = vector.shape_cast %353 : vector<8xf32> to vector<8x1xf32>
    %cst_252 = arith.constant 3.200000e+01 : f32
    %355 = vector.broadcast %cst_252 : f32 to vector<8x1xf32>
    %356 = arith.divf %354, %355 : vector<8x1xf32>
    %357 = vector.broadcast %356 : vector<8x1xf32> to vector<8x32xf32>
    %358 = arith.subf %350, %357 : vector<8x32xf32>
    %359 = arith.mulf %358, %358 : vector<8x32xf32>
    %cst_253 = arith.constant dense<0.000000e+00> : vector<8xf32>
    %360 = vector.multi_reduction <add>, %359, %cst_253 [1] : vector<8x32xf32> to vector<8xf32>
    %361 = vector.shape_cast %360 : vector<8xf32> to vector<8x1xf32>
    %cst_254 = arith.constant 3.200000e+01 : f32
    %362 = vector.broadcast %cst_254 : f32 to vector<8x1xf32>
    %363 = arith.divf %361, %362 : vector<8x1xf32>
    %364 = vector.broadcast %356 : vector<8x1xf32> to vector<8x32xf32>
    %365 = arith.subf %350, %364 : vector<8x32xf32>
    %cst_255 = arith.constant 9.99999997E-7 : f32
    %366 = vector.broadcast %cst_255 : f32 to vector<8x1xf32>
    %367 = arith.addf %363, %366 : vector<8x1xf32>
    %368 = math.rsqrt %367 : vector<8x1xf32>
    %369 = vector.broadcast %368 : vector<8x1xf32> to vector<8x32xf32>
    %370 = arith.mulf %365, %369 : vector<8x32xf32>
    %371 = vector.broadcast %351 : vector<1x32xf32> to vector<8x32xf32>
    %372 = arith.mulf %370, %371 : vector<8x32xf32>
    %373 = vector.broadcast %352 : vector<1x32xf32> to vector<8x32xf32>
    %374 = arith.addf %372, %373 : vector<8x32xf32>
    %c0_256 = arith.constant 0 : index
    %c0_257 = arith.constant 0 : index
    %c0_258 = arith.constant 0 : index
    %375 = vector.load %arg25[%c0_256, %c0_257, %c0_258] : memref<1x8x32xf32, #tpu.memory_space<vmem>>, vector<1x8x32xf32>
    %376 = vector.shape_cast %375 : vector<1x8x32xf32> to vector<8x32xf32>
    %377 = vector.shape_cast %374 : vector<8x32xf32> to vector<1x8x32xf32>
    tpu.vector_store %arg25[%c0_256, %c0_257, %c0_258], %377 {strides = array<i32>} : memref<1x8x32xf32, #tpu.memory_space<vmem>>, vector<1x8x32xf32>,
    return
  }
  func.func @transform_0(%arg0: i32, %arg1: i32) -> (i32, i32, i32) {
    %c0_i32 = arith.constant 0 : i32
    %c0_i32_0 = arith.constant 0 : i32
    return %arg0, %arg1, %c0_i32 : i32, i32, i32
  }
  func.func @transform_1(%arg0: i32, %arg1: i32) -> (i32, i32, i32) {
    %c0_i32 = arith.constant 0 : i32
    %c0_i32_0 = arith.constant 0 : i32
    %c0_i32_1 = arith.constant 0 : i32
    return %arg0, %c0_i32, %c0_i32_0 : i32, i32, i32
  }
  func.func @transform_2(%arg0: i32, %arg1: i32) -> (i32, i32, i32) {
    %c0_i32 = arith.constant 0 : i32
    %c0_i32_0 = arith.constant 0 : i32
    %c0_i32_1 = arith.constant 0 : i32
    return %arg0, %c0_i32, %c0_i32_0 : i32, i32, i32
  }
  func.func @transform_3(%arg0: i32, %arg1: i32) -> (i32, i32, i32) {
    %c0_i32 = arith.constant 0 : i32
    %c0_i32_0 = arith.constant 0 : i32
    return %arg0, %arg1, %c0_i32 : i32, i32, i32
  }
  func.func @transform_4(%arg0: i32, %arg1: i32) -> (i32, i32, i32) {
    %c0_i32 = arith.constant 0 : i32
    %c0_i32_0 = arith.constant 0 : i32
    %c0_i32_1 = arith.constant 0 : i32
    %c0_i32_2 = arith.constant 0 : i32
    return %c0_i32, %c0_i32_0, %c0_i32_1 : i32, i32, i32
  }
  func.func @transform_5(%arg0: i32, %arg1: i32) -> (i32, i32, i32) {
    %c0_i32 = arith.constant 0 : i32
    %c0_i32_0 = arith.constant 0 : i32
    %c0_i32_1 = arith.constant 0 : i32
    %c0_i32_2 = arith.constant 0 : i32
    return %c0_i32, %c0_i32_0, %c0_i32_1 : i32, i32, i32
  }
  func.func @transform_6(%arg0: i32, %arg1: i32) -> (i32, i32, i32) {
    %c0_i32 = arith.constant 0 : i32
    %c0_i32_0 = arith.constant 0 : i32
    %c0_i32_1 = arith.constant 0 : i32
    %c0_i32_2 = arith.constant 0 : i32
    return %c0_i32, %c0_i32_0, %c0_i32_1 : i32, i32, i32
  }
  func.func @transform_7(%arg0: i32, %arg1: i32) -> (i32, i32, i32) {
    %c0_i32 = arith.constant 0 : i32
    %c0_i32_0 = arith.constant 0 : i32
    %c0_i32_1 = arith.constant 0 : i32
    %c0_i32_2 = arith.constant 0 : i32
    return %c0_i32, %c0_i32_0, %c0_i32_1 : i32, i32, i32
  }
  func.func @transform_8(%arg0: i32, %arg1: i32) -> (i32, i32, i32) {
    %c0_i32 = arith.constant 0 : i32
    %c0_i32_0 = arith.constant 0 : i32
    %c0_i32_1 = arith.constant 0 : i32
    %c0_i32_2 = arith.constant 0 : i32
    return %c0_i32, %c0_i32_0, %c0_i32_1 : i32, i32, i32
  }
  func.func @transform_9(%arg0: i32, %arg1: i32) -> (i32, i32) {
    %c0_i32 = arith.constant 0 : i32
    %c0_i32_0 = arith.constant 0 : i32
    %c0_i32_1 = arith.constant 0 : i32
    return %c0_i32, %c0_i32_0 : i32, i32
  }
  func.func @transform_10(%arg0: i32, %arg1: i32) -> (i32, i32) {
    %c0_i32 = arith.constant 0 : i32
    %c0_i32_0 = arith.constant 0 : i32
    %c0_i32_1 = arith.constant 0 : i32
    return %c0_i32, %c0_i32_0 : i32, i32
  }
  func.func @transform_11(%arg0: i32, %arg1: i32) -> (i32, i32, i32) {
    %c0_i32 = arith.constant 0 : i32
    %c0_i32_0 = arith.constant 0 : i32
    %c0_i32_1 = arith.constant 0 : i32
    %c0_i32_2 = arith.constant 0 : i32
    return %c0_i32, %c0_i32_0, %c0_i32_1 : i32, i32, i32
  }
  func.func @transform_12(%arg0: i32, %arg1: i32) -> (i32, i32, i32) {
    %c0_i32 = arith.constant 0 : i32
    %c0_i32_0 = arith.constant 0 : i32
    %c0_i32_1 = arith.constant 0 : i32
    %c0_i32_2 = arith.constant 0 : i32
    return %c0_i32, %c0_i32_0, %c0_i32_1 : i32, i32, i32
  }
  func.func @transform_13(%arg0: i32, %arg1: i32) -> (i32, i32, i32) {
    %c0_i32 = arith.constant 0 : i32
    %c0_i32_0 = arith.constant 0 : i32
    %c0_i32_1 = arith.constant 0 : i32
    %c0_i32_2 = arith.constant 0 : i32
    return %c0_i32, %c0_i32_0, %c0_i32_1 : i32, i32, i32
  }
  func.func @transform_14(%arg0: i32, %arg1: i32) -> (i32, i32, i32) {
    %c0_i32 = arith.constant 0 : i32
    %c0_i32_0 = arith.constant 0 : i32
    %c0_i32_1 = arith.constant 0 : i32
    %c0_i32_2 = arith.constant 0 : i32
    return %c0_i32, %c0_i32_0, %c0_i32_1 : i32, i32, i32
  }
  func.func @transform_15(%arg0: i32, %arg1: i32) -> (i32, i32) {
    %c0_i32 = arith.constant 0 : i32
    %c0_i32_0 = arith.constant 0 : i32
    %c0_i32_1 = arith.constant 0 : i32
    return %c0_i32, %c0_i32_0 : i32, i32
  }
  func.func @transform_16(%arg0: i32, %arg1: i32) -> (i32, i32) {
    %c0_i32 = arith.constant 0 : i32
    %c0_i32_0 = arith.constant 0 : i32
    %c0_i32_1 = arith.constant 0 : i32
    return %c0_i32, %c0_i32_0 : i32, i32
  }
  func.func @transform_17(%arg0: i32, %arg1: i32) -> (i32, i32) {
    %c0_i32 = arith.constant 0 : i32
    %c0_i32_0 = arith.constant 0 : i32
    %c0_i32_1 = arith.constant 0 : i32
    return %c0_i32, %c0_i32_0 : i32, i32
  }
  func.func @transform_18(%arg0: i32, %arg1: i32) -> (i32, i32) {
    %c0_i32 = arith.constant 0 : i32
    %c0_i32_0 = arith.constant 0 : i32
    %c0_i32_1 = arith.constant 0 : i32
    return %c0_i32, %c0_i32_0 : i32, i32
  }
  func.func @transform_19(%arg0: i32, %arg1: i32) -> (i32, i32) {
    %c0_i32 = arith.constant 0 : i32
    %c0_i32_0 = arith.constant 0 : i32
    %c0_i32_1 = arith.constant 0 : i32
    return %c0_i32, %c0_i32_0 : i32, i32
  }
  func.func @transform_20(%arg0: i32, %arg1: i32) -> (i32, i32) {
    %c0_i32 = arith.constant 0 : i32
    %c0_i32_0 = arith.constant 0 : i32
    %c0_i32_1 = arith.constant 0 : i32
    return %c0_i32, %c0_i32_0 : i32, i32
  }
  func.func @transform_21(%arg0: i32, %arg1: i32) -> (i32, i32) {
    %c0_i32 = arith.constant 0 : i32
    %c0_i32_0 = arith.constant 0 : i32
    %c0_i32_1 = arith.constant 0 : i32
    return %c0_i32, %c0_i32_0 : i32, i32
  }
  func.func @transform_22(%arg0: i32, %arg1: i32) -> (i32, i32) {
    %c0_i32 = arith.constant 0 : i32
    %c0_i32_0 = arith.constant 0 : i32
    %c0_i32_1 = arith.constant 0 : i32
    return %c0_i32, %c0_i32_0 : i32, i32
  }
  func.func @transform_23(%arg0: i32, %arg1: i32) -> (i32, i32, i32) {
    %c0_i32 = arith.constant 0 : i32
    %c0_i32_0 = arith.constant 0 : i32
    return %arg0, %arg1, %c0_i32 : i32, i32, i32
  }
  func.func @transform_24(%arg0: i32, %arg1: i32) -> (i32, i32, i32, i32) {
    %c0_i32 = arith.constant 0 : i32
    %c0_i32_0 = arith.constant 0 : i32
    %c0_i32_1 = arith.constant 0 : i32
    return %arg0, %c0_i32, %arg1, %c0_i32_0 : i32, i32, i32, i32
  }
  func.func @transform_25(%arg0: i32, %arg1: i32) -> (i32, i32, i32, i32) {
    %c0_i32 = arith.constant 0 : i32
    %c0_i32_0 = arith.constant 0 : i32
    %c0_i32_1 = arith.constant 0 : i32
    return %arg0, %c0_i32, %arg1, %c0_i32_0 : i32, i32, i32, i32
  }
}

module attributes {stable_mosaic.version = 11 : i64} {
  func.func @decoder_layer_kernel(%arg0: i32, %arg1: i32, %arg2: memref<1x8x32xf32, #tpu.memory_space<vmem>>, %arg3: memref<1x8x32xf32, #tpu.memory_space<vmem>>, %arg4: memref<1x8x32xf32, #tpu.memory_space<vmem>>, %arg5: memref<1x8x8xi8, #tpu.memory_space<vmem>>, %arg6: memref<1x1x1xi8, #tpu.memory_space<vmem>>, %arg7: memref<4x32x8xf32, #tpu.memory_space<vmem>>, %arg8: memref<4x32x8xf32, #tpu.memory_space<vmem>>, %arg9: memref<4x32x8xf32, #tpu.memory_space<vmem>>, %arg10: memref<4x8x32xf32, #tpu.memory_space<vmem>>, %arg11: memref<1x32xf32, #tpu.memory_space<vmem>>, %arg12: memref<1x32xf32, #tpu.memory_space<vmem>>, %arg13: memref<4x32x8xf32, #tpu.memory_space<vmem>>, %arg14: memref<4x32x8xf32, #tpu.memory_space<vmem>>, %arg15: memref<4x32x8xf32, #tpu.memory_space<vmem>>, %arg16: memref<4x8x32xf32, #tpu.memory_space<vmem>>, %arg17: memref<1x32xf32, #tpu.memory_space<vmem>>, %arg18: memref<1x32xf32, #tpu.memory_space<vmem>>, %arg19: memref<32x64xf32, #tpu.memory_space<vmem>>, %arg20: memref<1x64xf32, #tpu.memory_space<vmem>>, %arg21: memref<64x32xf32, #tpu.memory_space<vmem>>, %arg22: memref<1x32xf32, #tpu.memory_space<vmem>>, %arg23: memref<1x32xf32, #tpu.memory_space<vmem>>, %arg24: memref<1x32xf32, #tpu.memory_space<vmem>>, %arg25: memref<1x8x32xf32, #tpu.memory_space<vmem>>, %arg26: memref<1x4x8x8xf32, #tpu.memory_space<vmem>>, %arg27: memref<1x4x8x8xf32, #tpu.memory_space<vmem>>) attributes {dimension_semantics = [#tpu.dimension_semantics<parallel>, #tpu.dimension_semantics<parallel>], iteration_bounds = array<i64: 2, 1>, scalar_prefetch = 0 : i64, scratch_operands = 0 : i64, tpu.core_type = #tpu.core_type<tc>, window_params = [{transform_indices = @transform_0, window_bounds = array<i64: 1, 8, 32>}, {transform_indices = @transform_1, window_bounds = array<i64: 1, 8, 32>}, {transform_indices = @transform_2, window_bounds = array<i64: 1, 8, 32>}, {transform_indices = @transform_3, window_bounds = array<i64: 1, 8, 8>}, {pipeline_mode = #tpu.pipeline_mode<synchronous>, transform_indices = @transform_4, window_bounds = array<i64: 1, 1, 1>}, {pipeline_mode = #tpu.pipeline_mode<synchronous>, transform_indices = @transform_5, window_bounds = array<i64: 4, 32, 8>}, {pipeline_mode = #tpu.pipeline_mode<synchronous>, transform_indices = @transform_6, window_bounds = array<i64: 4, 32, 8>}, {pipeline_mode = #tpu.pipeline_mode<synchronous>, transform_indices = @transform_7, window_bounds = array<i64: 4, 32, 8>}, {pipeline_mode = #tpu.pipeline_mode<synchronous>, transform_indices = @transform_8, window_bounds = array<i64: 4, 8, 32>}, {pipeline_mode = #tpu.pipeline_mode<synchronous>, transform_indices = @transform_9, window_bounds = array<i64: 1, 32>}, {pipeline_mode = #tpu.pipeline_mode<synchronous>, transform_indices = @transform_10, window_bounds = array<i64: 1, 32>}, {pipeline_mode = #tpu.pipeline_mode<synchronous>, transform_indices = @transform_11, window_bounds = array<i64: 4, 32, 8>}, {pipeline_mode = #tpu.pipeline_mode<synchronous>, transform_indices = @transform_12, window_bounds = array<i64: 4, 32, 8>}, {pipeline_mode = #tpu.pipeline_mode<synchronous>, transform_indices = @transform_13, window_bounds = array<i64: 4, 32, 8>}, {pipeline_mode = #tpu.pipeline_mode<synchronous>, transform_indices = @transform_14, window_bounds = array<i64: 4, 8, 32>}, {pipeline_mode = #tpu.pipeline_mode<synchronous>, transform_indices = @transform_15, window_bounds = array<i64: 1, 32>}, {pipeline_mode = #tpu.pipeline_mode<synchronous>, transform_indices = @transform_16, window_bounds = array<i64: 1, 32>}, {pipeline_mode = #tpu.pipeline_mode<synchronous>, transform_indices = @transform_17, window_bounds = array<i64: 32, 64>}, {pipeline_mode = #tpu.pipeline_mode<synchronous>, transform_indices = @transform_18, window_bounds = array<i64: 1, 64>}, {pipeline_mode = #tpu.pipeline_mode<synchronous>, transform_indices = @transform_19, window_bounds = array<i64: 64, 32>}, {pipeline_mode = #tpu.pipeline_mode<synchronous>, transform_indices = @transform_20, window_bounds = array<i64: 1, 32>}, {pipeline_mode = #tpu.pipeline_mode<synchronous>, transform_indices = @transform_21, window_bounds = array<i64: 1, 32>}, {pipeline_mode = #tpu.pipeline_mode<synchronous>, transform_indices = @transform_22, window_bounds = array<i64: 1, 32>}, {transform_indices = @transform_23, window_bounds = array<i64: 1, 8, 32>}, {transform_indices = @transform_24, window_bounds = array<i64: 1, 4, 8, 8>}, {transform_indices = @transform_25, window_bounds = array<i64: 1, 4, 8, 8>}]} {
    %c0 = arith.constant 0 : index
    %c0_0 = arith.constant 0 : index
    %c0_1 = arith.constant 0 : index
    %0 = vector.load %arg2[%c0, %c0_0, %c0_1] : memref<1x8x32xf32, #tpu.memory_space<vmem>>, vector<1x8x32xf32>
    %1 = vector.shape_cast %0 : vector<1x8x32xf32> to vector<8x32xf32>
    %c0_2 = arith.constant 0 : index
    %c0_3 = arith.constant 0 : index
    %c0_4 = arith.constant 0 : index
    %2 = vector.load %arg3[%c0_2, %c0_3, %c0_4] : memref<1x8x32xf32, #tpu.memory_space<vmem>>, vector<1x8x32xf32>
    %3 = vector.shape_cast %2 : vector<1x8x32xf32> to vector<8x32xf32>
    %c0_5 = arith.constant 0 : index
    %c0_6 = arith.constant 0 : index
    %c0_7 = arith.constant 0 : index
    %4 = vector.load %arg4[%c0_5, %c0_6, %c0_7] : memref<1x8x32xf32, #tpu.memory_space<vmem>>, vector<1x8x32xf32>
    %5 = vector.shape_cast %4 : vector<1x8x32xf32> to vector<8x32xf32>
    %c0_8 = arith.constant 0 : index
    %c0_9 = arith.constant 0 : index
    %c0_10 = arith.constant 0 : index
    %6 = vector.load %arg5[%c0_8, %c0_9, %c0_10] : memref<1x8x8xi8, #tpu.memory_space<vmem>>, vector<1x8x8xi8>
    %7 = vector.shape_cast %6 : vector<1x8x8xi8> to vector<8x8xi8>
    %8 = arith.sitofp %7 : vector<8x8xi8> to vector<8x8xf32>
    %cst = arith.constant 0.000000e+00 : f32
    %9 = vector.broadcast %cst : f32 to vector<8x8xf32>
    %10 = arith.cmpf oeq, %8, %9 : vector<8x8xf32>
    %cst_11 = arith.constant -1.000000e+09 : f32
    %cst_12 = arith.constant 0.000000e+00 : f32
    %11 = vector.broadcast %cst_11 : f32 to vector<8x8xf32>
    %12 = vector.broadcast %cst_12 : f32 to vector<8x8xf32>
    %13 = arith.select %10, %11, %12 : vector<8x8xi1>, vector<8x8xf32>
    %c0_13 = arith.constant 0 : index
    %c0_14 = arith.constant 0 : index
    %c0_15 = arith.constant 0 : index
    %14 = vector.load %arg7[%c0_13, %c0_14, %c0_15] : memref<4x32x8xf32, #tpu.memory_space<vmem>>, vector<1x32x8xf32>
    %15 = vector.shape_cast %14 : vector<1x32x8xf32> to vector<32x8xf32>
    %cst_16 = arith.constant dense<0.000000e+00> : vector<8x8xf32>
    %16 = tpu.matmul %1, %15, %cst_16 {dimension_numbers = #tpu.dot_dimension_numbers<[1], [0], [0], [1], [0, 0, 1, 1], [], []>} : vector<8x32xf32>, vector<32x8xf32>, vector<8x8xf32> -> vector<8x8xf32>
    %cst_17 = arith.constant 0.353553385 : f32
    %17 = vector.broadcast %cst_17 : f32 to vector<8x8xf32>
    %18 = arith.mulf %16, %17 : vector<8x8xf32>
    %c0_18 = arith.constant 0 : index
    %c0_19 = arith.constant 0 : index
    %c0_20 = arith.constant 0 : index
    %19 = vector.load %arg8[%c0_18, %c0_19, %c0_20] : memref<4x32x8xf32, #tpu.memory_space<vmem>>, vector<1x32x8xf32>
    %20 = vector.shape_cast %19 : vector<1x32x8xf32> to vector<32x8xf32>
    %cst_21 = arith.constant dense<0.000000e+00> : vector<8x8xf32>
    %21 = tpu.matmul %3, %20, %cst_21 {dimension_numbers = #tpu.dot_dimension_numbers<[1], [0], [0], [1], [0, 0, 1, 1], [], []>} : vector<8x32xf32>, vector<32x8xf32>, vector<8x8xf32> -> vector<8x8xf32>
    %c0_22 = arith.constant 0 : index
    %c0_23 = arith.constant 0 : index
    %c0_24 = arith.constant 0 : index
    %22 = vector.load %arg9[%c0_22, %c0_23, %c0_24] : memref<4x32x8xf32, #tpu.memory_space<vmem>>, vector<1x32x8xf32>
    %23 = vector.shape_cast %22 : vector<1x32x8xf32> to vector<32x8xf32>
    %cst_25 = arith.constant dense<0.000000e+00> : vector<8x8xf32>
    %24 = tpu.matmul %3, %23, %cst_25 {dimension_numbers = #tpu.dot_dimension_numbers<[1], [0], [0], [1], [0, 0, 1, 1], [], []>} : vector<8x32xf32>, vector<32x8xf32>, vector<8x8xf32> -> vector<8x8xf32>
    %cst_26 = arith.constant dense<0.000000e+00> : vector<8x8xf32>
    %25 = tpu.matmul %18, %21, %cst_26 {dimension_numbers = #tpu.dot_dimension_numbers<[1], [1], [0], [0], [0, 0, 1, 0], [], []>} : vector<8x8xf32>, vector<8x8xf32>, vector<8x8xf32> -> vector<8x8xf32>
    %26 = arith.addf %25, %13 : vector<8x8xf32>
    %cst_27 = arith.constant dense<0xFF800000> : vector<8xf32>
    %27 = vector.multi_reduction <maximumf>, %26, %cst_27 [1] : vector<8x8xf32> to vector<8xf32>
    %28 = vector.shape_cast %27 : vector<8xf32> to vector<8x1xf32>
    %29 = vector.broadcast %28 : vector<8x1xf32> to vector<8x8xf32>
    %30 = arith.subf %26, %29 : vector<8x8xf32>
    %31 = math.exp %30 : vector<8x8xf32>
    %cst_28 = arith.constant dense<0.000000e+00> : vector<8xf32>
    %32 = vector.multi_reduction <add>, %31, %cst_28 [1] : vector<8x8xf32> to vector<8xf32>
    %33 = vector.shape_cast %32 : vector<8xf32> to vector<8x1xf32>
    %34 = tpu.reciprocal %33 {approx = true} : vector<8x1xf32> -> vector<8x1xf32>
    %35 = arith.mulf %33, %34 : vector<8x1xf32>
    %cst_29 = arith.constant 2.000000e+00 : f32
    %36 = vector.broadcast %cst_29 : f32 to vector<8x1xf32>
    %37 = arith.subf %36, %35 : vector<8x1xf32>
    %38 = arith.mulf %34, %37 : vector<8x1xf32>
    %39 = vector.broadcast %38 : vector<8x1xf32> to vector<8x8xf32>
    %40 = arith.mulf %31, %39 : vector<8x8xf32>
    %c0_30 = arith.constant 0 : index
    %c0_31 = arith.constant 0 : index
    %c0_32 = arith.constant 0 : index
    %c0_33 = arith.constant 0 : index
    %41 = vector.load %arg26[%c0_30, %c0_31, %c0_32, %c0_33] : memref<1x4x8x8xf32, #tpu.memory_space<vmem>>, vector<1x1x8x8xf32>
    %42 = vector.shape_cast %41 : vector<1x1x8x8xf32> to vector<8x8xf32>
    %43 = vector.shape_cast %40 : vector<8x8xf32> to vector<1x1x8x8xf32>
    tpu.vector_store %arg26[%c0_30, %c0_31, %c0_32, %c0_33], %43 {strides = array<i32>} : memref<1x4x8x8xf32, #tpu.memory_space<vmem>>, vector<1x1x8x8xf32>,
    %cst_34 = arith.constant dense<0.000000e+00> : vector<8x8xf32>
    %44 = tpu.matmul %40, %24, %cst_34 {dimension_numbers = #tpu.dot_dimension_numbers<[1], [0], [0], [1], [0, 0, 1, 1], [], []>} : vector<8x8xf32>, vector<8x8xf32>, vector<8x8xf32> -> vector<8x8xf32>
    %c0_35 = arith.constant 0 : index
    %c0_36 = arith.constant 0 : index
    %c0_37 = arith.constant 0 : index
    %45 = vector.load %arg10[%c0_35, %c0_36, %c0_37] : memref<4x8x32xf32, #tpu.memory_space<vmem>>, vector<1x8x32xf32>
    %46 = vector.shape_cast %45 : vector<1x8x32xf32> to vector<8x32xf32>
    %cst_38 = arith.constant dense<0.000000e+00> : vector<8x32xf32>
    %47 = tpu.matmul %44, %46, %cst_38 {dimension_numbers = #tpu.dot_dimension_numbers<[1], [0], [0], [1], [0, 0, 1, 1], [], []>} : vector<8x8xf32>, vector<8x32xf32>, vector<8x32xf32> -> vector<8x32xf32>
    %c1 = arith.constant 1 : index
    %c0_39 = arith.constant 0 : index
    %c0_40 = arith.constant 0 : index
    %48 = vector.load %arg7[%c1, %c0_39, %c0_40] : memref<4x32x8xf32, #tpu.memory_space<vmem>>, vector<1x32x8xf32>
    %49 = vector.shape_cast %48 : vector<1x32x8xf32> to vector<32x8xf32>
    %cst_41 = arith.constant dense<0.000000e+00> : vector<8x8xf32>
    %50 = tpu.matmul %1, %49, %cst_41 {dimension_numbers = #tpu.dot_dimension_numbers<[1], [0], [0], [1], [0, 0, 1, 1], [], []>} : vector<8x32xf32>, vector<32x8xf32>, vector<8x8xf32> -> vector<8x8xf32>
    %cst_42 = arith.constant 0.353553385 : f32
    %51 = vector.broadcast %cst_42 : f32 to vector<8x8xf32>
    %52 = arith.mulf %50, %51 : vector<8x8xf32>
    %c1_43 = arith.constant 1 : index
    %c0_44 = arith.constant 0 : index
    %c0_45 = arith.constant 0 : index
    %53 = vector.load %arg8[%c1_43, %c0_44, %c0_45] : memref<4x32x8xf32, #tpu.memory_space<vmem>>, vector<1x32x8xf32>
    %54 = vector.shape_cast %53 : vector<1x32x8xf32> to vector<32x8xf32>
    %cst_46 = arith.constant dense<0.000000e+00> : vector<8x8xf32>
    %55 = tpu.matmul %3, %54, %cst_46 {dimension_numbers = #tpu.dot_dimension_numbers<[1], [0], [0], [1], [0, 0, 1, 1], [], []>} : vector<8x32xf32>, vector<32x8xf32>, vector<8x8xf32> -> vector<8x8xf32>
    %c1_47 = arith.constant 1 : index
    %c0_48 = arith.constant 0 : index
    %c0_49 = arith.constant 0 : index
    %56 = vector.load %arg9[%c1_47, %c0_48, %c0_49] : memref<4x32x8xf32, #tpu.memory_space<vmem>>, vector<1x32x8xf32>
    %57 = vector.shape_cast %56 : vector<1x32x8xf32> to vector<32x8xf32>
    %cst_50 = arith.constant dense<0.000000e+00> : vector<8x8xf32>
    %58 = tpu.matmul %3, %57, %cst_50 {dimension_numbers = #tpu.dot_dimension_numbers<[1], [0], [0], [1], [0, 0, 1, 1], [], []>} : vector<8x32xf32>, vector<32x8xf32>, vector<8x8xf32> -> vector<8x8xf32>
    %cst_51 = arith.constant dense<0.000000e+00> : vector<8x8xf32>
    %59 = tpu.matmul %52, %55, %cst_51 {dimension_numbers = #tpu.dot_dimension_numbers<[1], [1], [0], [0], [0, 0, 1, 0], [], []>} : vector<8x8xf32>, vector<8x8xf32>, vector<8x8xf32> -> vector<8x8xf32>
    %60 = arith.addf %59, %13 : vector<8x8xf32>
    %cst_52 = arith.constant dense<0xFF800000> : vector<8xf32>
    %61 = vector.multi_reduction <maximumf>, %60, %cst_52 [1] : vector<8x8xf32> to vector<8xf32>
    %62 = vector.shape_cast %61 : vector<8xf32> to vector<8x1xf32>
    %63 = vector.broadcast %62 : vector<8x1xf32> to vector<8x8xf32>
    %64 = arith.subf %60, %63 : vector<8x8xf32>
    %65 = math.exp %64 : vector<8x8xf32>
    %cst_53 = arith.constant dense<0.000000e+00> : vector<8xf32>
    %66 = vector.multi_reduction <add>, %65, %cst_53 [1] : vector<8x8xf32> to vector<8xf32>
    %67 = vector.shape_cast %66 : vector<8xf32> to vector<8x1xf32>
    %68 = tpu.reciprocal %67 {approx = true} : vector<8x1xf32> -> vector<8x1xf32>
    %69 = arith.mulf %67, %68 : vector<8x1xf32>
    %cst_54 = arith.constant 2.000000e+00 : f32
    %70 = vector.broadcast %cst_54 : f32 to vector<8x1xf32>
    %71 = arith.subf %70, %69 : vector<8x1xf32>
    %72 = arith.mulf %68, %71 : vector<8x1xf32>
    %73 = vector.broadcast %72 : vector<8x1xf32> to vector<8x8xf32>
    %74 = arith.mulf %65, %73 : vector<8x8xf32>
    %c0_55 = arith.constant 0 : index
    %c1_56 = arith.constant 1 : index
    %c0_57 = arith.constant 0 : index
    %c0_58 = arith.constant 0 : index
    %75 = vector.load %arg26[%c0_55, %c1_56, %c0_57, %c0_58] : memref<1x4x8x8xf32, #tpu.memory_space<vmem>>, vector<1x1x8x8xf32>
    %76 = vector.shape_cast %75 : vector<1x1x8x8xf32> to vector<8x8xf32>
    %77 = vector.shape_cast %74 : vector<8x8xf32> to vector<1x1x8x8xf32>
    tpu.vector_store %arg26[%c0_55, %c1_56, %c0_57, %c0_58], %77 {strides = array<i32>} : memref<1x4x8x8xf32, #tpu.memory_space<vmem>>, vector<1x1x8x8xf32>,
    %cst_59 = arith.constant dense<0.000000e+00> : vector<8x8xf32>
    %78 = tpu.matmul %74, %58, %cst_59 {dimension_numbers = #tpu.dot_dimension_numbers<[1], [0], [0], [1], [0, 0, 1, 1], [], []>} : vector<8x8xf32>, vector<8x8xf32>, vector<8x8xf32> -> vector<8x8xf32>
    %c1_60 = arith.constant 1 : index
    %c0_61 = arith.constant 0 : index
    %c0_62 = arith.constant 0 : index
    %79 = vector.load %arg10[%c1_60, %c0_61, %c0_62] : memref<4x8x32xf32, #tpu.memory_space<vmem>>, vector<1x8x32xf32>
    %80 = vector.shape_cast %79 : vector<1x8x32xf32> to vector<8x32xf32>
    %cst_63 = arith.constant dense<0.000000e+00> : vector<8x32xf32>
    %81 = tpu.matmul %78, %80, %cst_63 {dimension_numbers = #tpu.dot_dimension_numbers<[1], [0], [0], [1], [0, 0, 1, 1], [], []>} : vector<8x8xf32>, vector<8x32xf32>, vector<8x32xf32> -> vector<8x32xf32>
    %82 = arith.addf %47, %81 : vector<8x32xf32>
    %c2 = arith.constant 2 : index
    %c0_64 = arith.constant 0 : index
    %c0_65 = arith.constant 0 : index
    %83 = vector.load %arg7[%c2, %c0_64, %c0_65] : memref<4x32x8xf32, #tpu.memory_space<vmem>>, vector<1x32x8xf32>
    %84 = vector.shape_cast %83 : vector<1x32x8xf32> to vector<32x8xf32>
    %cst_66 = arith.constant dense<0.000000e+00> : vector<8x8xf32>
    %85 = tpu.matmul %1, %84, %cst_66 {dimension_numbers = #tpu.dot_dimension_numbers<[1], [0], [0], [1], [0, 0, 1, 1], [], []>} : vector<8x32xf32>, vector<32x8xf32>, vector<8x8xf32> -> vector<8x8xf32>
    %cst_67 = arith.constant 0.353553385 : f32
    %86 = vector.broadcast %cst_67 : f32 to vector<8x8xf32>
    %87 = arith.mulf %85, %86 : vector<8x8xf32>
    %c2_68 = arith.constant 2 : index
    %c0_69 = arith.constant 0 : index
    %c0_70 = arith.constant 0 : index
    %88 = vector.load %arg8[%c2_68, %c0_69, %c0_70] : memref<4x32x8xf32, #tpu.memory_space<vmem>>, vector<1x32x8xf32>
    %89 = vector.shape_cast %88 : vector<1x32x8xf32> to vector<32x8xf32>
    %cst_71 = arith.constant dense<0.000000e+00> : vector<8x8xf32>
    %90 = tpu.matmul %3, %89, %cst_71 {dimension_numbers = #tpu.dot_dimension_numbers<[1], [0], [0], [1], [0, 0, 1, 1], [], []>} : vector<8x32xf32>, vector<32x8xf32>, vector<8x8xf32> -> vector<8x8xf32>
    %c2_72 = arith.constant 2 : index
    %c0_73 = arith.constant 0 : index
    %c0_74 = arith.constant 0 : index
    %91 = vector.load %arg9[%c2_72, %c0_73, %c0_74] : memref<4x32x8xf32, #tpu.memory_space<vmem>>, vector<1x32x8xf32>
    %92 = vector.shape_cast %91 : vector<1x32x8xf32> to vector<32x8xf32>
    %cst_75 = arith.constant dense<0.000000e+00> : vector<8x8xf32>
    %93 = tpu.matmul %3, %92, %cst_75 {dimension_numbers = #tpu.dot_dimension_numbers<[1], [0], [0], [1], [0, 0, 1, 1], [], []>} : vector<8x32xf32>, vector<32x8xf32>, vector<8x8xf32> -> vector<8x8xf32>
    %cst_76 = arith.constant dense<0.000000e+00> : vector<8x8xf32>
    %94 = tpu.matmul %87, %90, %cst_76 {dimension_numbers = #tpu.dot_dimension_numbers<[1], [1], [0], [0], [0, 0, 1, 0], [], []>} : vector<8x8xf32>, vector<8x8xf32>, vector<8x8xf32> -> vector<8x8xf32>
    %95 = arith.addf %94, %13 : vector<8x8xf32>
    %cst_77 = arith.constant dense<0xFF800000> : vector<8xf32>
    %96 = vector.multi_reduction <maximumf>, %95, %cst_77 [1] : vector<8x8xf32> to vector<8xf32>
    %97 = vector.shape_cast %96 : vector<8xf32> to vector<8x1xf32>
    %98 = vector.broadcast %97 : vector<8x1xf32> to vector<8x8xf32>
    %99 = arith.subf %95, %98 : vector<8x8xf32>
    %100 = math.exp %99 : vector<8x8xf32>
    %cst_78 = arith.constant dense<0.000000e+00> : vector<8xf32>
    %101 = vector.multi_reduction <add>, %100, %cst_78 [1] : vector<8x8xf32> to vector<8xf32>
    %102 = vector.shape_cast %101 : vector<8xf32> to vector<8x1xf32>
    %103 = tpu.reciprocal %102 {approx = true} : vector<8x1xf32> -> vector<8x1xf32>
    %104 = arith.mulf %102, %103 : vector<8x1xf32>
    %cst_79 = arith.constant 2.000000e+00 : f32
    %105 = vector.broadcast %cst_79 : f32 to vector<8x1xf32>
    %106 = arith.subf %105, %104 : vector<8x1xf32>
    %107 = arith.mulf %103, %106 : vector<8x1xf32>
    %108 = vector.broadcast %107 : vector<8x1xf32> to vector<8x8xf32>
    %109 = arith.mulf %100, %108 : vector<8x8xf32>
    %c0_80 = arith.constant 0 : index
    %c2_81 = arith.constant 2 : index
    %c0_82 = arith.constant 0 : index
    %c0_83 = arith.constant 0 : index
    %110 = vector.load %arg26[%c0_80, %c2_81, %c0_82, %c0_83] : memref<1x4x8x8xf32, #tpu.memory_space<vmem>>, vector<1x1x8x8xf32>
    %111 = vector.shape_cast %110 : vector<1x1x8x8xf32> to vector<8x8xf32>
    %112 = vector.shape_cast %109 : vector<8x8xf32> to vector<1x1x8x8xf32>
    tpu.vector_store %arg26[%c0_80, %c2_81, %c0_82, %c0_83], %112 {strides = array<i32>} : memref<1x4x8x8xf32, #tpu.memory_space<vmem>>, vector<1x1x8x8xf32>,
    %cst_84 = arith.constant dense<0.000000e+00> : vector<8x8xf32>
    %113 = tpu.matmul %109, %93, %cst_84 {dimension_numbers = #tpu.dot_dimension_numbers<[1], [0], [0], [1], [0, 0, 1, 1], [], []>} : vector<8x8xf32>, vector<8x8xf32>, vector<8x8xf32> -> vector<8x8xf32>
    %c2_85 = arith.constant 2 : index
    %c0_86 = arith.constant 0 : index
    %c0_87 = arith.constant 0 : index
    %114 = vector.load %arg10[%c2_85, %c0_86, %c0_87] : memref<4x8x32xf32, #tpu.memory_space<vmem>>, vector<1x8x32xf32>
    %115 = vector.shape_cast %114 : vector<1x8x32xf32> to vector<8x32xf32>
    %cst_88 = arith.constant dense<0.000000e+00> : vector<8x32xf32>
    %116 = tpu.matmul %113, %115, %cst_88 {dimension_numbers = #tpu.dot_dimension_numbers<[1], [0], [0], [1], [0, 0, 1, 1], [], []>} : vector<8x8xf32>, vector<8x32xf32>, vector<8x32xf32> -> vector<8x32xf32>
    %117 = arith.addf %82, %116 : vector<8x32xf32>
    %c3 = arith.constant 3 : index
    %c0_89 = arith.constant 0 : index
    %c0_90 = arith.constant 0 : index
    %118 = vector.load %arg7[%c3, %c0_89, %c0_90] : memref<4x32x8xf32, #tpu.memory_space<vmem>>, vector<1x32x8xf32>
    %119 = vector.shape_cast %118 : vector<1x32x8xf32> to vector<32x8xf32>
    %cst_91 = arith.constant dense<0.000000e+00> : vector<8x8xf32>
    %120 = tpu.matmul %1, %119, %cst_91 {dimension_numbers = #tpu.dot_dimension_numbers<[1], [0], [0], [1], [0, 0, 1, 1], [], []>} : vector<8x32xf32>, vector<32x8xf32>, vector<8x8xf32> -> vector<8x8xf32>
    %cst_92 = arith.constant 0.353553385 : f32
    %121 = vector.broadcast %cst_92 : f32 to vector<8x8xf32>
    %122 = arith.mulf %120, %121 : vector<8x8xf32>
    %c3_93 = arith.constant 3 : index
    %c0_94 = arith.constant 0 : index
    %c0_95 = arith.constant 0 : index
    %123 = vector.load %arg8[%c3_93, %c0_94, %c0_95] : memref<4x32x8xf32, #tpu.memory_space<vmem>>, vector<1x32x8xf32>
    %124 = vector.shape_cast %123 : vector<1x32x8xf32> to vector<32x8xf32>
    %cst_96 = arith.constant dense<0.000000e+00> : vector<8x8xf32>
    %125 = tpu.matmul %3, %124, %cst_96 {dimension_numbers = #tpu.dot_dimension_numbers<[1], [0], [0], [1], [0, 0, 1, 1], [], []>} : vector<8x32xf32>, vector<32x8xf32>, vector<8x8xf32> -> vector<8x8xf32>
    %c3_97 = arith.constant 3 : index
    %c0_98 = arith.constant 0 : index
    %c0_99 = arith.constant 0 : index
    %126 = vector.load %arg9[%c3_97, %c0_98, %c0_99] : memref<4x32x8xf32, #tpu.memory_space<vmem>>, vector<1x32x8xf32>
    %127 = vector.shape_cast %126 : vector<1x32x8xf32> to vector<32x8xf32>
    %cst_100 = arith.constant dense<0.000000e+00> : vector<8x8xf32>
    %128 = tpu.matmul %3, %127, %cst_100 {dimension_numbers = #tpu.dot_dimension_numbers<[1], [0], [0], [1], [0, 0, 1, 1], [], []>} : vector<8x32xf32>, vector<32x8xf32>, vector<8x8xf32> -> vector<8x8xf32>
    %cst_101 = arith.constant dense<0.000000e+00> : vector<8x8xf32>
    %129 = tpu.matmul %122, %125, %cst_101 {dimension_numbers = #tpu.dot_dimension_numbers<[1], [1], [0], [0], [0, 0, 1, 0], [], []>} : vector<8x8xf32>, vector<8x8xf32>, vector<8x8xf32> -> vector<8x8xf32>
    %130 = arith.addf %129, %13 : vector<8x8xf32>
    %cst_102 = arith.constant dense<0xFF800000> : vector<8xf32>
    %131 = vector.multi_reduction <maximumf>, %130, %cst_102 [1] : vector<8x8xf32> to vector<8xf32>
    %132 = vector.shape_cast %131 : vector<8xf32> to vector<8x1xf32>
    %133 = vector.broadcast %132 : vector<8x1xf32> to vector<8x8xf32>
    %134 = arith.subf %130, %133 : vector<8x8xf32>
    %135 = math.exp %134 : vector<8x8xf32>
    %cst_103 = arith.constant dense<0.000000e+00> : vector<8xf32>
    %136 = vector.multi_reduction <add>, %135, %cst_103 [1] : vector<8x8xf32> to vector<8xf32>
    %137 = vector.shape_cast %136 : vector<8xf32> to vector<8x1xf32>
    %138 = tpu.reciprocal %137 {approx = true} : vector<8x1xf32> -> vector<8x1xf32>
    %139 = arith.mulf %137, %138 : vector<8x1xf32>
    %cst_104 = arith.constant 2.000000e+00 : f32
    %140 = vector.broadcast %cst_104 : f32 to vector<8x1xf32>
    %141 = arith.subf %140, %139 : vector<8x1xf32>
    %142 = arith.mulf %138, %141 : vector<8x1xf32>
    %143 = vector.broadcast %142 : vector<8x1xf32> to vector<8x8xf32>
    %144 = arith.mulf %135, %143 : vector<8x8xf32>
    %c0_105 = arith.constant 0 : index
    %c3_106 = arith.constant 3 : index
    %c0_107 = arith.constant 0 : index
    %c0_108 = arith.constant 0 : index
    %145 = vector.load %arg26[%c0_105, %c3_106, %c0_107, %c0_108] : memref<1x4x8x8xf32, #tpu.memory_space<vmem>>, vector<1x1x8x8xf32>
    %146 = vector.shape_cast %145 : vector<1x1x8x8xf32> to vector<8x8xf32>
    %147 = vector.shape_cast %144 : vector<8x8xf32> to vector<1x1x8x8xf32>
    tpu.vector_store %arg26[%c0_105, %c3_106, %c0_107, %c0_108], %147 {strides = array<i32>} : memref<1x4x8x8xf32, #tpu.memory_space<vmem>>, vector<1x1x8x8xf32>,
    %cst_109 = arith.constant dense<0.000000e+00> : vector<8x8xf32>
    %148 = tpu.matmul %144, %128, %cst_109 {dimension_numbers = #tpu.dot_dimension_numbers<[1], [0], [0], [1], [0, 0, 1, 1], [], []>} : vector<8x8xf32>, vector<8x8xf32>, vector<8x8xf32> -> vector<8x8xf32>
    %c3_110 = arith.constant 3 : index
    %c0_111 = arith.constant 0 : index
    %c0_112 = arith.constant 0 : index
    %149 = vector.load %arg10[%c3_110, %c0_111, %c0_112] : memref<4x8x32xf32, #tpu.memory_space<vmem>>, vector<1x8x32xf32>
    %150 = vector.shape_cast %149 : vector<1x8x32xf32> to vector<8x32xf32>
    %cst_113 = arith.constant dense<0.000000e+00> : vector<8x32xf32>
    %151 = tpu.matmul %148, %150, %cst_113 {dimension_numbers = #tpu.dot_dimension_numbers<[1], [0], [0], [1], [0, 0, 1, 1], [], []>} : vector<8x8xf32>, vector<8x32xf32>, vector<8x32xf32> -> vector<8x32xf32>
    %152 = arith.addf %117, %151 : vector<8x32xf32>
    %153 = arith.addf %152, %1 : vector<8x32xf32>
    %c0_114 = arith.constant 0 : index
    %c0_115 = arith.constant 0 : index
    %154 = vector.load %arg11[%c0_114, %c0_115] : memref<1x32xf32, #tpu.memory_space<vmem>>, vector<1x32xf32>
    %c0_116 = arith.constant 0 : index
    %c0_117 = arith.constant 0 : index
    %155 = vector.load %arg12[%c0_116, %c0_117] : memref<1x32xf32, #tpu.memory_space<vmem>>, vector<1x32xf32>
    %cst_118 = arith.constant dense<0.000000e+00> : vector<8xf32>
    %156 = vector.multi_reduction <add>, %153, %cst_118 [1] : vector<8x32xf32> to vector<8xf32>
    %157 = vector.shape_cast %156 : vector<8xf32> to vector<8x1xf32>
    %cst_119 = arith.constant 3.200000e+01 : f32
    %158 = vector.broadcast %cst_119 : f32 to vector<8x1xf32>
    %159 = arith.divf %157, %158 : vector<8x1xf32>
    %160 = vector.broadcast %159 : vector<8x1xf32> to vector<8x32xf32>
    %161 = arith.subf %153, %160 : vector<8x32xf32>
    %162 = arith.mulf %161, %161 : vector<8x32xf32>
    %cst_120 = arith.constant dense<0.000000e+00> : vector<8xf32>
    %163 = vector.multi_reduction <add>, %162, %cst_120 [1] : vector<8x32xf32> to vector<8xf32>
    %164 = vector.shape_cast %163 : vector<8xf32> to vector<8x1xf32>
    %cst_121 = arith.constant 3.200000e+01 : f32
    %165 = vector.broadcast %cst_121 : f32 to vector<8x1xf32>
    %166 = arith.divf %164, %165 : vector<8x1xf32>
    %167 = vector.broadcast %159 : vector<8x1xf32> to vector<8x32xf32>
    %168 = arith.subf %153, %167 : vector<8x32xf32>
    %cst_122 = arith.constant 9.99999997E-7 : f32
    %169 = vector.broadcast %cst_122 : f32 to vector<8x1xf32>
    %170 = arith.addf %166, %169 : vector<8x1xf32>
    %171 = math.rsqrt %170 : vector<8x1xf32>
    %172 = vector.broadcast %171 : vector<8x1xf32> to vector<8x32xf32>
    %173 = arith.mulf %168, %172 : vector<8x32xf32>
    %174 = vector.broadcast %154 : vector<1x32xf32> to vector<8x32xf32>
    %175 = arith.mulf %173, %174 : vector<8x32xf32>
    %176 = vector.broadcast %155 : vector<1x32xf32> to vector<8x32xf32>
    %177 = arith.addf %175, %176 : vector<8x32xf32>
    %c0_123 = arith.constant 0 : index
    %c0_124 = arith.constant 0 : index
    %c0_125 = arith.constant 0 : index
    %178 = vector.load %arg13[%c0_123, %c0_124, %c0_125] : memref<4x32x8xf32, #tpu.memory_space<vmem>>, vector<1x32x8xf32>
    %179 = vector.shape_cast %178 : vector<1x32x8xf32> to vector<32x8xf32>
    %cst_126 = arith.constant dense<0.000000e+00> : vector<8x8xf32>
    %180 = tpu.matmul %177, %179, %cst_126 {dimension_numbers = #tpu.dot_dimension_numbers<[1], [0], [0], [1], [0, 0, 1, 1], [], []>} : vector<8x32xf32>, vector<32x8xf32>, vector<8x8xf32> -> vector<8x8xf32>
    %cst_127 = arith.constant 0.353553385 : f32
    %181 = vector.broadcast %cst_127 : f32 to vector<8x8xf32>
    %182 = arith.mulf %180, %181 : vector<8x8xf32>
    %c0_128 = arith.constant 0 : index
    %c0_129 = arith.constant 0 : index
    %c0_130 = arith.constant 0 : index
    %183 = vector.load %arg14[%c0_128, %c0_129, %c0_130] : memref<4x32x8xf32, #tpu.memory_space<vmem>>, vector<1x32x8xf32>
    %184 = vector.shape_cast %183 : vector<1x32x8xf32> to vector<32x8xf32>
    %cst_131 = arith.constant dense<0.000000e+00> : vector<8x8xf32>
    %185 = tpu.matmul %5, %184, %cst_131 {dimension_numbers = #tpu.dot_dimension_numbers<[1], [0], [0], [1], [0, 0, 1, 1], [], []>} : vector<8x32xf32>, vector<32x8xf32>, vector<8x8xf32> -> vector<8x8xf32>
    %c0_132 = arith.constant 0 : index
    %c0_133 = arith.constant 0 : index
    %c0_134 = arith.constant 0 : index
    %186 = vector.load %arg15[%c0_132, %c0_133, %c0_134] : memref<4x32x8xf32, #tpu.memory_space<vmem>>, vector<1x32x8xf32>
    %187 = vector.shape_cast %186 : vector<1x32x8xf32> to vector<32x8xf32>
    %cst_135 = arith.constant dense<0.000000e+00> : vector<8x8xf32>
    %188 = tpu.matmul %5, %187, %cst_135 {dimension_numbers = #tpu.dot_dimension_numbers<[1], [0], [0], [1], [0, 0, 1, 1], [], []>} : vector<8x32xf32>, vector<32x8xf32>, vector<8x8xf32> -> vector<8x8xf32>
    %cst_136 = arith.constant dense<0.000000e+00> : vector<8x8xf32>
    %189 = tpu.matmul %182, %185, %cst_136 {dimension_numbers = #tpu.dot_dimension_numbers<[1], [1], [0], [0], [0, 0, 1, 0], [], []>} : vector<8x8xf32>, vector<8x8xf32>, vector<8x8xf32> -> vector<8x8xf32>
    %cst_137 = arith.constant dense<0xFF800000> : vector<8xf32>
    %190 = vector.multi_reduction <maximumf>, %189, %cst_137 [1] : vector<8x8xf32> to vector<8xf32>
    %191 = vector.shape_cast %190 : vector<8xf32> to vector<8x1xf32>
    %192 = vector.broadcast %191 : vector<8x1xf32> to vector<8x8xf32>
    %193 = arith.subf %189, %192 : vector<8x8xf32>
    %194 = math.exp %193 : vector<8x8xf32>
    %cst_138 = arith.constant dense<0.000000e+00> : vector<8xf32>
    %195 = vector.multi_reduction <add>, %194, %cst_138 [1] : vector<8x8xf32> to vector<8xf32>
    %196 = vector.shape_cast %195 : vector<8xf32> to vector<8x1xf32>
    %197 = tpu.reciprocal %196 {approx = true} : vector<8x1xf32> -> vector<8x1xf32>
    %198 = arith.mulf %196, %197 : vector<8x1xf32>
    %cst_139 = arith.constant 2.000000e+00 : f32
    %199 = vector.broadcast %cst_139 : f32 to vector<8x1xf32>
    %200 = arith.subf %199, %198 : vector<8x1xf32>
    %201 = arith.mulf %197, %200 : vector<8x1xf32>
    %202 = vector.broadcast %201 : vector<8x1xf32> to vector<8x8xf32>
    %203 = arith.mulf %194, %202 : vector<8x8xf32>
    %c0_140 = arith.constant 0 : index
    %c0_141 = arith.constant 0 : index
    %c0_142 = arith.constant 0 : index
    %c0_143 = arith.constant 0 : index
    %204 = vector.load %arg27[%c0_140, %c0_141, %c0_142, %c0_143] : memref<1x4x8x8xf32, #tpu.memory_space<vmem>>, vector<1x1x8x8xf32>
    %205 = vector.shape_cast %204 : vector<1x1x8x8xf32> to vector<8x8xf32>
    %206 = vector.shape_cast %203 : vector<8x8xf32> to vector<1x1x8x8xf32>
    tpu.vector_store %arg27[%c0_140, %c0_141, %c0_142, %c0_143], %206 {strides = array<i32>} : memref<1x4x8x8xf32, #tpu.memory_space<vmem>>, vector<1x1x8x8xf32>,
    %cst_144 = arith.constant dense<0.000000e+00> : vector<8x8xf32>
    %207 = tpu.matmul %203, %188, %cst_144 {dimension_numbers = #tpu.dot_dimension_numbers<[1], [0], [0], [1], [0, 0, 1, 1], [], []>} : vector<8x8xf32>, vector<8x8xf32>, vector<8x8xf32> -> vector<8x8xf32>
    %c0_145 = arith.constant 0 : index
    %c0_146 = arith.constant 0 : index
    %c0_147 = arith.constant 0 : index
    %208 = vector.load %arg16[%c0_145, %c0_146, %c0_147] : memref<4x8x32xf32, #tpu.memory_space<vmem>>, vector<1x8x32xf32>
    %209 = vector.shape_cast %208 : vector<1x8x32xf32> to vector<8x32xf32>
    %cst_148 = arith.constant dense<0.000000e+00> : vector<8x32xf32>
    %210 = tpu.matmul %207, %209, %cst_148 {dimension_numbers = #tpu.dot_dimension_numbers<[1], [0], [0], [1], [0, 0, 1, 1], [], []>} : vector<8x8xf32>, vector<8x32xf32>, vector<8x32xf32> -> vector<8x32xf32>
    %c1_149 = arith.constant 1 : index
    %c0_150 = arith.constant 0 : index
    %c0_151 = arith.constant 0 : index
    %211 = vector.load %arg13[%c1_149, %c0_150, %c0_151] : memref<4x32x8xf32, #tpu.memory_space<vmem>>, vector<1x32x8xf32>
    %212 = vector.shape_cast %211 : vector<1x32x8xf32> to vector<32x8xf32>
    %cst_152 = arith.constant dense<0.000000e+00> : vector<8x8xf32>
    %213 = tpu.matmul %177, %212, %cst_152 {dimension_numbers = #tpu.dot_dimension_numbers<[1], [0], [0], [1], [0, 0, 1, 1], [], []>} : vector<8x32xf32>, vector<32x8xf32>, vector<8x8xf32> -> vector<8x8xf32>
    %cst_153 = arith.constant 0.353553385 : f32
    %214 = vector.broadcast %cst_153 : f32 to vector<8x8xf32>
    %215 = arith.mulf %213, %214 : vector<8x8xf32>
    %c1_154 = arith.constant 1 : index
    %c0_155 = arith.constant 0 : index
    %c0_156 = arith.constant 0 : index
    %216 = vector.load %arg14[%c1_154, %c0_155, %c0_156] : memref<4x32x8xf32, #tpu.memory_space<vmem>>, vector<1x32x8xf32>
    %217 = vector.shape_cast %216 : vector<1x32x8xf32> to vector<32x8xf32>
    %cst_157 = arith.constant dense<0.000000e+00> : vector<8x8xf32>
    %218 = tpu.matmul %5, %217, %cst_157 {dimension_numbers = #tpu.dot_dimension_numbers<[1], [0], [0], [1], [0, 0, 1, 1], [], []>} : vector<8x32xf32>, vector<32x8xf32>, vector<8x8xf32> -> vector<8x8xf32>
    %c1_158 = arith.constant 1 : index
    %c0_159 = arith.constant 0 : index
    %c0_160 = arith.constant 0 : index
    %219 = vector.load %arg15[%c1_158, %c0_159, %c0_160] : memref<4x32x8xf32, #tpu.memory_space<vmem>>, vector<1x32x8xf32>
    %220 = vector.shape_cast %219 : vector<1x32x8xf32> to vector<32x8xf32>
    %cst_161 = arith.constant dense<0.000000e+00> : vector<8x8xf32>
    %221 = tpu.matmul %5, %220, %cst_161 {dimension_numbers = #tpu.dot_dimension_numbers<[1], [0], [0], [1], [0, 0, 1, 1], [], []>} : vector<8x32xf32>, vector<32x8xf32>, vector<8x8xf32> -> vector<8x8xf32>
    %cst_162 = arith.constant dense<0.000000e+00> : vector<8x8xf32>
    %222 = tpu.matmul %215, %218, %cst_162 {dimension_numbers = #tpu.dot_dimension_numbers<[1], [1], [0], [0], [0, 0, 1, 0], [], []>} : vector<8x8xf32>, vector<8x8xf32>, vector<8x8xf32> -> vector<8x8xf32>
    %cst_163 = arith.constant dense<0xFF800000> : vector<8xf32>
    %223 = vector.multi_reduction <maximumf>, %222, %cst_163 [1] : vector<8x8xf32> to vector<8xf32>
    %224 = vector.shape_cast %223 : vector<8xf32> to vector<8x1xf32>
    %225 = vector.broadcast %224 : vector<8x1xf32> to vector<8x8xf32>
    %226 = arith.subf %222, %225 : vector<8x8xf32>
    %227 = math.exp %226 : vector<8x8xf32>
    %cst_164 = arith.constant dense<0.000000e+00> : vector<8xf32>
    %228 = vector.multi_reduction <add>, %227, %cst_164 [1] : vector<8x8xf32> to vector<8xf32>
    %229 = vector.shape_cast %228 : vector<8xf32> to vector<8x1xf32>
    %230 = tpu.reciprocal %229 {approx = true} : vector<8x1xf32> -> vector<8x1xf32>
    %231 = arith.mulf %229, %230 : vector<8x1xf32>
    %cst_165 = arith.constant 2.000000e+00 : f32
    %232 = vector.broadcast %cst_165 : f32 to vector<8x1xf32>
    %233 = arith.subf %232, %231 : vector<8x1xf32>
    %234 = arith.mulf %230, %233 : vector<8x1xf32>
    %235 = vector.broadcast %234 : vector<8x1xf32> to vector<8x8xf32>
    %236 = arith.mulf %227, %235 : vector<8x8xf32>
    %c0_166 = arith.constant 0 : index
    %c1_167 = arith.constant 1 : index
    %c0_168 = arith.constant 0 : index
    %c0_169 = arith.constant 0 : index
    %237 = vector.load %arg27[%c0_166, %c1_167, %c0_168, %c0_169] : memref<1x4x8x8xf32, #tpu.memory_space<vmem>>, vector<1x1x8x8xf32>
    %238 = vector.shape_cast %237 : vector<1x1x8x8xf32> to vector<8x8xf32>
    %239 = vector.shape_cast %236 : vector<8x8xf32> to vector<1x1x8x8xf32>
    tpu.vector_store %arg27[%c0_166, %c1_167, %c0_168, %c0_169], %239 {strides = array<i32>} : memref<1x4x8x8xf32, #tpu.memory_space<vmem>>, vector<1x1x8x8xf32>,
    %cst_170 = arith.constant dense<0.000000e+00> : vector<8x8xf32>
    %240 = tpu.matmul %236, %221, %cst_170 {dimension_numbers = #tpu.dot_dimension_numbers<[1], [0], [0], [1], [0, 0, 1, 1], [], []>} : vector<8x8xf32>, vector<8x8xf32>, vector<8x8xf32> -> vector<8x8xf32>
    %c1_171 = arith.constant 1 : index
    %c0_172 = arith.constant 0 : index
    %c0_173 = arith.constant 0 : index
    %241 = vector.load %arg16[%c1_171, %c0_172, %c0_173] : memref<4x8x32xf32, #tpu.memory_space<vmem>>, vector<1x8x32xf32>
    %242 = vector.shape_cast %241 : vector<1x8x32xf32> to vector<8x32xf32>
    %cst_174 = arith.constant dense<0.000000e+00> : vector<8x32xf32>
    %243 = tpu.matmul %240, %242, %cst_174 {dimension_numbers = #tpu.dot_dimension_numbers<[1], [0], [0], [1], [0, 0, 1, 1], [], []>} : vector<8x8xf32>, vector<8x32xf32>, vector<8x32xf32> -> vector<8x32xf32>
    %244 = arith.addf %210, %243 : vector<8x32xf32>
    %c2_175 = arith.constant 2 : index
    %c0_176 = arith.constant 0 : index
    %c0_177 = arith.constant 0 : index
    %245 = vector.load %arg13[%c2_175, %c0_176, %c0_177] : memref<4x32x8xf32, #tpu.memory_space<vmem>>, vector<1x32x8xf32>
    %246 = vector.shape_cast %245 : vector<1x32x8xf32> to vector<32x8xf32>
    %cst_178 = arith.constant dense<0.000000e+00> : vector<8x8xf32>
    %247 = tpu.matmul %177, %246, %cst_178 {dimension_numbers = #tpu.dot_dimension_numbers<[1], [0], [0], [1], [0, 0, 1, 1], [], []>} : vector<8x32xf32>, vector<32x8xf32>, vector<8x8xf32> -> vector<8x8xf32>
    %cst_179 = arith.constant 0.353553385 : f32
    %248 = vector.broadcast %cst_179 : f32 to vector<8x8xf32>
    %249 = arith.mulf %247, %248 : vector<8x8xf32>
    %c2_180 = arith.constant 2 : index
    %c0_181 = arith.constant 0 : index
    %c0_182 = arith.constant 0 : index
    %250 = vector.load %arg14[%c2_180, %c0_181, %c0_182] : memref<4x32x8xf32, #tpu.memory_space<vmem>>, vector<1x32x8xf32>
    %251 = vector.shape_cast %250 : vector<1x32x8xf32> to vector<32x8xf32>
    %cst_183 = arith.constant dense<0.000000e+00> : vector<8x8xf32>
    %252 = tpu.matmul %5, %251, %cst_183 {dimension_numbers = #tpu.dot_dimension_numbers<[1], [0], [0], [1], [0, 0, 1, 1], [], []>} : vector<8x32xf32>, vector<32x8xf32>, vector<8x8xf32> -> vector<8x8xf32>
    %c2_184 = arith.constant 2 : index
    %c0_185 = arith.constant 0 : index
    %c0_186 = arith.constant 0 : index
    %253 = vector.load %arg15[%c2_184, %c0_185, %c0_186] : memref<4x32x8xf32, #tpu.memory_space<vmem>>, vector<1x32x8xf32>
    %254 = vector.shape_cast %253 : vector<1x32x8xf32> to vector<32x8xf32>
    %cst_187 = arith.constant dense<0.000000e+00> : vector<8x8xf32>
    %255 = tpu.matmul %5, %254, %cst_187 {dimension_numbers = #tpu.dot_dimension_numbers<[1], [0], [0], [1], [0, 0, 1, 1], [], []>} : vector<8x32xf32>, vector<32x8xf32>, vector<8x8xf32> -> vector<8x8xf32>
    %cst_188 = arith.constant dense<0.000000e+00> : vector<8x8xf32>
    %256 = tpu.matmul %249, %252, %cst_188 {dimension_numbers = #tpu.dot_dimension_numbers<[1], [1], [0], [0], [0, 0, 1, 0], [], []>} : vector<8x8xf32>, vector<8x8xf32>, vector<8x8xf32> -> vector<8x8xf32>
    %cst_189 = arith.constant dense<0xFF800000> : vector<8xf32>
    %257 = vector.multi_reduction <maximumf>, %256, %cst_189 [1] : vector<8x8xf32> to vector<8xf32>
    %258 = vector.shape_cast %257 : vector<8xf32> to vector<8x1xf32>
    %259 = vector.broadcast %258 : vector<8x1xf32> to vector<8x8xf32>
    %260 = arith.subf %256, %259 : vector<8x8xf32>
    %261 = math.exp %260 : vector<8x8xf32>
    %cst_190 = arith.constant dense<0.000000e+00> : vector<8xf32>
    %262 = vector.multi_reduction <add>, %261, %cst_190 [1] : vector<8x8xf32> to vector<8xf32>
    %263 = vector.shape_cast %262 : vector<8xf32> to vector<8x1xf32>
    %264 = tpu.reciprocal %263 {approx = true} : vector<8x1xf32> -> vector<8x1xf32>
    %265 = arith.mulf %263, %264 : vector<8x1xf32>
    %cst_191 = arith.constant 2.000000e+00 : f32
    %266 = vector.broadcast %cst_191 : f32 to vector<8x1xf32>
    %267 = arith.subf %266, %265 : vector<8x1xf32>
    %268 = arith.mulf %264, %267 : vector<8x1xf32>
    %269 = vector.broadcast %268 : vector<8x1xf32> to vector<8x8xf32>
    %270 = arith.mulf %261, %269 : vector<8x8xf32>
    %c0_192 = arith.constant 0 : index
    %c2_193 = arith.constant 2 : index
    %c0_194 = arith.constant 0 : index
    %c0_195 = arith.constant 0 : index
    %271 = vector.load %arg27[%c0_192, %c2_193, %c0_194, %c0_195] : memref<1x4x8x8xf32, #tpu.memory_space<vmem>>, vector<1x1x8x8xf32>
    %272 = vector.shape_cast %271 : vector<1x1x8x8xf32> to vector<8x8xf32>
    %273 = vector.shape_cast %270 : vector<8x8xf32> to vector<1x1x8x8xf32>
    tpu.vector_store %arg27[%c0_192, %c2_193, %c0_194, %c0_195], %273 {strides = array<i32>} : memref<1x4x8x8xf32, #tpu.memory_space<vmem>>, vector<1x1x8x8xf32>,
    %cst_196 = arith.constant dense<0.000000e+00> : vector<8x8xf32>
    %274 = tpu.matmul %270, %255, %cst_196 {dimension_numbers = #tpu.dot_dimension_numbers<[1], [0], [0], [1], [0, 0, 1, 1], [], []>} : vector<8x8xf32>, vector<8x8xf32>, vector<8x8xf32> -> vector<8x8xf32>
    %c2_197 = arith.constant 2 : index
    %c0_198 = arith.constant 0 : index
    %c0_199 = arith.constant 0 : index
    %275 = vector.load %arg16[%c2_197, %c0_198, %c0_199] : memref<4x8x32xf32, #tpu.memory_space<vmem>>, vector<1x8x32xf32>
    %276 = vector.shape_cast %275 : vector<1x8x32xf32> to vector<8x32xf32>
    %cst_200 = arith.constant dense<0.000000e+00> : vector<8x32xf32>
    %277 = tpu.matmul %274, %276, %cst_200 {dimension_numbers = #tpu.dot_dimension_numbers<[1], [0], [0], [1], [0, 0, 1, 1], [], []>} : vector<8x8xf32>, vector<8x32xf32>, vector<8x32xf32> -> vector<8x32xf32>
    %278 = arith.addf %244, %277 : vector<8x32xf32>
    %c3_201 = arith.constant 3 : index
    %c0_202 = arith.constant 0 : index
    %c0_203 = arith.constant 0 : index
    %279 = vector.load %arg13[%c3_201, %c0_202, %c0_203] : memref<4x32x8xf32, #tpu.memory_space<vmem>>, vector<1x32x8xf32>
    %280 = vector.shape_cast %279 : vector<1x32x8xf32> to vector<32x8xf32>
    %cst_204 = arith.constant dense<0.000000e+00> : vector<8x8xf32>
    %281 = tpu.matmul %177, %280, %cst_204 {dimension_numbers = #tpu.dot_dimension_numbers<[1], [0], [0], [1], [0, 0, 1, 1], [], []>} : vector<8x32xf32>, vector<32x8xf32>, vector<8x8xf32> -> vector<8x8xf32>
    %cst_205 = arith.constant 0.353553385 : f32
    %282 = vector.broadcast %cst_205 : f32 to vector<8x8xf32>
    %283 = arith.mulf %281, %282 : vector<8x8xf32>
    %c3_206 = arith.constant 3 : index
    %c0_207 = arith.constant 0 : index
    %c0_208 = arith.constant 0 : index
    %284 = vector.load %arg14[%c3_206, %c0_207, %c0_208] : memref<4x32x8xf32, #tpu.memory_space<vmem>>, vector<1x32x8xf32>
    %285 = vector.shape_cast %284 : vector<1x32x8xf32> to vector<32x8xf32>
    %cst_209 = arith.constant dense<0.000000e+00> : vector<8x8xf32>
    %286 = tpu.matmul %5, %285, %cst_209 {dimension_numbers = #tpu.dot_dimension_numbers<[1], [0], [0], [1], [0, 0, 1, 1], [], []>} : vector<8x32xf32>, vector<32x8xf32>, vector<8x8xf32> -> vector<8x8xf32>
    %c3_210 = arith.constant 3 : index
    %c0_211 = arith.constant 0 : index
    %c0_212 = arith.constant 0 : index
    %287 = vector.load %arg15[%c3_210, %c0_211, %c0_212] : memref<4x32x8xf32, #tpu.memory_space<vmem>>, vector<1x32x8xf32>
    %288 = vector.shape_cast %287 : vector<1x32x8xf32> to vector<32x8xf32>
    %cst_213 = arith.constant dense<0.000000e+00> : vector<8x8xf32>
    %289 = tpu.matmul %5, %288, %cst_213 {dimension_numbers = #tpu.dot_dimension_numbers<[1], [0], [0], [1], [0, 0, 1, 1], [], []>} : vector<8x32xf32>, vector<32x8xf32>, vector<8x8xf32> -> vector<8x8xf32>
    %cst_214 = arith.constant dense<0.000000e+00> : vector<8x8xf32>
    %290 = tpu.matmul %283, %286, %cst_214 {dimension_numbers = #tpu.dot_dimension_numbers<[1], [1], [0], [0], [0, 0, 1, 0], [], []>} : vector<8x8xf32>, vector<8x8xf32>, vector<8x8xf32> -> vector<8x8xf32>
    %cst_215 = arith.constant dense<0xFF800000> : vector<8xf32>
    %291 = vector.multi_reduction <maximumf>, %290, %cst_215 [1] : vector<8x8xf32> to vector<8xf32>
    %292 = vector.shape_cast %291 : vector<8xf32> to vector<8x1xf32>
    %293 = vector.broadcast %292 : vector<8x1xf32> to vector<8x8xf32>
    %294 = arith.subf %290, %293 : vector<8x8xf32>
    %295 = math.exp %294 : vector<8x8xf32>
    %cst_216 = arith.constant dense<0.000000e+00> : vector<8xf32>
    %296 = vector.multi_reduction <add>, %295, %cst_216 [1] : vector<8x8xf32> to vector<8xf32>
    %297 = vector.shape_cast %296 : vector<8xf32> to vector<8x1xf32>
    %298 = tpu.reciprocal %297 {approx = true} : vector<8x1xf32> -> vector<8x1xf32>
    %299 = arith.mulf %297, %298 : vector<8x1xf32>
    %cst_217 = arith.constant 2.000000e+00 : f32
    %300 = vector.broadcast %cst_217 : f32 to vector<8x1xf32>
    %301 = arith.subf %300, %299 : vector<8x1xf32>
    %302 = arith.mulf %298, %301 : vector<8x1xf32>
    %303 = vector.broadcast %302 : vector<8x1xf32> to vector<8x8xf32>
    %304 = arith.mulf %295, %303 : vector<8x8xf32>
    %c0_218 = arith.constant 0 : index
    %c3_219 = arith.constant 3 : index
    %c0_220 = arith.constant 0 : index
    %c0_221 = arith.constant 0 : index
    %305 = vector.load %arg27[%c0_218, %c3_219, %c0_220, %c0_221] : memref<1x4x8x8xf32, #tpu.memory_space<vmem>>, vector<1x1x8x8xf32>
    %306 = vector.shape_cast %305 : vector<1x1x8x8xf32> to vector<8x8xf32>
    %307 = vector.shape_cast %304 : vector<8x8xf32> to vector<1x1x8x8xf32>
    tpu.vector_store %arg27[%c0_218, %c3_219, %c0_220, %c0_221], %307 {strides = array<i32>} : memref<1x4x8x8xf32, #tpu.memory_space<vmem>>, vector<1x1x8x8xf32>,
    %cst_222 = arith.constant dense<0.000000e+00> : vector<8x8xf32>
    %308 = tpu.matmul %304, %289, %cst_222 {dimension_numbers = #tpu.dot_dimension_numbers<[1], [0], [0], [1], [0, 0, 1, 1], [], []>} : vector<8x8xf32>, vector<8x8xf32>, vector<8x8xf32> -> vector<8x8xf32>
    %c3_223 = arith.constant 3 : index
    %c0_224 = arith.constant 0 : index
    %c0_225 = arith.constant 0 : index
    %309 = vector.load %arg16[%c3_223, %c0_224, %c0_225] : memref<4x8x32xf32, #tpu.memory_space<vmem>>, vector<1x8x32xf32>
    %310 = vector.shape_cast %309 : vector<1x8x32xf32> to vector<8x32xf32>
    %cst_226 = arith.constant dense<0.000000e+00> : vector<8x32xf32>
    %311 = tpu.matmul %308, %310, %cst_226 {dimension_numbers = #tpu.dot_dimension_numbers<[1], [0], [0], [1], [0, 0, 1, 1], [], []>} : vector<8x8xf32>, vector<8x32xf32>, vector<8x32xf32> -> vector<8x32xf32>
    %312 = arith.addf %278, %311 : vector<8x32xf32>
    %313 = arith.addf %312, %177 : vector<8x32xf32>
    %c0_227 = arith.constant 0 : index
    %c0_228 = arith.constant 0 : index
    %314 = vector.load %arg17[%c0_227, %c0_228] : memref<1x32xf32, #tpu.memory_space<vmem>>, vector<1x32xf32>
    %c0_229 = arith.constant 0 : index
    %c0_230 = arith.constant 0 : index
    %315 = vector.load %arg18[%c0_229, %c0_230] : memref<1x32xf32, #tpu.memory_space<vmem>>, vector<1x32xf32>
    %cst_231 = arith.constant dense<0.000000e+00> : vector<8xf32>
    %316 = vector.multi_reduction <add>, %313, %cst_231 [1] : vector<8x32xf32> to vector<8xf32>
    %317 = vector.shape_cast %316 : vector<8xf32> to vector<8x1xf32>
    %cst_232 = arith.constant 3.200000e+01 : f32
    %318 = vector.broadcast %cst_232 : f32 to vector<8x1xf32>
    %319 = arith.divf %317, %318 : vector<8x1xf32>
    %320 = vector.broadcast %319 : vector<8x1xf32> to vector<8x32xf32>
    %321 = arith.subf %313, %320 : vector<8x32xf32>
    %322 = arith.mulf %321, %321 : vector<8x32xf32>
    %cst_233 = arith.constant dense<0.000000e+00> : vector<8xf32>
    %323 = vector.multi_reduction <add>, %322, %cst_233 [1] : vector<8x32xf32> to vector<8xf32>
    %324 = vector.shape_cast %323 : vector<8xf32> to vector<8x1xf32>
    %cst_234 = arith.constant 3.200000e+01 : f32
    %325 = vector.broadcast %cst_234 : f32 to vector<8x1xf32>
    %326 = arith.divf %324, %325 : vector<8x1xf32>
    %327 = vector.broadcast %319 : vector<8x1xf32> to vector<8x32xf32>
    %328 = arith.subf %313, %327 : vector<8x32xf32>
    %cst_235 = arith.constant 9.99999997E-7 : f32
    %329 = vector.broadcast %cst_235 : f32 to vector<8x1xf32>
    %330 = arith.addf %326, %329 : vector<8x1xf32>
    %331 = math.rsqrt %330 : vector<8x1xf32>
    %332 = vector.broadcast %331 : vector<8x1xf32> to vector<8x32xf32>
    %333 = arith.mulf %328, %332 : vector<8x32xf32>
    %334 = vector.broadcast %314 : vector<1x32xf32> to vector<8x32xf32>
    %335 = arith.mulf %333, %334 : vector<8x32xf32>
    %336 = vector.broadcast %315 : vector<1x32xf32> to vector<8x32xf32>
    %337 = arith.addf %335, %336 : vector<8x32xf32>
    %c0_236 = arith.constant 0 : index
    %c0_237 = arith.constant 0 : index
    %338 = vector.load %arg19[%c0_236, %c0_237] : memref<32x64xf32, #tpu.memory_space<vmem>>, vector<32x64xf32>
    %cst_238 = arith.constant dense<0.000000e+00> : vector<8x64xf32>
    %339 = tpu.matmul %337, %338, %cst_238 {dimension_numbers = #tpu.dot_dimension_numbers<[1], [0], [0], [1], [0, 0, 1, 1], [], []>} : vector<8x32xf32>, vector<32x64xf32>, vector<8x64xf32> -> vector<8x64xf32>
    %c0_239 = arith.constant 0 : index
    %c0_240 = arith.constant 0 : index
    %340 = vector.load %arg20[%c0_239, %c0_240] : memref<1x64xf32, #tpu.memory_space<vmem>>, vector<1x64xf32>
    %341 = vector.broadcast %340 : vector<1x64xf32> to vector<8x64xf32>
    %342 = arith.addf %339, %341 : vector<8x64xf32>
    %cst_241 = arith.constant 0.000000e+00 : f32
    %343 = vector.broadcast %cst_241 : f32 to vector<8x64xf32>
    %344 = arith.maximumf %342, %343 : vector<8x64xf32>
    %c0_242 = arith.constant 0 : index
    %c0_243 = arith.constant 0 : index
    %345 = vector.load %arg21[%c0_242, %c0_243] : memref<64x32xf32, #tpu.memory_space<vmem>>, vector<64x32xf32>
    %cst_244 = arith.constant dense<0.000000e+00> : vector<8x32xf32>
    %346 = tpu.matmul %344, %345, %cst_244 {dimension_numbers = #tpu.dot_dimension_numbers<[1], [0], [0], [1], [0, 0, 1, 1], [], []>} : vector<8x64xf32>, vector<64x32xf32>, vector<8x32xf32> -> vector<8x32xf32>
    %c0_245 = arith.constant 0 : index
    %c0_246 = arith.constant 0 : index
    %347 = vector.load %arg22[%c0_245, %c0_246] : memref<1x32xf32, #tpu.memory_space<vmem>>, vector<1x32xf32>
    %348 = vector.broadcast %347 : vector<1x32xf32> to vector<8x32xf32>
    %349 = arith.addf %346, %348 : vector<8x32xf32>
    %350 = arith.addf %349, %337 : vector<8x32xf32>
    %c0_247 = arith.constant 0 : index
    %c0_248 = arith.constant 0 : index
    %351 = vector.load %arg23[%c0_247, %c0_248] : memref<1x32xf32, #tpu.memory_space<vmem>>, vector<1x32xf32>
    %c0_249 = arith.constant 0 : index
    %c0_250 = arith.constant 0 : index
    %352 = vector.load %arg24[%c0_249, %c0_250] : memref<1x32xf32, #tpu.memory_space<vmem>>, vector<1x32xf32>
    %cst_251 = arith.constant dense<0.000000e+00> : vector<8xf32>
    %353 = vector.multi_reduction <add>, %350, %cst_251 [1] : vector<8x32xf32> to vector<8xf32>
    %354 = vector.shape_cast %353 : vector<8xf32> to vector<8x1xf32>
    %cst_252 = arith.constant 3.200000e+01 : f32
    %355 = vector.broadcast %cst_252 : f32 to vector<8x1xf32>
    %356 = arith.divf %354, %355 : vector<8x1xf32>
    %357 = vector.broadcast %356 : vector<8x1xf32> to vector<8x32xf32>
    %358 = arith.subf %350, %357 : vector<8x32xf32>
    %359 = arith.mulf %358, %358 : vector<8x32xf32>
    %cst_253 = arith.constant dense<0.000000e+00> : vector<8xf32>
    %360 = vector.multi_reduction <add>, %359, %cst_253 [1] : vector<8x32xf32> to vector<8xf32>
    %361 = vector.shape_cast %360 : vector<8xf32> to vector<8x1xf32>
    %cst_254 = arith.constant 3.200000e+01 : f32
    %362 = vector.broadcast %cst_254 : f32 to vector<8x1xf32>
    %363 = arith.divf %361, %362 : vector<8x1xf32>
    %364 = vector.broadcast %356 : vector<8x1xf32> to vector<8x32xf32>
    %365 = arith.subf %350, %364 : vector<8x32xf32>
    %cst_255 = arith.constant 9.99999997E-7 : f32
    %366 = vector.broadcast %cst_255 : f32 to vector<8x1xf32>
    %367 = arith.addf %363, %366 : vector<8x1xf32>
    %368 = math.rsqrt %367 : vector<8x1xf32>
    %369 = vector.broadcast %368 : vector<8x1xf32> to vector<8x32xf32>
    %370 = arith.mulf %365, %369 : vector<8x32xf32>
    %371 = vector.broadcast %351 : vector<1x32xf32> to vector<8x32xf32>
    %372 = arith.mulf %370, %371 : vector<8x32xf32>
    %373 = vector.broadcast %352 : vector<1x32xf32> to vector<8x32xf32>
    %374 = arith.addf %372, %373 : vector<8x32xf32>
    %c0_256 = arith.constant 0 : index
    %c0_257 = arith.constant 0 : index
    %c0_258 = arith.constant 0 : index
    %375 = vector.load %arg25[%c0_256, %c0_257, %c0_258] : memref<1x8x32xf32, #tpu.memory_space<vmem>>, vector<1x8x32xf32>
    %376 = vector.shape_cast %375 : vector<1x8x32xf32> to vector<8x32xf32>
    %377 = vector.shape_cast %374 : vector<8x32xf32> to vector<1x8x32xf32>
    tpu.vector_store %arg25[%c0_256, %c0_257, %c0_258], %377 {strides = array<i32>} : memref<1x8x32xf32, #tpu.memory_space<vmem>>, vector<1x8x32xf32>,
    return
  }
  func.func @transform_0(%arg0: i32, %arg1: i32) -> (i32, i32, i32) {
    %c0_i32 = arith.constant 0 : i32
    %c0_i32_0 = arith.constant 0 : i32
    return %arg0, %arg1, %c0_i32 : i32, i32, i32
  }
  func.func @transform_1(%arg0: i32, %arg1: i32) -> (i32, i32, i32) {
    %c0_i32 = arith.constant 0 : i32
    %c0_i32_0 = arith.constant 0 : i32
    %c0_i32_1 = arith.constant 0 : i32
    return %arg0, %c0_i32, %c0_i32_0 : i32, i32, i32
  }
  func.func @transform_2(%arg0: i32, %arg1: i32) -> (i32, i32, i32) {
    %c0_i32 = arith.constant 0 : i32
    %c0_i32_0 = arith.constant 0 : i32
    %c0_i32_1 = arith.constant 0 : i32
    return %arg0, %c0_i32, %c0_i32_0 : i32, i32, i32
  }
  func.func @transform_3(%arg0: i32, %arg1: i32) -> (i32, i32, i32) {
    %c0_i32 = arith.constant 0 : i32
    %c0_i32_0 = arith.constant 0 : i32
    return %arg0, %arg1, %c0_i32 : i32, i32, i32
  }
  func.func @transform_4(%arg0: i32, %arg1: i32) -> (i32, i32, i32) {
    %c0_i32 = arith.constant 0 : i32
    %c0_i32_0 = arith.constant 0 : i32
    %c0_i32_1 = arith.constant 0 : i32
    %c0_i32_2 = arith.constant 0 : i32
    return %c0_i32, %c0_i32_0, %c0_i32_1 : i32, i32, i32
  }
  func.func @transform_5(%arg0: i32, %arg1: i32) -> (i32, i32, i32) {
    %c0_i32 = arith.constant 0 : i32
    %c0_i32_0 = arith.constant 0 : i32
    %c0_i32_1 = arith.constant 0 : i32
    %c0_i32_2 = arith.constant 0 : i32
    return %c0_i32, %c0_i32_0, %c0_i32_1 : i32, i32, i32
  }
  func.func @transform_6(%arg0: i32, %arg1: i32) -> (i32, i32, i32) {
    %c0_i32 = arith.constant 0 : i32
    %c0_i32_0 = arith.constant 0 : i32
    %c0_i32_1 = arith.constant 0 : i32
    %c0_i32_2 = arith.constant 0 : i32
    return %c0_i32, %c0_i32_0, %c0_i32_1 : i32, i32, i32
  }
  func.func @transform_7(%arg0: i32, %arg1: i32) -> (i32, i32, i32) {
    %c0_i32 = arith.constant 0 : i32
    %c0_i32_0 = arith.constant 0 : i32
    %c0_i32_1 = arith.constant 0 : i32
    %c0_i32_2 = arith.constant 0 : i32
    return %c0_i32, %c0_i32_0, %c0_i32_1 : i32, i32, i32
  }
  func.func @transform_8(%arg0: i32, %arg1: i32) -> (i32, i32, i32) {
    %c0_i32 = arith.constant 0 : i32
    %c0_i32_0 = arith.constant 0 : i32
    %c0_i32_1 = arith.constant 0 : i32
    %c0_i32_2 = arith.constant 0 : i32
    return %c0_i32, %c0_i32_0, %c0_i32_1 : i32, i32, i32
  }
  func.func @transform_9(%arg0: i32, %arg1: i32) -> (i32, i32) {
    %c0_i32 = arith.constant 0 : i32
    %c0_i32_0 = arith.constant 0 : i32
    %c0_i32_1 = arith.constant 0 : i32
    return %c0_i32, %c0_i32_0 : i32, i32
  }
  func.func @transform_10(%arg0: i32, %arg1: i32) -> (i32, i32) {
    %c0_i32 = arith.constant 0 : i32
    %c0_i32_0 = arith.constant 0 : i32
    %c0_i32_1 = arith.constant 0 : i32
    return %c0_i32, %c0_i32_0 : i32, i32
  }
  func.func @transform_11(%arg0: i32, %arg1: i32) -> (i32, i32, i32) {
    %c0_i32 = arith.constant 0 : i32
    %c0_i32_0 = arith.constant 0 : i32
    %c0_i32_1 = arith.constant 0 : i32
    %c0_i32_2 = arith.constant 0 : i32
    return %c0_i32, %c0_i32_0, %c0_i32_1 : i32, i32, i32
  }
  func.func @transform_12(%arg0: i32, %arg1: i32) -> (i32, i32, i32) {
    %c0_i32 = arith.constant 0 : i32
    %c0_i32_0 = arith.constant 0 : i32
    %c0_i32_1 = arith.constant 0 : i32
    %c0_i32_2 = arith.constant 0 : i32
    return %c0_i32, %c0_i32_0, %c0_i32_1 : i32, i32, i32
  }
  func.func @transform_13(%arg0: i32, %arg1: i32) -> (i32, i32, i32) {
    %c0_i32 = arith.constant 0 : i32
    %c0_i32_0 = arith.constant 0 : i32
    %c0_i32_1 = arith.constant 0 : i32
    %c0_i32_2 = arith.constant 0 : i32
    return %c0_i32, %c0_i32_0, %c0_i32_1 : i32, i32, i32
  }
  func.func @transform_14(%arg0: i32, %arg1: i32) -> (i32, i32, i32) {
    %c0_i32 = arith.constant 0 : i32
    %c0_i32_0 = arith.constant 0 : i32
    %c0_i32_1 = arith.constant 0 : i32
    %c0_i32_2 = arith.constant 0 : i32
    return %c0_i32, %c0_i32_0, %c0_i32_1 : i32, i32, i32
  }
  func.func @transform_15(%arg0: i32, %arg1: i32) -> (i32, i32) {
    %c0_i32 = arith.constant 0 : i32
    %c0_i32_0 = arith.constant 0 : i32
    %c0_i32_1 = arith.constant 0 : i32
    return %c0_i32, %c0_i32_0 : i32, i32
  }
  func.func @transform_16(%arg0: i32, %arg1: i32) -> (i32, i32) {
    %c0_i32 = arith.constant 0 : i32
    %c0_i32_0 = arith.constant 0 : i32
    %c0_i32_1 = arith.constant 0 : i32
    return %c0_i32, %c0_i32_0 : i32, i32
  }
  func.func @transform_17(%arg0: i32, %arg1: i32) -> (i32, i32) {
    %c0_i32 = arith.constant 0 : i32
    %c0_i32_0 = arith.constant 0 : i32
    %c0_i32_1 = arith.constant 0 : i32
    return %c0_i32, %c0_i32_0 : i32, i32
  }
  func.func @transform_18(%arg0: i32, %arg1: i32) -> (i32, i32) {
    %c0_i32 = arith.constant 0 : i32
    %c0_i32_0 = arith.constant 0 : i32
    %c0_i32_1 = arith.constant 0 : i32
    return %c0_i32, %c0_i32_0 : i32, i32
  }
  func.func @transform_19(%arg0: i32, %arg1: i32) -> (i32, i32) {
    %c0_i32 = arith.constant 0 : i32
    %c0_i32_0 = arith.constant 0 : i32
    %c0_i32_1 = arith.constant 0 : i32
    return %c0_i32, %c0_i32_0 : i32, i32
  }
  func.func @transform_20(%arg0: i32, %arg1: i32) -> (i32, i32) {
    %c0_i32 = arith.constant 0 : i32
    %c0_i32_0 = arith.constant 0 : i32
    %c0_i32_1 = arith.constant 0 : i32
    return %c0_i32, %c0_i32_0 : i32, i32
  }
  func.func @transform_21(%arg0: i32, %arg1: i32) -> (i32, i32) {
    %c0_i32 = arith.constant 0 : i32
    %c0_i32_0 = arith.constant 0 : i32
    %c0_i32_1 = arith.constant 0 : i32
    return %c0_i32, %c0_i32_0 : i32, i32
  }
  func.func @transform_22(%arg0: i32, %arg1: i32) -> (i32, i32) {
    %c0_i32 = arith.constant 0 : i32
    %c0_i32_0 = arith.constant 0 : i32
    %c0_i32_1 = arith.constant 0 : i32
    return %c0_i32, %c0_i32_0 : i32, i32
  }
  func.func @transform_23(%arg0: i32, %arg1: i32) -> (i32, i32, i32) {
    %c0_i32 = arith.constant 0 : i32
    %c0_i32_0 = arith.constant 0 : i32
    return %arg0, %arg1, %c0_i32 : i32, i32, i32
  }
  func.func @transform_24(%arg0: i32, %arg1: i32) -> (i32, i32, i32, i32) {
    %c0_i32 = arith.constant 0 : i32
    %c0_i32_0 = arith.constant 0 : i32
    %c0_i32_1 = arith.constant 0 : i32
    return %arg0, %c0_i32, %arg1, %c0_i32_0 : i32, i32, i32, i32
  }
  func.func @transform_25(%arg0: i32, %arg1: i32) -> (i32, i32, i32, i32) {
    %c0_i32 = arith.constant 0 : i32
    %c0_i32_0 = arith.constant 0 : i32
    %c0_i32_1 = arith.constant 0 : i32
    return %arg0, %c0_i32, %arg1, %c0_i32_0 : i32, i32, i32, i32
  }
}

</mosaic_0001>

<bundles_post_ra>
// kernel: tpu_custom_call.1
= control target key start
LH: loop header
LB: loop body
LE: loop exit
PB: predicated region body
PF: predicated region fallthrough
CT: control target
= control target key end

     0   :  { %s7360_s0 = inlined_call_operand.vmem [shape: f32[2,8,32], index: 0, kind: input, shape index: {}]   ;;  %s7361_s1 = inlined_call_operand.vmem [shape: f32[2,8,32], index: 1, kind: input, shape index: {}]   ;;  %s7362_s2 = inlined_call_operand.vmem [shape: f32[2,8,32], index: 2, kind: input, shape index: {}]   ;;  %s7363_s3 = inlined_call_operand.vmem [shape: s8[2,8,8], index: 3, kind: input, shape index: {}]   ;;  %s7364_s4 = inlined_call_operand.<no memory space> [shape: s8[1,1,1], index: 4, kind: input, shape index: {}]   ;;  %s7365_s5 = inlined_call_operand.vmem [shape: f32[4,32,8], index: 5, kind: input, shape index: {}]   ;;  %s7366_s6 = inlined_call_operand.vmem [shape: f32[4,32,8], index: 6, kind: input, shape index: {}]   ;;  %s7367_s7 = inlined_call_operand.vmem [shape: f32[4,32,8], index: 7, kind: input, shape index: {}]   ;;  %s7368_s8 = inlined_call_operand.vmem [shape: f32[4,8,32], index: 8, kind: input, shape index: {}]   ;;  %s7369_s9 = inlined_call_operand.vmem [shape: f32[1,32], index: 9, kind: input, shape index: {}]   ;;  %s7370_s10 = inlined_call_operand.vmem [shape: f32[1,32], index: 10, kind: input, shape index: {}]   ;;  %s7371_s11 = inlined_call_operand.vmem [shape: f32[4,32,8], index: 11, kind: input, shape index: {}]   ;;  %s7372_s12 = inlined_call_operand.vmem [shape: f32[4,32,8], index: 12, kind: input, shape index: {}]   ;;  %s7373_s13 = inlined_call_operand.vmem [shape: f32[4,32,8], index: 13, kind: input, shape index: {}]   ;;  %s7374_s14 = inlined_call_operand.vmem [shape: f32[4,8,32], index: 14, kind: input, shape index: {}]   ;;  %s7375_s15 = inlined_call_operand.vmem [shape: f32[1,32], index: 15, kind: input, shape index: {}]   ;;  %s7376_s16 = inlined_call_operand.vmem [shape: f32[1,32], index: 16, kind: input, shape index: {}]   ;;  %s7377_s17 = inlined_call_operand.vmem [shape: f32[32,64], index: 17, kind: input, shape index: {}]   ;;  %s7378_s18 = inlined_call_operand.vmem [shape: f32[1,64], index: 18, kind: input, shape index: {}]   ;;  %s7379_s19 = inlined_call_operand.vmem [shape: f32[64,32], index: 19, kind: input, shape index: {}]   ;;  %s7380_s20 = inlined_call_operand.vmem [shape: f32[1,32], index: 20, kind: input, shape index: {}]   ;;  %s7381_s21 = inlined_call_operand.vmem [shape: f32[1,32], index: 21, kind: input, shape index: {}]   ;;  %s7382_s22 = inlined_call_operand.vmem [shape: f32[1,32], index: 22, kind: input, shape index: {}]   ;;  %s7383_s23 = inlined_call_operand.hbm [shape: f32[2,8,32], index: 23, kind: output, shape index: {0}]   ;;  %s7384_s24 = inlined_call_operand.hbm [shape: f32[2,4,8,8], index: 24, kind: output, shape index: {1}]   ;;  %s7385_s25 = inlined_call_operand.hbm [shape: f32[2,4,8,8], index: 25, kind: output, shape index: {2}]  }
   0x1   :  { %7408 = sst [smem:[#allocation18_spill]] %s7360_s0 }
   0x2   :  { %7409 = sst [smem:[#allocation19_spill]] %s7361_s1 }
   0x3   :  { %7410 = sst [smem:[#allocation20_spill]] %s7362_s2 }
   0x4   :  { %7411 = sst [smem:[#allocation21_spill]] %s7363_s3 }
   0x5   :  { %7412 = sst [smem:[#allocation22_spill]] %s7365_s5 }
   0x6   :  { %7413 = sst [smem:[#allocation23_spill]] %s7366_s6 }
   0x7   :  { %7414 = sst [smem:[#allocation24_spill]] %s7367_s7 }
   0x8   :  { %7415 = sst [smem:[#allocation25_spill]] %s7368_s8 }
   0x9   :  { %7416 = sst [smem:[#allocation26_spill]] %s7369_s9 }
   0xa   :  { %7417 = sst [smem:[#allocation27_spill]] %s7370_s10 }
   0xb   :  { %7418 = sst [smem:[#allocation28_spill]] %s7371_s11 }
   0xc   :  { %7419 = sst [smem:[#allocation29_spill]] %s7372_s12 }
   0xd   :  { %7420 = sst [smem:[#allocation30_spill]] %s7373_s13 }
   0xe   :  { %7421 = sst [smem:[#allocation31_spill]] %s7381_s21 }
   0xf   :  { %7422 = sst [smem:[#allocation32_spill]] %s7382_s22 }
  0x10   :  { %7423 = sst [smem:[#allocation33_spill]] %s7383_s23 }
  0x11   :  { %7424 = sst [smem:[#allocation34_spill]] %s7384_s24 }
  0x12   :  { %7425 = sst [smem:[#allocation35_spill]] %s7385_s25 }
  0x13   :  { %33 = vsyncpa [#allocation4], 0 }
  0x14   :  { %35 = vsyncpa [#allocation4 + $0x1], 0 }
  0x15   :  { %36 = vsyncpa [#allocation6], 0 }
  0x16   :  { %38 = vsyncpa [#allocation6 + $0x1], 0  ;;  %s6433_s29 = smov 0   ;;  %s6435_s2 = smov 0  }
  0x17   :  { %s6437_s6 = smov 0   ;;  %s6439_s30 = smov 0  }
  0x18   :  { %s6441_s7 = smov 0   ;;  %s6443_s3 = smov 0  }
  0x19 LB: > { %7426 = sst [smem:[#allocation10_spill]] %s6273_s29  ;;  %s7390_s26 = sadd.s32 4294967295, %s6293_s3   ;;  %s6293_s3 = sphi %s6443_s3, %s44_s3   ;;  %s6289_s7 = sphi %s6441_s7, %s7468_s7   ;;  %s6285_s30 = sphi %s6439_s30, %s7467_s30   ;;  %s6281_s6 = sphi %s6437_s6, %s7466_s6   ;;  %s6277_s2 = sphi %s6435_s2, %s7470_s2   ;;  %s6273_s29 = sphi %s6433_s29, %s7469_s29  }
  0x1a   : > { %7427 = sst [smem:[#allocation11_spill]] %s6281_s6  ;;  %s7393_s1 = sadd.s32 4294967294, %s6293_s3  }
  0x1b   : > { %7428 = sst [smem:[#allocation12_spill]] %s6285_s30  ;;  %s56_s8 = sadd.s32 1, %s6289_s7 }
  0x1c   : > { %7429 = sst [smem:[#allocation13_spill]] %s6289_s7  ;;  %s572_s27 = sadd.s32 1, %s6281_s6 }
  0x1d   : > { %p58_p0 = scmp.ge.s32.totalorder %s56_s8, 2  ;;  %p582_p1 = scmp.ne.s32.totalorder %s6281_s6, %s6277_s2 }
  0x1e   : > { %p583_p2 = scmp.eq.s32.totalorder %s7390_s26, 1  ;;  %p588_p3 = scmp.ne.s32.totalorder %s6277_s2, %s6273_s29 }
  0x1f   : > { %s7472_s8 = smov (%p58_p0, %s56_s8), 0  ;;  %p589_p5 = scmp.eq.s32.totalorder %s7393_s1, 1 }
  0x20   : > { %7430 = sst [smem:[#allocation14_spill]] %s7472_s8  ;;  %p6475_p4 = por %p583_p2, %p582_p1 }
  0x21   : > { %s567_s28 = ssub.s32 %s6289_s7, %s7472_s8  ;;  %p5119_p6 = scmp.ge.s32.totalorder %s6293_s3, 1 }
  0x22   : > { %s7431_s4 = scalar_select %p6475_p4, 1, 0 }
  0x23   : > { %p570_p7 = scmp.eq.s32.totalorder %s567_s28, 0  ;;  %p6484_p8 = por %p589_p5, %p588_p3 }
  0x24   : > { %7432 = sst [smem:[#allocation15_spill]] %s7431_s4  ;;  %p754_p9 = scmp.lt.s32.totalorder %s6293_s3, 3 }
  0x25   : > { %s7433_s9 = scalar_select %p6484_p8, 1, 0 }
  0x26   : > { %s6490_s5 = scalar_select %p570_p7, %s6281_s6, %s572_s27  }
  0x27   : > { %7434 = sst [smem:[#allocation16_spill]] %s7433_s9  ;;  %p755_p10 = pnand %p5119_p6, %p754_p9 }
  0x28   : > { %7435 = sst [smem:[#allocation17_spill]] %s6490_s5  ;;  %s7436_s29 = sld [smem:[#allocation22_spill]] (!%p755_p10)  ;;  %v6295_v3 = vmov (!%p755_p10), 0.0|0.0   ;;  %vm6296_vm0 = vmmov (!%p755_p10), 0   ;;  %v6297_v11 = vmov (!%p755_p10), 0.0   ;;  %vm883_vm1 = vcmask (!%p755_p10), 261120  }
  0x29   : > { %758 = sbr.rel (%p755_p10) target bundleno = 9176 (0x23d8), region = 112  ;;  %s7438_s8 = sld [smem:[#allocation23_spill]] (!%p755_p10)  ;;  %5885 = vmatprep.subr.bf16.mxu0 (!%p755_p10), %v6295_v3  ;;  %5891 = vmatprep.subr.bf16.mxu1 (!%p755_p10), %v6295_v3  ;;  %vm1109_vm2 = vcmask (!%p755_p10), 64512   ;;  %vm4776_vm4 = vcmask (!%p755_p10), 523264  }
  0x2a   : > { %p849_p11 = scmp.lt.s32.totalorder (!%p755_p10), %s6285_s30, 1  ;;  %5479 = vmatprep.mubr.msk.f32.mxu0 (!%p755_p10), %vm6296_vm0, %v6297_v11  ;;  %5490 = vmatprep.mubr.msk.f32.mxu1 (!%p755_p10), %vm6296_vm0, %v6297_v11  ;;  %s7441_s6 = sld [smem:[#allocation18_spill]] (!%p755_p10) }
  0x2b   : > { %s7442_s4 = sld [smem:[#allocation19_spill]] (!%p755_p10)  ;;  %s7444_s0 = sld [smem:[#allocation25_spill]] (!%p755_p10) }
  0x2c   : > { %s7445_s12 = sld [smem:[#allocation29_spill]] (!%p755_p10)  ;;  %s7446_s11 = sld [smem:[#allocation28_spill]] (!%p755_p10) }
  0x2d   : > { %s7448_s25 = sld [smem:[#allocation26_spill]] (!%p755_p10)  ;;  %s7449_s13 = sld [smem:[#allocation30_spill]] (!%p755_p10) }
  0x2e   : > { %s7437_s23 = smov (!%p755_p10), %s7436_s29  ;;  %v879_v0 = vld [vmem:[%s7436_s29] sm:$0xff] (!%p755_p10)  ;;  %s7439_s29 = sld [smem:[#allocation24_spill]] (!%p755_p10) }
  0x2f   : > { %v880_v1 = vld [vmem:[%s7437_s23 + $0x8] sm:$0xff] (!%p755_p10)  ;;  %v958_v2 = vld [vmem:[%s7438_s8] sm:$0xff] (!%p755_p10)  ;;  %v881_v6 = vld [vmem:[%s7437_s23 + $0x10] sm:$0xff] (!%p755_p10)  ;;  %s7450_s10 = sld [smem:[#allocation27_spill]] (!%p755_p10)  ;;  %s7454_s21 = sadd.s32 (!%p755_p10), 4294967295, %s6293_s3  }
  0x30   : > { %v5886_v4 = vpack.c.bf16 %v880_v1, %v879_v0  ;;  %v959_v5 = vld [vmem:[%s7438_s8 + $0x8] sm:$0xff]  ;;  %v882_v7 = vld [vmem:[%s7437_s23 + $0x18] sm:$0xff]  ;;  %v960_v9 = vld [vmem:[%s7438_s8 + $0x10] sm:$0xff]  ;;  %s6524_s7 = scalar_select %p849_p11, %s6285_s30, 1 }
  0x31   : > { %v5892_v8 = vpack.c.bf16 %v959_v5, %v958_v2  ;;  %v961_v10 = vld [vmem:[%s7438_s8 + $0x18] sm:$0xff]  ;;  %v5889_v12 = vpack.c.bf16 %v882_v7, %v881_v6  ;;  %v5133_v42 = vld [vmem:[%s7437_s23 + $0x20] sm:$0xff]  ;;  %v5134_v43 = vld [vmem:[%s7437_s23 + $0x28] sm:$0xff]  ;;  %s7220_s22 = sand.u32 1, %s7454_s21   ;;  %s6298_s21 = smov [#allocation5]  }
  0x32   : > { %5887 = vmatpush3.bf16.msra.mxu0 %v5886_v4  ;;  %v5895_v13 = vpack.c.bf16 %v961_v10, %v960_v9  ;;  %s6535_s1 = sshll.u32 %s6524_s7, 3  ;;  %s5126_s24 = sshll.u32 %s6524_s7, 1  ;;  %v5904_v44 = vpack.c.bf16 %v5134_v43, %v5133_v42  ;;  %v5135_v45 = vld [vmem:[%s7437_s23 + $0x30] sm:$0xff]  ;;  %v5136_v46 = vld [vmem:[%s7437_s23 + $0x38] sm:$0xff]  ;;  %v5138_v52 = vld [vmem:[%s7438_s8 + $0x20] sm:$0xff] }
  0x33   : > { %5893 = vmatpush3.bf16.msra.mxu1 %v5892_v8  ;;  %5888 = vmatprep.subr.bf16.mxu0 %v6295_v3  ;;  %s855_s9 = scalar_lea.vmem %s7441_s6, %s6535_s1  ;;  %s859_s30 = scalar_lea.vmem %s7442_s4, %s6535_s1  ;;  %v5907_v47 = vpack.c.bf16 %v5136_v46, %v5135_v45  ;;  %v5139_v53 = vld [vmem:[%s7438_s8 + $0x28] sm:$0xff]  ;;  %v5140_v57 = vld [vmem:[%s7438_s8 + $0x30] sm:$0xff]  ;;  %v5141_v58 = vld [vmem:[%s7438_s8 + $0x38] sm:$0xff] }
  0x34   : > { %s7440_s26 = smov %s7439_s29  ;;  %v1035_v14 = vld [vmem:[%s7439_s29] sm:$0xff]  ;;  %5894 = vmatprep.subr.bf16.mxu1 %v6295_v3  ;;  %s7443_s4 = sld [smem:[#allocation21_spill]]  ;;  %v5910_v55 = vpack.c.bf16 %v5139_v53, %v5138_v52  ;;  %v5913_v59 = vpack.c.bf16 %v5141_v58, %v5140_v57  ;;  %v5157_v42 = vld [vmem:[%s7437_s23 + $0x50] sm:$0xff]  ;;  %v5158_v43 = vld [vmem:[%s7437_s23 + $0x58] sm:$0xff] }
  0x35   : > { %v1036_v15 = vld [vmem:[%s7440_s26 + $0x8] sm:$0xff]  ;;  %v6545_v16 = vld [vmem:[%s855_s9] sm:$0xff]  ;;  %v1037_v19 = vld [vmem:[%s7440_s26 + $0x10] sm:$0xff]  ;;  %s6606_s6 = sand.u32 1, %s6277_s2   ;;  %v5925_v46 = vpack.c.bf16 %v5158_v43, %v5157_v42 }
  0x36   : > { %5890 = vmatpush3.bf16.msra.mxu0 %v5889_v12  ;;  %v5898_v17 = vpack.c.bf16 %v1036_v15, %v1035_v14  ;;  %v6547_v18 = vld [vmem:[%s859_s30] sm:$0xff]  ;;  %v1038_v20 = vld [vmem:[%s7440_s26 + $0x18] sm:$0xff]  ;;  %v5144_v5 = vld [vmem:[%s7440_s26 + $0x28] sm:$0xff] }
  0x37   : > { %5896 = vmatpush3.bf16.msra.mxu1 %v5895_v13  ;;  %5897 = vmatprep.subr.bf16.mxu0 %v6295_v3  ;;  %v5901_v21 = vpack.c.bf16 %v1038_v20, %v1037_v19  ;;  %v5143_v4 = vld [vmem:[%s7440_s26 + $0x20] sm:$0xff]  ;;  %v5145_v6 = vld [vmem:[%s7440_s26 + $0x30] sm:$0xff]  ;;  %v5146_v8 = vld [vmem:[%s7440_s26 + $0x38] sm:$0xff] }
  0x38   : > { %5509 = vmatprep.subr.mxu1 %v6297_v11  ;;  %v5916_v7 = vpack.c.bf16 %v5144_v5, %v5143_v4  ;;  %v5919_v9 = vpack.c.bf16 %v5146_v8, %v5145_v6  ;;  %v5165_v57 = vld [vmem:[%s7440_s26 + $0x40] sm:$0xff]  ;;  %v5166_v58 = vld [vmem:[%s7440_s26 + $0x48] sm:$0xff] }
  0x39   : > { %5480 = vmatmul.mubr.msk.f32.vlgmr.msra.gmra.mrb[0].mxu0 %vm883_vm1, %v6545_v16 }
  0x3a   : > { %5491 = vmatmul.mubr.msk.f32.vlgmr.msra.gmra.mrb[0].mxu1 %vm883_vm1, %v6547_v18  ;;  %5899 = vmatpush3.bf16.msra.mxu0 %v5898_v17  ;;  %s870_s9 = scalar_lea.vmem %s7443_s4, %s5126_s24  ;;  %s7404_s24 = sshll.u32 %s6606_s6, 5 }
  0x3b   : > { %5900 = vmatprep.subr.bf16.mxu0 %v6295_v3  ;;  %5501 = vmatprep.mubr.msk.f32.mxu0 %vm6296_vm0, %v6297_v11  ;;  %v874_v29 = vld [vmem:[%s870_s9] sm:$0x3]  ;;  %s6623_s28 = scalar_lea.vmem [#allocation5], %s7404_s24  ;;  %s7447_s24 = sld [smem:[#allocation20_spill]] }
  0x3c   : > { %5511 = vmatprep.mubr.msk.f32.mxu1 %vm6296_vm0, %v6297_v11  ;;  %v875_v30 = vunpack.c.0.s8 %v874_v29  ;;  %s7451_s9 = sshll.u32 %s6606_s6, 5 }
  0x3d   : > { %s6946_s7 = scalar_lea.vmem [#allocation7], %s7451_s9  ;;  %s6159_s9 = sshll.u32 %s6298_s21, 4  ;;  %s6160_s9 = int_to_ptr.vmem [resolvable:$false] %s6159_s9 }
  0x3e   : > { %5902 = vmatpush3.bf16.msra.mxu0 %v5901_v21  ;;  %v876_v31 = vcvt.s32.f32 %v875_v30 }
  0x3f   : > { %5504 = vmatprep.subr.mxu0 %v6297_v11 }
  0x40   : > { %vm877_vm3 = vcmp.eq.f32.partialorder %v876_v31, 0.0  ;;  %v1274_v31 = vld [vmem:[%s7444_s0] sm:$0xff] }
  0x41   : > { %5502 = vmatmul.mubr.msk.f32.vlgmr.msra.gmra.mrb[2].mxu0 %vm883_vm1, %v6547_v18  ;;  %v6582_v32 = vsel %vm877_vm3, -1e+09, %v6297_v11  ;;  %s863_s30 = scalar_lea.vmem %s7447_s24, %s6535_s1  ;;  %s7455_s24 = sld [smem:[#allocation34_spill]] }
  0x42   : > { %5506 = vmatprep.mubr.msk.f32.mxu0 %vm6296_vm0, %v6297_v11 }
 0x10c   : > { %v953_v22 = vpop.f32.mrb[0].mxu0 }
 0x10d   : > { %v957_v23 = vmul.f32 0.35355338, %v953_v22  ;;  %v1031_v24 = vpop.f32.mrb[0].mxu1  ;;  %v5481_v25 = vpop.f32.mrb[1].mxu0 }
 0x10e   : > { %v5492_v26 = vpop.f32.mrb[1].mxu1  ;;  %5505 = vmatpush3.xpose.msk.msra.mxu0 %vm1109_vm2, %v1031_v24  ;;  %v5152_v24 = vld [vmem:[%s7444_s0 + $0x8] sm:$0xff] }
 0x10f   : > { %5903 = vmatprep.subr.bf16.mxu0 %v6295_v3 }
 0x111   : > { %5507 = vmatmul.mubr.msk.f32.vlgmr.msra.gmra.mrb[4].mxu0 %vm1109_vm2, %v957_v23 }
 0x112   : > { %5522 = vmatprep.mubr.msk.f32.mxu0 %vm6296_vm0, %v6297_v11  ;;  %5905 = vmatpush3.bf16.msra.mxu0 %v5904_v44 }
 0x113   : > { %5906 = vmatprep.subr.bf16.mxu0 %v6295_v3 }
 0x114   : > { %v1105_v27 = vpop.f32.mrb[2].mxu0 }
 0x115   : > { %v5503_v28 = vpop.f32.mrb[3].mxu0  ;;  %5510 = vmatpush3.msra.mxu1 %v1105_v27 }
 0x116   : > { %5909 = vmatprep.subr.bf16.mxu1 %v6295_v3  ;;  %5908 = vmatpush3.bf16.msra.mxu0 %v5907_v47 }
 0x117   : > { %5915 = vmatprep.subr.bf16.mxu0 %v6295_v3 }
 0x119   : > { %5523 = vmatmul.mubr.msk.f32.vlgmr.msra.gmra.mrb[6].mxu0 %vm883_vm1, %v6545_v16 }
 0x11a   : > { %5544 = vmatprep.mubr.msk.f32.mxu0 %vm6296_vm0, %v6297_v11  ;;  %5917 = vmatpush3.bf16.msra.mxu0 %v5916_v7 }
 0x11b   : > { %5918 = vmatprep.subr.bf16.mxu0 %v6295_v3 }
 0x11e   : > { %5920 = vmatpush3.bf16.msra.mxu0 %v5919_v9 }
 0x11f   : > { %5557 = vmatprep.subr.mxu0 %v6297_v11 }
 0x121   : > { %5545 = vmatmul.mubr.msk.f32.vlgmr.msra.gmra.mrb[8].mxu0 %vm883_vm1, %v6547_v18 }
 0x122   : > { %5559 = vmatprep.mubr.msk.f32.mxu0 %vm6296_vm0, %v6297_v11  ;;  %5558 = vmatpush3.msra.mxu0 %v5152_v24  ;;  %v5178_v24 = vld [vmem:[%s7437_s23 + $0x70] sm:$0xff] }
 0x123   : > { %5921 = vmatprep.subr.bf16.mxu0 %v6295_v3 }
 0x1e4   : > { %v1182_v33 = vpop.f32.mrb[4].mxu0 }
 0x1e5   : > { %v1183_v34 = vadd.f32 %v1182_v33, %v6582_v32  ;;  %v5508_v35 = vpop.f32.mrb[5].mxu0  ;;  %v5160_v33 = vld [vmem:[%s7438_s8 + $0x40] sm:$0xff] }
 0x1e7   : > { %v1186_v36 = vsel %vm1109_vm2, %v1183_v34, -inf }
 0x1e8   : > { %1187 = vmax.xlane.f32.xlu0 %v1186_v36  ;;  %v5162_v36 = vld [vmem:[%s7438_s8 + $0x50] sm:$0xff] }
 0x1ec   : > { %v1346_v60 = vpop.f32.mrb[6].mxu0 }
 0x1ed   : > { %v5524_v61 = vpop.f32.mrb[7].mxu0  ;;  %v1350_v0 = vmul.f32 0.35355338, %v1346_v60  ;;  %v5934_v60 = vpack.c.bf16 %v5166_v58, %v5165_v57 }
 0x1ee   : > { %v5168_v61 = vld [vmem:[%s7440_s26 + $0x58] sm:$0xff] }
 0x1f4   : > { %v1497_v22 = vpop.f32.mrb[8].mxu0 }
 0x1f5   : > { %v5546_v23 = vpop.f32.mrb[9].mxu0 }
 0x275   : > { %v1188_v37 = vpop.xlane.xlu0 %1187 }
 0x276   : > { %v1189_v38 = vsub.f32 %v1183_v34, %v1188_v37  ;;  %v5161_v34 = vld [vmem:[%s7438_s8 + $0x48] sm:$0xff]  ;;  %v5163_v37 = vld [vmem:[%s7438_s8 + $0x58] sm:$0xff] }
 0x277   : > { %v5928_v35 = vpack.c.bf16 %v5161_v34, %v5160_v33 }
 0x278   : > { %v1190_v39 = vmul.f32 1.442695, %v1189_v38  ;;  %v5931_v38 = vpack.c.bf16 %v5163_v37, %v5162_v36 }
 0x27a   : > { %6117 = vpow2.f32 %v1190_v39  ;;  %v5155_v39 = vld [vmem:[%s7437_s23 + $0x40] sm:$0xff] }
 0x284   : > { %v6118_v40 = vpop.eup %6117 }
 0x285   : > { %v1192_v41 = vsel %vm1109_vm2, %v6118_v40, 0.0 }
 0x286   : > { %1193 = vadd.xlane.f32.xlu0 %v1192_v41 }
 0x313   : > { %v1194_v48 = vpop.xlane.xlu0 %1193 }
 0x314   : > { %6119 = vrcp.f32 %v1194_v48 }
 0x31e   : > { %v6120_v49 = vpop.eup %6119 }
 0x31f   : > { %v1196_v50 = vmul.f32 %v6120_v49, %v1194_v48 }
 0x321   : > { %v1197_v51 = vsub.f32 2.0, %v1196_v50 }
 0x323   : > { %v1198_v54 = vmul.f32 %v6120_v49, %v1197_v51 }
 0x325   : > { %v1199_v56 = vmul.f32 %v6118_v40, %v1198_v54  ;;  %v5156_v40 = vld [vmem:[%s7437_s23 + $0x48] sm:$0xff] }
 0x326   : > { %v5922_v41 = vpack.c.bf16 %v5156_v40, %v5155_v39 }
 0x327   : > { %1200 = vst.msk [vmem:[%s6623_s28] sm:$0xff] %vm1109_vm2, %v1199_v56  ;;  %5512 = vmatmul.mubr.msk.f32.vlgmr.msra.gmra.mrb[2].mxu1 %vm1109_vm2, %v1199_v56 }
 0x328   : > { %5911 = vmatpush3.bf16.msra.mxu1 %v5910_v55  ;;  %5533 = vmatprep.mubr.msk.f32.mxu1 %vm6296_vm0, %v6297_v11 }
 0x329   : > { %5912 = vmatprep.subr.bf16.mxu1 %v6295_v3 }
 0x32c   : > { %5914 = vmatpush3.bf16.msra.mxu1 %v5913_v59  ;;  %v5167_v59 = vld [vmem:[%s7440_s26 + $0x50] sm:$0xff] }
 0x32d   : > { %5547 = vmatprep.subr.mxu1 %v6297_v11 }
 0x32f   : > { %5534 = vmatmul.mubr.msk.f32.vlgmr.msra.gmra.mrb[4].mxu1 %vm883_vm1, %v6547_v18 }
 0x330   : > { %5549 = vmatprep.mubr.msk.f32.mxu1 %vm6296_vm0, %v6297_v11 }
 0x3fa   : > { %v1270_v62 = vpop.f32.mrb[2].mxu1 }
 0x3fb   : > { %v5513_v63 = vpop.f32.mrb[3].mxu1 }
 0x402   : > { %v1422_v1 = vpop.f32.mrb[4].mxu1 }
 0x403   : > { %v5535_v2 = vpop.f32.mrb[5].mxu1  ;;  %5548 = vmatpush3.xpose.msk.msra.mxu1 %vm1109_vm2, %v1422_v1 }
 0x404   : > { %5552 = vmatprep.subr.mxu1 %v6297_v11 }
 0x406   : > { %5550 = vmatmul.mubr.msk.f32.vlgmr.msra.gmra.mrb[6].mxu1 %vm1109_vm2, %v1350_v0 }
 0x407   : > { %5554 = vmatprep.mubr.msk.f32.mxu1 %vm6296_vm0, %v6297_v11  ;;  %5553 = vmatpush3.msra.mxu1 %v1497_v22  ;;  %v5177_v22 = vld [vmem:[%s7437_s23 + $0x68] sm:$0xff] }
 0x408   : > { %5562 = vmatprep.subr.mxu1 %v6297_v11 }
 0x4d9   : > { %v1573_v10 = vpop.f32.mrb[6].mxu1 }
 0x4da   : > { %v1574_v12 = vadd.f32 %v1573_v10, %v6582_v32  ;;  %v5551_v13 = vpop.f32.mrb[7].mxu1 }
 0x4dc   : > { %v1577_v14 = vsel %vm1109_vm2, %v1574_v12, -inf }
 0x4dd   : > { %1578 = vmax.xlane.f32.xlu1 %v1577_v14 }
 0x56a   : > { %v1579_v15 = vpop.xlane.xlu1 %1578 }
 0x56b   : > { %v1580_v17 = vsub.f32 %v1574_v12, %v1579_v15  ;;  %v5174_v12 = vld [vmem:[%s7444_s0 + $0x10] sm:$0xff] }
 0x56d   : > { %v1581_v19 = vmul.f32 1.442695, %v1580_v17 }
 0x56f   : > { %6121 = vpow2.f32 %v1581_v19 }
 0x579   : > { %v6122_v20 = vpop.eup %6121 }
 0x57a   : > { %v1583_v21 = vsel %vm1109_vm2, %v6122_v20, 0.0 }
 0x57b   : > { %1584 = vadd.xlane.f32.xlu1 %v1583_v21  ;;  %v5176_v21 = vld [vmem:[%s7437_s23 + $0x60] sm:$0xff] }
 0x57c   : > { %v5940_v23 = vpack.c.bf16 %v5177_v22, %v5176_v21  ;;  %v2780_v21 = vld [vmem:[%s7446_s11 + $0x8] sm:$0xff] }
 0x608   : > { %v1585_v25 = vpop.xlane.xlu1 %1584 }
 0x609   : > { %6123 = vrcp.f32 %v1585_v25 }
 0x613   : > { %v6124_v26 = vpop.eup %6123 }
 0x614   : > { %v1587_v27 = vmul.f32 %v6124_v26, %v1585_v25  ;;  %v5179_v25 = vld [vmem:[%s7437_s23 + $0x78] sm:$0xff] }
 0x616   : > { %v1588_v28 = vsub.f32 2.0, %v1587_v27  ;;  %v5181_v27 = vld [vmem:[%s7438_s8 + $0x60] sm:$0xff] }
 0x618   : > { %v1589_v29 = vmul.f32 %v6124_v26, %v1588_v28  ;;  %v5943_v26 = vpack.c.bf16 %v5179_v25, %v5178_v24  ;;  %v5182_v28 = vld [vmem:[%s7438_s8 + $0x68] sm:$0xff]  ;;  %v2860_v24 = vld [vmem:[%s7445_s12 + $0x18] sm:$0xff] }
 0x61a   : > { %v1590_v30 = vmul.f32 %v6122_v20, %v1589_v29  ;;  %v5946_v29 = vpack.c.bf16 %v5182_v28, %v5181_v27  ;;  %v2782_v27 = vld [vmem:[%s7446_s11 + $0x18] sm:$0xff] }
 0x61c   : > { %5150 = vst.msk [vmem:[%s6623_s28 + $0x8] sm:$0xff] %vm1109_vm2, %v1590_v30  ;;  %5555 = vmatmul.mubr.msk.f32.vlgmr.msra.gmra.mrb[8].mxu1 %vm1109_vm2, %v1590_v30  ;;  %v5183_v30 = vld [vmem:[%s7438_s8 + $0x70] sm:$0xff] }
 0x61d   : > { %5563 = vmatpush3.msra.mxu1 %v1274_v31  ;;  %5564 = vmatprep.mubr.msk.f32.mxu1 %vm6296_vm0, %v6297_v11  ;;  %v5184_v31 = vld [vmem:[%s7438_s8 + $0x78] sm:$0xff] }
 0x61e   : > { %5927 = vmatprep.subr.bf16.mxu1 %v6295_v3 }
 0x620   : > { %5565 = vmatmul.mubr.msk.f32.vlgmr.msra.gmra.mrb[10].mxu1 %vm1109_vm2, %v1270_v62  ;;  %v5937_v62 = vpack.c.bf16 %v5168_v61, %v5167_v59 }
 0x621   : > { %5929 = vmatpush3.bf16.msra.mxu1 %v5928_v35  ;;  %5586 = vmatprep.mubr.msk.f32.mxu1 %vm6296_vm0, %v6297_v11  ;;  %v5949_v35 = vpack.c.bf16 %v5184_v31, %v5183_v30 }
 0x622   : > { %5930 = vmatprep.subr.bf16.mxu1 %v6295_v3 }
 0x625   : > { %5932 = vmatpush3.bf16.msra.mxu1 %v5931_v38 }
 0x626   : > { %5600 = vmatprep.subr.mxu1 %v6297_v11 }
 0x628   : > { %5587 = vmatmul.mubr.msk.f32.vlgmr.msra.gmra.mrb[12].mxu1 %vm883_vm1, %v6547_v18 }
 0x629   : > { %5602 = vmatprep.mubr.msk.f32.mxu1 %vm6296_vm0, %v6297_v11 }
 0x6ef   : > { %v1662_v44 = vpop.f32.mrb[8].mxu1 }
 0x6f0   : > { %v5556_v45 = vpop.f32.mrb[9].mxu1  ;;  %5560 = vmatmul.mubr.msk.f32.vlgmr.msra.gmra.mrb[10].mxu0 %vm1109_vm2, %v1662_v44  ;;  %v5186_v44 = vld [vmem:[%s7440_s26 + $0x60] sm:$0xff] }
 0x6f1   : > { %5923 = vmatpush3.bf16.msra.mxu0 %v5922_v41  ;;  %5575 = vmatprep.mubr.msk.f32.mxu0 %vm6296_vm0, %v6297_v11  ;;  %v5187_v45 = vld [vmem:[%s7440_s26 + $0x68] sm:$0xff] }
 0x6f2   : > { %5924 = vmatprep.subr.bf16.mxu0 %v6295_v3 }
 0x6f3   : > { %v1810_v47 = vpop.f32.mrb[10].mxu1 }
 0x6f4   : > { %v5566_v48 = vpop.f32.mrb[11].mxu1 }
 0x6f5   : > { %5926 = vmatpush3.bf16.msra.mxu0 %v5925_v46  ;;  %v5188_v46 = vld [vmem:[%s7440_s26 + $0x70] sm:$0xff]  ;;  %v5189_v48 = vld [vmem:[%s7440_s26 + $0x78] sm:$0xff] }
 0x6f6   : > { %5933 = vmatprep.subr.bf16.mxu0 %v6295_v3 }
 0x6f8   : > { %5576 = vmatmul.mubr.msk.f32.vlgmr.msra.gmra.mrb[12].mxu0 %vm883_vm1, %v6545_v16 }
 0x6f9   : > { %5597 = vmatprep.mubr.msk.f32.mxu0 %vm6296_vm0, %v6297_v11  ;;  %5935 = vmatpush3.bf16.msra.mxu0 %v5934_v60 }
 0x6fa   : > { %5936 = vmatprep.subr.bf16.mxu0 %v6295_v3 }
 0x6fb   : > { %v1961_v49 = vpop.f32.mrb[12].mxu1 }
 0x6fc   : > { %v5588_v50 = vpop.f32.mrb[13].mxu1  ;;  %5601 = vmatpush3.xpose.msk.msra.mxu1 %vm1109_vm2, %v1961_v49  ;;  %v5955_v49 = vpack.c.bf16 %v5189_v48, %v5188_v46  ;;  %v5205_v46 = vld [vmem:[%s7446_s11 + $0x20] sm:$0xff] }
 0x6fd   : > { %5605 = vmatprep.subr.mxu1 %v6297_v11  ;;  %5938 = vmatpush3.bf16.msra.mxu0 %v5937_v62 }
 0x6fe   : > { %5610 = vmatprep.subr.mxu0 %v6297_v11 }
 0x700   : > { %5598 = vmatmul.mubr.msk.f32.vlgmr.msra.gmra.mrb[14].mxu0 %vm883_vm1, %v6547_v18 }
 0x701   : > { %5612 = vmatprep.mubr.msk.f32.mxu0 %vm6296_vm0, %v6297_v11  ;;  %5611 = vmatpush3.msra.mxu0 %v5174_v12 }
 0x702   : > { %5945 = vmatprep.subr.bf16.mxu0 %v6295_v3 }
 0x7c3   : > { %v1737_v51 = vpop.f32.mrb[10].mxu0 }
 0x7c4   : > { %v6720_v52 = vadd.f32 %v1810_v47, %v1737_v51  ;;  %v5561_v53 = vpop.f32.mrb[11].mxu0  ;;  %v5952_v47 = vpack.c.bf16 %v5187_v45, %v5186_v44  ;;  %v2937_v44 = vld [vmem:[%s7449_s13 + $0x18] sm:$0xff] }
 0x7cb   : > { %v1885_v54 = vpop.f32.mrb[12].mxu0 }
 0x7cc   : > { %v1889_v55 = vmul.f32 0.35355338, %v1885_v54  ;;  %v5577_v56 = vpop.f32.mrb[13].mxu0 }
 0x7ce   : > { %5603 = vmatmul.mubr.msk.f32.vlgmr.msra.gmra.mrb[14].mxu1 %vm1109_vm2, %v1889_v55 }
 0x7cf   : > { %5607 = vmatprep.mubr.msk.f32.mxu1 %vm6296_vm0, %v6297_v11 }
 0x7d3   : > { %v2036_v9 = vpop.f32.mrb[14].mxu0 }
 0x7d4   : > { %v5599_v10 = vpop.f32.mrb[15].mxu0  ;;  %5606 = vmatpush3.msra.mxu1 %v2036_v9 }
 0x7d5   : > { %5939 = vmatprep.subr.bf16.mxu1 %v6295_v3 }
 0x8a1   : > { %v2112_v63 = vpop.f32.mrb[14].mxu1 }
 0x8a2   : > { %v2113_v0 = vadd.f32 %v2112_v63, %v6582_v32  ;;  %v5604_v1 = vpop.f32.mrb[15].mxu1 }
 0x8a4   : > { %v2116_v2 = vsel %vm1109_vm2, %v2113_v0, -inf }
 0x8a5   : > { %2117 = vmax.xlane.f32.xlu0 %v2116_v2 }
 0x932   : > { %v2118_v4 = vpop.xlane.xlu0 %2117 }
 0x933   : > { %v2119_v5 = vsub.f32 %v2113_v0, %v2118_v4 }
 0x935   : > { %v2120_v6 = vmul.f32 1.442695, %v2119_v5 }
 0x937   : > { %6125 = vpow2.f32 %v2120_v6 }
 0x941   : > { %v6126_v7 = vpop.eup %6125 }
 0x942   : > { %v2122_v8 = vsel %vm1109_vm2, %v6126_v7, 0.0 }
 0x943   : > { %2123 = vadd.xlane.f32.xlu1 %v2122_v8 }
 0x9d0   : > { %v2124_v13 = vpop.xlane.xlu1 %2123 }
 0x9d1   : > { %6127 = vrcp.f32 %v2124_v13 }
 0x9db   : > { %v6128_v14 = vpop.eup %6127 }
 0x9dc   : > { %v2126_v15 = vmul.f32 %v6128_v14, %v2124_v13 }
 0x9de   : > { %v2127_v17 = vsub.f32 2.0, %v2126_v15 }
 0x9e0   : > { %v2128_v19 = vmul.f32 %v6128_v14, %v2127_v17  ;;  %v2857_v17 = vld [vmem:[%s7445_s12] sm:$0xff] }
 0x9e2   : > { %v2129_v20 = vmul.f32 %v6126_v7, %v2128_v19  ;;  %v2858_v19 = vld [vmem:[%s7445_s12 + $0x8] sm:$0xff] }
 0x9e4   : > { %5172 = vst.msk [vmem:[%s6623_s28 + $0x10] sm:$0xff] %vm1109_vm2, %v2129_v20  ;;  %5608 = vmatmul.mubr.msk.f32.vlgmr.msra.gmra.mrb[16].mxu1 %vm1109_vm2, %v2129_v20  ;;  %v2779_v20 = vld [vmem:[%s7446_s11] sm:$0xff] }
 0x9e5   : > { %5623 = vmatprep.mubr.msk.f32.mxu1 %vm6296_vm0, %v6297_v11  ;;  %5941 = vmatpush3.bf16.msra.mxu1 %v5940_v23  ;;  %v5958_v22 = vpack.c.bf16 %v2780_v21, %v2779_v20  ;;  %v2859_v23 = vld [vmem:[%s7445_s12 + $0x10] sm:$0xff] }
 0x9e6   : > { %5942 = vmatprep.subr.bf16.mxu1 %v6295_v3  ;;  %v5967_v25 = vpack.c.bf16 %v2860_v24, %v2859_v23  ;;  %v5215_v23 = vld [vmem:[%s7449_s13 + $0x20] sm:$0xff]  ;;  %v5216_v24 = vld [vmem:[%s7449_s13 + $0x28] sm:$0xff] }
 0x9e9   : > { %5944 = vmatpush3.bf16.msra.mxu1 %v5943_v26  ;;  %v2781_v26 = vld [vmem:[%s7446_s11 + $0x10] sm:$0xff] }
 0x9ea   : > { %5951 = vmatprep.subr.bf16.mxu1 %v6295_v3  ;;  %v5961_v28 = vpack.c.bf16 %v2782_v27, %v2781_v26  ;;  %v5988_v26 = vpack.c.bf16 %v5216_v24, %v5215_v23  ;;  %v5218_v27 = vld [vmem:[%s7449_s13 + $0x38] sm:$0xff] }
 0x9ec   : > { %5624 = vmatmul.mubr.msk.f32.vlgmr.msra.gmra.mrb[18].mxu1 %vm883_vm1, %v6545_v16 }
 0x9ed   : > { %5645 = vmatprep.mubr.msk.f32.mxu1 %vm6296_vm0, %v6297_v11  ;;  %5953 = vmatpush3.bf16.msra.mxu1 %v5952_v47  ;;  %v5206_v47 = vld [vmem:[%s7446_s11 + $0x28] sm:$0xff] }
 0x9ee   : > { %5954 = vmatprep.subr.bf16.mxu1 %v6295_v3  ;;  %v5976_v48 = vpack.c.bf16 %v5206_v47, %v5205_v46 }
 0x9f1   : > { %5956 = vmatpush3.bf16.msra.mxu1 %v5955_v49  ;;  %v5207_v49 = vld [vmem:[%s7446_s11 + $0x30] sm:$0xff] }
 0x9f2   : > { %5658 = vmatprep.subr.mxu1 %v6297_v11 }
 0x9f4   : > { %5646 = vmatmul.mubr.msk.f32.vlgmr.msra.gmra.mrb[20].mxu1 %vm883_vm1, %v6547_v18 }
 0x9f5   : > { %5660 = vmatprep.mubr.msk.f32.mxu1 %vm6296_vm0, %v6297_v11 }
 0xab7   : > { %v2201_v33 = vpop.f32.mrb[16].mxu1 }
 0xab8   : > { %v5609_v34 = vpop.f32.mrb[17].mxu1  ;;  %5613 = vmatmul.mubr.msk.f32.vlgmr.msra.gmra.mrb[16].mxu0 %vm1109_vm2, %v2201_v33 }
 0xab9   : > { %5947 = vmatpush3.bf16.msra.mxu0 %v5946_v29  ;;  %5634 = vmatprep.mubr.msk.f32.mxu0 %vm6296_vm0, %v6297_v11  ;;  %v6868_v29 = vld [vmem:[%s863_s30] sm:$0xff]  ;;  %s7452_s30 = sld [smem:[#allocation12_spill]] }
 0xaba   : > { %5948 = vmatprep.subr.bf16.mxu0 %v6295_v3 }
 0xabd   : > { %5950 = vmatpush3.bf16.msra.mxu0 %v5949_v35  ;;  %v5197_v35 = vld [vmem:[%s7448_s25] ss:$0 sm:$0xff]  ;;  %s4920_s25 = sshll.u32 %s6623_s28, 4  ;;  %s7231_s25 = int_to_ptr.vmem [resolvable:$true] %s4920_s25 }
 0xabe   : > { %5648 = vmatprep.subr.mxu0 %v6297_v11  ;;  %s6155_s8 = scalar_lea.vmem %s7231_s25, 512  ;;  %p6162_p1 = scmp.lt.s32.totalorder %s7231_s25, %s6160_s9 }
 0xabf   : > { %v2352_v36 = vpop.f32.mrb[18].mxu1  ;;  %s7407_s27 = sshll.u32 %s7452_s30, 9  ;;  %p6156_p12 = scmp.ne.s32.totalorder %s7231_s25, %s6155_s8 }
 0xac0   : > { %5635 = vmatmul.mubr.msk.f32.vlgmr.msra.gmra.mrb[18].mxu0 %vm883_vm1, %v6547_v18  ;;  %v5625_v37 = vpop.f32.mrb[19].mxu1  ;;  %v2356_v41 = vmul.f32 0.35355338, %v2352_v36  ;;  %s7228_s29 = scalar_lea.hbm %s7455_s24, %s7407_s27 }
 0xac1   : > { %5650 = vmatprep.mubr.msk.f32.mxu0 %vm6296_vm0, %v6297_v11  ;;  %v2934_v37 = vld [vmem:[%s7449_s13] sm:$0xff]  ;;  %p6157_p13 = pnand %p6156_p12, %p6475_p4 }
 0xac3   : > { %p6158_p0 = pneg %p6157_p13 }
 0xac7   : > { %v2503_v18 = vpop.f32.mrb[20].mxu1 }
 0xac8   : > { %v5647_v59 = vpop.f32.mrb[21].mxu1 }
 0xb8b   : > { %v2276_v38 = vpop.f32.mrb[16].mxu0 }
 0xb8c   : > { %v2280_v39 = vadd.f32 %v2276_v38, %v6720_v52  ;;  %v5614_v40 = vpop.f32.mrb[17].mxu0  ;;  %v2935_v38 = vld [vmem:[%s7449_s13 + $0x8] sm:$0xff] }
 0xb93   : > { %v2428_v42 = vpop.f32.mrb[18].mxu0 }
 0xb94   : > { %v5636_v43 = vpop.f32.mrb[19].mxu0  ;;  %5649 = vmatpush3.xpose.msk.msra.mxu0 %vm1109_vm2, %v2428_v42 }
 0xb95   : > { %5653 = vmatprep.subr.mxu0 %v6297_v11  ;;  %v2936_v43 = vld [vmem:[%s7449_s13 + $0x10] sm:$0xff] }
 0xb96   : > { %v5973_v45 = vpack.c.bf16 %v2937_v44, %v2936_v43 }
 0xb97   : > { %5651 = vmatmul.mubr.msk.f32.vlgmr.msra.gmra.mrb[20].mxu0 %vm1109_vm2, %v2356_v41  ;;  %v5970_v41 = vpack.c.bf16 %v2935_v38, %v2934_v37 }
 0xb98   : > { %5655 = vmatprep.mubr.msk.f32.mxu0 %vm6296_vm0, %v6297_v11  ;;  %5654 = vmatpush3.msra.mxu0 %v2503_v18 }
 0xb99   : > { %5957 = vmatprep.subr.bf16.mxu0 %v6295_v3 }
 0xc6a   : > { %v2579_v50 = vpop.f32.mrb[20].mxu0 }
 0xc6b   : > { %v2580_v51 = vadd.f32 %v2579_v50, %v6582_v32  ;;  %v5652_v52 = vpop.f32.mrb[21].mxu0  ;;  %v5195_v32 = vld [vmem:[%s7444_s0 + $0x18] sm:$0xff]  ;;  %s4887_s0 = scalar_lea.sflag [#allocation6], %s7220_s22 }
 0xc6c   : > { %5659 = vmatpush3.msra.mxu1 %v5195_v32  ;;  %v5208_v50 = vld [vmem:[%s7446_s11 + $0x38] sm:$0xff] }
 0xc6d   : > { %v2583_v53 = vsel %vm1109_vm2, %v2580_v51, -inf  ;;  %5963 = vmatprep.subr.bf16.mxu1 %v6295_v3 }
 0xc6e   : > { %2584 = vmax.xlane.f32.xlu0 %v2583_v53 }
 0xcfb   : > { %v2585_v54 = vpop.xlane.xlu0 %2584 }
 0xcfc   : > { %v2586_v55 = vsub.f32 %v2580_v51, %v2585_v54  ;;  %v5979_v51 = vpack.c.bf16 %v5208_v50, %v5207_v49  ;;  %v3172_v49 = vld [vmem:[%s7374_s14] sm:$0xff] }
 0xcfd   : > { %v5232_v50 = vld [vmem:[%s7445_s12 + $0x40] sm:$0xff] }
 0xcfe   : > { %v2587_v56 = vmul.f32 1.442695, %v2586_v55 }
 0xd00   : > { %6129 = vpow2.f32 %v2587_v56 }
 0xd0a   : > { %v6130_v57 = vpop.eup %6129 }
 0xd0b   : > { %v2589_v58 = vsel %vm1109_vm2, %v6130_v57, 0.0 }
 0xd0c   : > { %2590 = vadd.xlane.f32.xlu1 %v2589_v58 }
 0xd99   : > { %v2591_v60 = vpop.xlane.xlu1 %2590 }
 0xd9a   : > { %6131 = vrcp.f32 %v2591_v60 }
 0xda4   : > { %v6132_v61 = vpop.eup %6131 }
 0xda5   : > { %v2593_v62 = vmul.f32 %v6132_v61, %v2591_v60 }
 0xda7   : > { %v2594_v63 = vsub.f32 2.0, %v2593_v62 }
 0xda9   : > { %v2595_v0 = vmul.f32 %v6132_v61, %v2594_v63 }
 0xdab   : > { %v2596_v1 = vmul.f32 %v6130_v57, %v2595_v0 }
 0xdad   : > { %5193 = vst.msk [vmem:[%s6623_s28 + $0x18] sm:$0xff] %vm1109_vm2, %v2596_v1  ;;  %5656 = vmatmul.mubr.msk.f32.vlgmr.msra.gmra.mrb[22].mxu0 %vm1109_vm2, %v2596_v1 }
 0xdae   : > { %5671 = vmatprep.mubr.msk.f32.mxu0 %vm6296_vm0, %v6297_v11  ;;  %5959 = vmatpush3.bf16.msra.mxu0 %v5958_v22 }
 0xdaf   : > { %5960 = vmatprep.subr.bf16.mxu0 %v6295_v3 }
 0xdb2   : > { %5962 = vmatpush3.bf16.msra.mxu0 %v5961_v28 }
 0xdb3   : > { %5969 = vmatprep.subr.bf16.mxu0 %v6295_v3 }
 0xe80   : > { %v2668_v2 = vpop.f32.mrb[22].mxu0 }
 0xe81   : > { %v5657_v4 = vpop.f32.mrb[23].mxu0  ;;  %5661 = vmatmul.mubr.msk.f32.vlgmr.msra.gmra.mrb[22].mxu1 %vm1109_vm2, %v2668_v2 }
 0xe82   : > { %5682 = vmatprep.mubr.msk.f32.mxu1 %vm6296_vm0, %v6297_v11 }
 0xf54   : > { %v2743_v5 = vpop.f32.mrb[22].mxu1 }
 0xf55   : > { %v2747_v6 = vadd.f32 %v2743_v5, %v2280_v39  ;;  %v5662_v7 = vpop.f32.mrb[23].mxu1  ;;  %v5198_v39 = vld [vmem:[%s7450_s10] ss:$0 sm:$0xff]  ;;  %s6161_s10 = scalar_lea.vmem %s6160_s9, 1024 }
 0xf56   : > { %p6163_p2 = scmp.lt.s32.totalorder %s6161_s10, %s6155_s8 }
 0xf57   : > { %v2748_v8 = vadd.f32 %v2747_v6, %v6545_v16  ;;  %v5964_v16 = vpack.c.bf16 %v2858_v19, %v2857_v17 }
 0xf58   : > { %p6164_p3 = por %p6163_p2, %p6162_p1 }
 0xf59   : > { %v2751_v9 = vsel %vm883_vm1, %v2748_v8, 0.0  ;;  %5965 = vmatpush3.bf16.msra.mxu1 %v5964_v16 }
 0xf5a   : > { %2752 = vadd.xlane.f32.xlu0 %v2751_v9  ;;  %5966 = vmatprep.subr.bf16.mxu1 %v6295_v3  ;;  %v5211_v9 = vld [vmem:[%s7445_s12 + $0x28] sm:$0xff]  ;;  %p6165_p5 = pnand %p6164_p3, %p6158_p0 }
 0xf5d   : > { %5968 = vmatpush3.bf16.msra.mxu1 %v5967_v25  ;;  %v5217_v25 = vld [vmem:[%s7449_s13 + $0x30] sm:$0xff] }
 0xf5e   : > { %5696 = vmatprep.subr.mxu1 %v6297_v11  ;;  %v5991_v28 = vpack.c.bf16 %v5218_v27, %v5217_v25  ;;  %v5246_v27 = vld [vmem:[%s7374_s14 + $0x10] sm:$0xff] }
 0xf60   : > { %5683 = vmatmul.mubr.msk.f32.vlgmr.msra.gmra.mrb[24].mxu1 %vm883_vm1, %v6868_v29 }
 0xf61   : > { %5698 = vmatprep.mubr.msk.f32.mxu1 %vm6296_vm0, %v6297_v11 }
 0xfe7   : > { %v2753_v10 = vpop.xlane.xlu0 %2752 }
 0xfe8   : > { %v2755_v12 = vmul.f32 0.03125, %v2753_v10 }
 0xfea   : > { %v2756_v13 = vsub.f32 %v2748_v8, %v2755_v12  ;;  %v5210_v8 = vld [vmem:[%s7445_s12 + $0x20] sm:$0xff] }
 0xfeb   : > { %v5982_v12 = vpack.c.bf16 %v5211_v9, %v5210_v8  ;;  %v5237_v9 = vld [vmem:[%s7449_s13 + $0x40] sm:$0xff] }
 0xfec   : > { %v2757_v14 = vmul.f32 %v2756_v13, %v2756_v13 }
 0xfee   : > { %v2758_v15 = vsel %vm883_vm1, %v2757_v14, 0.0  ;;  %v5212_v14 = vld [vmem:[%s7445_s12 + $0x30] sm:$0xff] }
 0xfef   : > { %2759 = vadd.xlane.f32.xlu1 %v2758_v15  ;;  %v5213_v15 = vld [vmem:[%s7445_s12 + $0x38] sm:$0xff] }
 0xff0   : > { %v5985_v17 = vpack.c.bf16 %v5213_v15, %v5212_v14  ;;  %v5240_v14 = vld [vmem:[%s7449_s13 + $0x58] sm:$0xff] }
0x1033   : > { %v2930_v52 = vpop.f32.mrb[24].mxu1 }
0x1034   : > { %v5684_v53 = vpop.f32.mrb[25].mxu1  ;;  %5697 = vmatpush3.xpose.msk.msra.mxu1 %vm1109_vm2, %v2930_v52 }
0x1035   : > { %5701 = vmatprep.subr.mxu1 %v6297_v11  ;;  %v5234_v53 = vld [vmem:[%s7445_s12 + $0x50] sm:$0xff] }
0x107c   : > { %v2760_v30 = vpop.xlane.xlu1 %2759 }
0x107d   : > { %v2761_v31 = vmul.f32 0.03125, %v2760_v30 }
0x107f   : > { %v2762_v33 = vadd.f32 1e-06, %v2761_v31 }
0x1081   : > { %6133 = vrsqrt.f32 %v2762_v33 }
0x108b   : > { %v6134_v34 = vpop.eup %6133 }
0x108c   : > { %v2764_v36 = vmul.f32 %v6134_v34, %v2756_v13 }
0x108e   : > { %v2771_v40 = vmul.f32 %v5197_v35, %v2764_v36 }
0x1090   : > { %v6888_v42 = vadd.f32 %v5198_v39, %v2771_v40 }
0x1092   : > { %5672 = vmatmul.mubr.msk.f32.vlgmr.msra.gmra.mrb[24].mxu0 %vm883_vm1, %v6888_v42 }
0x1093   : > { %5971 = vmatpush3.bf16.msra.mxu0 %v5970_v41  ;;  %5693 = vmatprep.mubr.msk.f32.mxu0 %vm6296_vm0, %v6297_v11  ;;  %v5224_v41 = vld [vmem:[%s7374_s14 + $0x8] sm:$0xff] }
0x1094   : > { %5972 = vmatprep.subr.bf16.mxu0 %v6295_v3 }
0x1097   : > { %5974 = vmatpush3.bf16.msra.mxu0 %v5973_v45 }
0x1098   : > { %5975 = vmatprep.subr.bf16.mxu0 %v6295_v3 }
0x109a   : > { %5694 = vmatmul.mubr.msk.f32.vlgmr.msra.gmra.mrb[26].mxu0 %vm883_vm1, %v6868_v29 }
0x109b   : > { %5977 = vmatpush3.bf16.msra.mxu0 %v5976_v48  ;;  %5714 = vmatprep.mubr.msk.f32.mxu0 %vm6296_vm0, %v6297_v11 }
0x109c   : > { %5978 = vmatprep.subr.bf16.mxu0 %v6295_v3 }
0x109f   : > { %5980 = vmatpush3.bf16.msra.mxu0 %v5979_v51  ;;  %v5233_v51 = vld [vmem:[%s7445_s12 + $0x48] sm:$0xff] }
0x10a0   : > { %5987 = vmatprep.subr.bf16.mxu0 %v6295_v3  ;;  %v6000_v52 = vpack.c.bf16 %v5233_v51, %v5232_v50 }
0x10a2   : > { %5715 = vmatmul.mubr.msk.f32.vlgmr.msra.gmra.mrb[28].mxu0 %vm883_vm1, %v6888_v42 }
0x10a3   : > { %5736 = vmatprep.mubr.msk.f32.mxu0 %vm6296_vm0, %v6297_v11  ;;  %5989 = vmatpush3.bf16.msra.mxu0 %v5988_v26 }
0x10a4   : > { %5990 = vmatprep.subr.bf16.mxu0 %v6295_v3 }
0x10a7   : > { %5992 = vmatpush3.bf16.msra.mxu0 %v5991_v28 }
0x10a8   : > { %5749 = vmatprep.subr.mxu0 %v6297_v11 }
0x10aa   : > { %5737 = vmatmul.mubr.msk.f32.vlgmr.msra.gmra.mrb[30].mxu0 %vm883_vm1, %v6868_v29 }
0x10ab   : > { %5751 = vmatprep.mubr.msk.f32.mxu0 %vm6296_vm0, %v6297_v11  ;;  %5750 = vmatpush3.msra.mxu0 %v5224_v41 }
0x10ac   : > { %5993 = vmatprep.subr.bf16.mxu0 %v6295_v3 }
0x1165   : > { %v2852_v54 = vpop.f32.mrb[24].mxu0 }
0x1166   : > { %v2856_v55 = vmul.f32 0.35355338, %v2852_v54  ;;  %v5673_v56 = vpop.f32.mrb[25].mxu0  ;;  %v5235_v54 = vld [vmem:[%s7445_s12 + $0x58] sm:$0xff] }
0x1167   : > { %v5227_v56 = vld [vmem:[%s7446_s11 + $0x40] sm:$0xff] }
0x1168   : > { %5699 = vmatmul.mubr.msk.f32.vlgmr.msra.gmra.mrb[26].mxu1 %vm1109_vm2, %v2856_v55  ;;  %v6003_v55 = vpack.c.bf16 %v5235_v54, %v5234_v53 }
0x1169   : > { %5703 = vmatprep.mubr.msk.f32.mxu1 %vm6296_vm0, %v6297_v11 }
0x116d   : > { %v3004_v57 = vpop.f32.mrb[26].mxu0 }
0x116e   : > { %v5695_v58 = vpop.f32.mrb[27].mxu0  ;;  %5702 = vmatpush3.msra.mxu1 %v3004_v57  ;;  %v5228_v57 = vld [vmem:[%s7446_s11 + $0x48] sm:$0xff] }
0x116f   : > { %5981 = vmatprep.subr.bf16.mxu1 %v6295_v3  ;;  %v5994_v58 = vpack.c.bf16 %v5228_v57, %v5227_v56 }
0x1175   : > { %v3244_v18 = vpop.f32.mrb[28].mxu0 }
0x1176   : > { %v5716_v59 = vpop.f32.mrb[29].mxu0  ;;  %v3248_v22 = vmul.f32 0.35355338, %v3244_v18  ;;  %v5229_v18 = vld [vmem:[%s7446_s11 + $0x50] sm:$0xff] }
0x1177   : > { %v5230_v59 = vld [vmem:[%s7446_s11 + $0x58] sm:$0xff] }
0x117d   : > { %v3395_v39 = vpop.f32.mrb[30].mxu0 }
0x117e   : > { %v5738_v40 = vpop.f32.mrb[31].mxu0 }
0x117f   : > { %v5251_v40 = vld [vmem:[%s7446_s11 + $0x78] sm:$0xff] }
0x123b   : > { %v3080_v32 = vpop.f32.mrb[26].mxu1 }
0x123c   : > { %v5700_v60 = vpop.f32.mrb[27].mxu1  ;;  %v3084_v61 = vsel %vm1109_vm2, %v3080_v32, -inf }
0x123d   : > { %3085 = vmax.xlane.f32.xlu0 %v3084_v61  ;;  %v5997_v61 = vpack.c.bf16 %v5230_v59, %v5229_v18  ;;  %v5258_v18 = vld [vmem:[%s7449_s13 + $0x60] sm:$0xff]  ;;  %v5259_v59 = vld [vmem:[%s7449_s13 + $0x68] sm:$0xff] }
0x12ca   : > { %v3086_v62 = vpop.xlane.xlu0 %3085 }
0x12cb   : > { %v3087_v63 = vsub.f32 %v3080_v32, %v3086_v62 }
0x12cd   : > { %v3088_v0 = vmul.f32 1.442695, %v3087_v63 }
0x12cf   : > { %6135 = vpow2.f32 %v3088_v0 }
0x12d9   : > { %v6136_v1 = vpop.eup %6135 }
0x12da   : > { %v3090_v2 = vsel %vm1109_vm2, %v6136_v1, 0.0 }
0x12db   : > { %3091 = vadd.xlane.f32.xlu1 %v3090_v2 }
0x1368   : > { %v3092_v4 = vpop.xlane.xlu1 %3091 }
0x1369   : > { %6137 = vrcp.f32 %v3092_v4 }
0x1373   : > { %v6138_v5 = vpop.eup %6137 }
0x1374   : > { %v3094_v6 = vmul.f32 %v6138_v5, %v3092_v4 }
0x1376   : > { %v3095_v7 = vsub.f32 2.0, %v3094_v6 }
0x1378   : > { %v3096_v10 = vmul.f32 %v6138_v5, %v3095_v7 }
0x137a   : > { %v3097_v13 = vmul.f32 %v6136_v1, %v3096_v10  ;;  %v5238_v10 = vld [vmem:[%s7449_s13 + $0x48] sm:$0xff] }
0x137c   : > { %3098 = vst.msk [vmem:[%s6946_s7] sm:$0xff] %vm1109_vm2, %v3097_v13  ;;  %5704 = vmatmul.mubr.msk.f32.vlgmr.msra.gmra.mrb[28].mxu1 %vm1109_vm2, %v3097_v13  ;;  %v6006_v13 = vpack.c.bf16 %v5238_v10, %v5237_v9 }
0x137d   : > { %5983 = vmatpush3.bf16.msra.mxu1 %v5982_v12  ;;  %5725 = vmatprep.mubr.msk.f32.mxu1 %vm6296_vm0, %v6297_v11  ;;  %v5239_v12 = vld [vmem:[%s7449_s13 + $0x50] sm:$0xff] }
0x137e   : > { %5984 = vmatprep.subr.bf16.mxu1 %v6295_v3  ;;  %v6009_v15 = vpack.c.bf16 %v5240_v14, %v5239_v12 }
0x1381   : > { %5986 = vmatpush3.bf16.msra.mxu1 %v5985_v17 }
0x1382   : > { %5739 = vmatprep.subr.mxu1 %v6297_v11 }
0x1384   : > { %5726 = vmatmul.mubr.msk.f32.vlgmr.msra.gmra.mrb[30].mxu1 %vm883_vm1, %v6868_v29 }
0x1385   : > { %5741 = vmatprep.mubr.msk.f32.mxu1 %vm6296_vm0, %v6297_v11 }
0x144f   : > { %v3168_v19 = vpop.f32.mrb[28].mxu1 }
0x1450   : > { %v5705_v16 = vpop.f32.mrb[29].mxu1 }
0x1457   : > { %v3320_v20 = vpop.f32.mrb[30].mxu1 }
0x1458   : > { %v5727_v21 = vpop.f32.mrb[31].mxu1  ;;  %5740 = vmatpush3.xpose.msk.msra.mxu1 %vm1109_vm2, %v3320_v20 }
0x1459   : > { %5744 = vmatprep.subr.mxu1 %v6297_v11 }
0x145b   : > { %5742 = vmatmul.mubr.msk.f32.vlgmr.msra.gmra.mrb[32].mxu1 %vm1109_vm2, %v3248_v22 }
0x145c   : > { %5746 = vmatprep.mubr.msk.f32.mxu1 %vm6296_vm0, %v6297_v11  ;;  %5745 = vmatpush3.msra.mxu1 %v3395_v39  ;;  %v5250_v39 = vld [vmem:[%s7446_s11 + $0x70] sm:$0xff] }
0x145d   : > { %5754 = vmatprep.subr.mxu1 %v6297_v11  ;;  %v6015_v41 = vpack.c.bf16 %v5251_v40, %v5250_v39  ;;  %v4764_v40 = vld [vmem:[%s7379_s19 + $0x18] sm:$0xff] }
0x152e   : > { %v3471_v30 = vpop.f32.mrb[32].mxu1 }
0x152f   : > { %v5743_v31 = vpop.f32.mrb[33].mxu1  ;;  %v3475_v33 = vsel %vm1109_vm2, %v3471_v30, -inf }
0x1530   : > { %3476 = vmax.xlane.f32.xlu0 %v3475_v33 }
0x15bd   : > { %v3477_v34 = vpop.xlane.xlu0 %3476 }
0x15be   : > { %v3478_v35 = vsub.f32 %v3471_v30, %v3477_v34  ;;  %v5248_v34 = vld [vmem:[%s7446_s11 + $0x60] sm:$0xff] }
0x15c0   : > { %v3479_v36 = vmul.f32 1.442695, %v3478_v35  ;;  %v5249_v35 = vld [vmem:[%s7446_s11 + $0x68] sm:$0xff] }
0x15c2   : > { %6139 = vpow2.f32 %v3479_v36 }
0x15cc   : > { %v6140_v37 = vpop.eup %6139 }
0x15cd   : > { %v3481_v38 = vsel %vm1109_vm2, %v6140_v37, 0.0 }
0x15ce   : > { %3482 = vadd.xlane.f32.xlu1 %v3481_v38 }
0x165b   : > { %v3483_v43 = vpop.xlane.xlu1 %3482 }
0x165c   : > { %6141 = vrcp.f32 %v3483_v43 }
0x1666   : > { %v6142_v44 = vpop.eup %6141 }
0x1667   : > { %v3485_v45 = vmul.f32 %v6142_v44, %v3483_v43  ;;  %v5253_v43 = vld [vmem:[%s7445_s12 + $0x60] sm:$0xff] }
0x1669   : > { %v3486_v46 = vsub.f32 2.0, %v3485_v45 }
0x166b   : > { %v3487_v47 = vmul.f32 %v6142_v44, %v3486_v46  ;;  %v5254_v44 = vld [vmem:[%s7445_s12 + $0x68] sm:$0xff]  ;;  %v5255_v46 = vld [vmem:[%s7445_s12 + $0x70] sm:$0xff] }
0x166c   : > { %v6018_v45 = vpack.c.bf16 %v5254_v44, %v5253_v43  ;;  %v4765_v43 = vld [vmem:[%s7379_s19 + $0x20] sm:$0xff]  ;;  %v4766_v44 = vld [vmem:[%s7379_s19 + $0x28] sm:$0xff] }
0x166d   : > { %v3488_v48 = vmul.f32 %v6140_v37, %v3487_v47  ;;  %v6012_v37 = vpack.c.bf16 %v5249_v35, %v5248_v34  ;;  %v5256_v47 = vld [vmem:[%s7445_s12 + $0x78] sm:$0xff] }
0x166e   : > { %v6021_v50 = vpack.c.bf16 %v5256_v47, %v5255_v46  ;;  %v4679_v34 = vld [vmem:[%s7377_s17 + $0x18] sm:$0xff] }
0x166f   : > { %5222 = vst.msk [vmem:[%s6946_s7 + $0x8] sm:$0xff] %vm1109_vm2, %v3488_v48  ;;  %5747 = vmatmul.mubr.msk.f32.vlgmr.msra.gmra.mrb[34].mxu1 %vm1109_vm2, %v3488_v48 }
0x1670   : > { %5755 = vmatpush3.msra.mxu1 %v3172_v49  ;;  %5756 = vmatprep.mubr.msk.f32.mxu1 %vm6296_vm0, %v6297_v11 }
0x1671   : > { %5999 = vmatprep.subr.bf16.mxu1 %v6295_v3 }
0x1673   : > { %5757 = vmatmul.mubr.msk.f32.vlgmr.msra.gmra.mrb[36].mxu1 %vm1109_vm2, %v3168_v19 }
0x1674   : > { %6001 = vmatpush3.bf16.msra.mxu1 %v6000_v52  ;;  %5778 = vmatprep.mubr.msk.f32.mxu1 %vm6296_vm0, %v6297_v11 }
0x1675   : > { %6002 = vmatprep.subr.bf16.mxu1 %v6295_v3 }
0x1678   : > { %6004 = vmatpush3.bf16.msra.mxu1 %v6003_v55 }
0x1679   : > { %5792 = vmatprep.subr.mxu1 %v6297_v11 }
0x167b   : > { %5779 = vmatmul.mubr.msk.f32.vlgmr.msra.gmra.mrb[38].mxu1 %vm883_vm1, %v6868_v29 }
0x167c   : > { %5794 = vmatprep.mubr.msk.f32.mxu1 %vm6296_vm0, %v6297_v11 }
0x1742   : > { %v3560_v32 = vpop.f32.mrb[34].mxu1 }
0x1743   : > { %v5748_v60 = vpop.f32.mrb[35].mxu1  ;;  %5752 = vmatmul.mubr.msk.f32.vlgmr.msra.gmra.mrb[32].mxu0 %vm1109_vm2, %v3560_v32  ;;  %v5260_v32 = vld [vmem:[%s7449_s13 + $0x70] sm:$0xff] }
0x1744   : > { %5995 = vmatpush3.bf16.msra.mxu0 %v5994_v58  ;;  %5767 = vmatprep.mubr.msk.f32.mxu0 %vm6296_vm0, %v6297_v11  ;;  %v6024_v60 = vpack.c.bf16 %v5259_v59, %v5258_v18 }
0x1745   : > { %5996 = vmatprep.subr.bf16.mxu0 %v6295_v3 }
0x1746   : > { %v3708_v62 = vpop.f32.mrb[36].mxu1 }
0x1747   : > { %v5758_v63 = vpop.f32.mrb[37].mxu1 }
0x1748   : > { %5998 = vmatpush3.bf16.msra.mxu0 %v5997_v61  ;;  %v5261_v61 = vld [vmem:[%s7449_s13 + $0x78] sm:$0xff] }
0x1749   : > { %6005 = vmatprep.subr.bf16.mxu0 %v6295_v3 }
0x174b   : > { %5768 = vmatmul.mubr.msk.f32.vlgmr.msra.gmra.mrb[34].mxu0 %vm883_vm1, %v6888_v42 }
0x174c   : > { %5789 = vmatprep.mubr.msk.f32.mxu0 %vm6296_vm0, %v6297_v11  ;;  %6007 = vmatpush3.bf16.msra.mxu0 %v6006_v13 }
0x174d   : > { %6008 = vmatprep.subr.bf16.mxu0 %v6295_v3 }
0x174e   : > { %v3859_v0 = vpop.f32.mrb[38].mxu1 }
0x174f   : > { %v5780_v1 = vpop.f32.mrb[39].mxu1  ;;  %5793 = vmatpush3.xpose.msk.msra.mxu1 %vm1109_vm2, %v3859_v0 }
0x1750   : > { %5797 = vmatprep.subr.mxu1 %v6297_v11  ;;  %6010 = vmatpush3.bf16.msra.mxu0 %v6009_v15 }
0x1751   : > { %5802 = vmatprep.subr.mxu0 %v6297_v11 }
0x1753   : > { %5790 = vmatmul.mubr.msk.f32.vlgmr.msra.gmra.mrb[36].mxu0 %vm883_vm1, %v6868_v29 }
0x1754   : > { %5804 = vmatprep.mubr.msk.f32.mxu0 %vm6296_vm0, %v6297_v11  ;;  %5803 = vmatpush3.msra.mxu0 %v5246_v27 }
0x1755   : > { %6017 = vmatprep.subr.bf16.mxu0 %v6295_v3 }
0x1816   : > { %v3635_v2 = vpop.f32.mrb[32].mxu0 }
0x1817   : > { %v7042_v4 = vadd.f32 %v3708_v62, %v3635_v2  ;;  %v5753_v5 = vpop.f32.mrb[33].mxu0  ;;  %v6027_v62 = vpack.c.bf16 %v5261_v61, %v5260_v32 }
0x181e   : > { %v3783_v6 = vpop.f32.mrb[34].mxu0 }
0x181f   : > { %v3787_v7 = vmul.f32 0.35355338, %v3783_v6  ;;  %v5769_v8 = vpop.f32.mrb[35].mxu0 }
0x1821   : > { %5795 = vmatmul.mubr.msk.f32.vlgmr.msra.gmra.mrb[40].mxu1 %vm1109_vm2, %v3787_v7 }
0x1822   : > { %5799 = vmatprep.mubr.msk.f32.mxu1 %vm6296_vm0, %v6297_v11 }
0x1826   : > { %v3934_v25 = vpop.f32.mrb[36].mxu0 }
0x1827   : > { %v5791_v26 = vpop.f32.mrb[37].mxu0  ;;  %5798 = vmatpush3.msra.mxu1 %v3934_v25 }
0x1828   : > { %6011 = vmatprep.subr.bf16.mxu1 %v6295_v3 }
0x18f4   : > { %v4010_v17 = vpop.f32.mrb[40].mxu1 }
0x18f5   : > { %v5796_v19 = vpop.f32.mrb[41].mxu1  ;;  %v4014_v16 = vsel %vm1109_vm2, %v4010_v17, -inf }
0x18f6   : > { %4015 = vmax.xlane.f32.xlu0 %v4014_v16 }
0x1983   : > { %v4016_v20 = vpop.xlane.xlu0 %4015 }
0x1984   : > { %v4017_v21 = vsub.f32 %v4010_v17, %v4016_v20 }
0x1986   : > { %v4018_v22 = vmul.f32 1.442695, %v4017_v21 }
0x1988   : > { %6143 = vpow2.f32 %v4018_v22 }
0x1992   : > { %v6144_v23 = vpop.eup %6143 }
0x1993   : > { %v4020_v24 = vsel %vm1109_vm2, %v6144_v23, 0.0 }
0x1994   : > { %4021 = vadd.xlane.f32.xlu1 %v4020_v24 }
0x1a21   : > { %v4022_v28 = vpop.xlane.xlu1 %4021 }
0x1a22   : > { %6145 = vrcp.f32 %v4022_v28 }
0x1a2c   : > { %v6146_v30 = vpop.eup %6145 }
0x1a2d   : > { %v4024_v31 = vmul.f32 %v6146_v30, %v4022_v28 }
0x1a2f   : > { %v4025_v33 = vsub.f32 2.0, %v4024_v31  ;;  %v4676_v31 = vld [vmem:[%s7377_s17] sm:$0xff] }
0x1a31   : > { %v4026_v36 = vmul.f32 %v6146_v30, %v4025_v33 }
0x1a33   : > { %v4027_v38 = vmul.f32 %v6144_v23, %v4026_v36  ;;  %v4761_v36 = vld [vmem:[%s7379_s19] sm:$0xff] }
0x1a35   : > { %5244 = vst.msk [vmem:[%s6946_s7 + $0x10] sm:$0xff] %vm1109_vm2, %v4027_v38  ;;  %5800 = vmatmul.mubr.msk.f32.vlgmr.msra.gmra.mrb[42].mxu1 %vm1109_vm2, %v4027_v38  ;;  %v4763_v38 = vld [vmem:[%s7379_s19 + $0x10] sm:$0xff] }
0x1a36   : > { %6013 = vmatpush3.bf16.msra.mxu1 %v6012_v37  ;;  %5815 = vmatprep.mubr.msk.f32.mxu1 %vm6296_vm0, %v6297_v11  ;;  %v4762_v37 = vld [vmem:[%s7379_s19 + $0x8] sm:$0xff] }
0x1a37   : > { %6014 = vmatprep.subr.bf16.mxu1 %v6295_v3  ;;  %v6036_v39 = vpack.c.bf16 %v4762_v37, %v4761_v36 }
0x1a3a   : > { %6016 = vmatpush3.bf16.msra.mxu1 %v6015_v41  ;;  %v6039_v41 = vpack.c.bf16 %v4764_v40, %v4763_v38 }
0x1a3b   : > { %6023 = vmatprep.subr.bf16.mxu1 %v6295_v3 }
0x1a3d   : > { %5816 = vmatmul.mubr.msk.f32.vlgmr.msra.gmra.mrb[44].mxu1 %vm883_vm1, %v6888_v42 }
0x1a3e   : > { %5837 = vmatprep.mubr.msk.f32.mxu1 %vm6296_vm0, %v6297_v11  ;;  %6025 = vmatpush3.bf16.msra.mxu1 %v6024_v60  ;;  %v5273_v60 = vld [vmem:[%s7380_s20] ss:$0 sm:$0xff] }
0x1a3f   : > { %6026 = vmatprep.subr.bf16.mxu1 %v6295_v3 }
0x1a42   : > { %6028 = vmatpush3.bf16.msra.mxu1 %v6027_v62 }
0x1a43   : > { %5850 = vmatprep.subr.mxu1 %v6297_v11 }
0x1a45   : > { %5838 = vmatmul.mubr.msk.f32.vlgmr.msra.gmra.mrb[46].mxu1 %vm883_vm1, %v6868_v29 }
0x1a46   : > { %5852 = vmatprep.mubr.msk.f32.mxu1 %vm6296_vm0, %v6297_v11 }
0x1b08   : > { %v4099_v48 = vpop.f32.mrb[42].mxu1 }
0x1b09   : > { %v5801_v49 = vpop.f32.mrb[43].mxu1  ;;  %5805 = vmatmul.mubr.msk.f32.vlgmr.msra.gmra.mrb[38].mxu0 %vm1109_vm2, %v4099_v48 }
0x1b0a   : > { %6019 = vmatpush3.bf16.msra.mxu0 %v6018_v45  ;;  %5826 = vmatprep.mubr.msk.f32.mxu0 %vm6296_vm0, %v6297_v11  ;;  %v6042_v45 = vpack.c.bf16 %v4766_v44, %v4765_v43 }
0x1b0b   : > { %6020 = vmatprep.subr.bf16.mxu0 %v6295_v3 }
0x1b0e   : > { %6022 = vmatpush3.bf16.msra.mxu0 %v6021_v50  ;;  %v5269_v50 = vld [vmem:[%s7375_s15] ss:$0 sm:$0xff] }
0x1b0f   : > { %5840 = vmatprep.subr.mxu0 %v6297_v11 }
0x1b10   : > { %v4250_v51 = vpop.f32.mrb[44].mxu1 }
0x1b11   : > { %v5817_v52 = vpop.f32.mrb[45].mxu1  ;;  %5827 = vmatmul.mubr.msk.f32.vlgmr.msra.gmra.mrb[40].mxu0 %vm883_vm1, %v6868_v29  ;;  %v4254_v58 = vmul.f32 0.35355338, %v4250_v51  ;;  %v5267_v29 = vld [vmem:[%s7374_s14 + $0x18] sm:$0xff] }
0x1b12   : > { %5842 = vmatprep.mubr.msk.f32.mxu0 %vm6296_vm0, %v6297_v11  ;;  %5851 = vmatpush3.msra.mxu1 %v5267_v29  ;;  %v5270_v52 = vld [vmem:[%s7376_s16] ss:$0 sm:$0xff] }
0x1b13   : > { %6035 = vmatprep.subr.bf16.mxu1 %v6295_v3 }
0x1b18   : > { %v4401_v8 = vpop.f32.mrb[46].mxu1 }
0x1b19   : > { %v5839_v9 = vpop.f32.mrb[47].mxu1 }
0x1bdc   : > { %v4174_v53 = vpop.f32.mrb[38].mxu0 }
0x1bdd   : > { %v4178_v54 = vadd.f32 %v4174_v53, %v7042_v4  ;;  %v5806_v55 = vpop.f32.mrb[39].mxu0 }
0x1bde   : > { %v4768_v55 = vld [vmem:[%s7379_s19 + $0x38] sm:$0xff] }
0x1be4   : > { %v4326_v56 = vpop.f32.mrb[40].mxu0 }
0x1be5   : > { %v5828_v57 = vpop.f32.mrb[41].mxu0  ;;  %5841 = vmatpush3.xpose.msk.msra.mxu0 %vm1109_vm2, %v4326_v56 }
0x1be6   : > { %5845 = vmatprep.subr.mxu0 %v6297_v11  ;;  %v5271_v57 = vld [vmem:[%s7378_s18] ss:$0 sm:$0xff] }
0x1be8   : > { %5843 = vmatmul.mubr.msk.f32.vlgmr.msra.gmra.mrb[42].mxu0 %vm1109_vm2, %v4254_v58 }
0x1be9   : > { %5847 = vmatprep.mubr.msk.f32.mxu0 %vm6296_vm0, %v6297_v11  ;;  %5846 = vmatpush3.msra.mxu0 %v4401_v8 }
0x1bea   : > { %6029 = vmatprep.subr.bf16.mxu0 %v6295_v3 }
0x1cbb   : > { %v4477_v63 = vpop.f32.mrb[42].mxu0 }
0x1cbc   : > { %v5844_v0 = vpop.f32.mrb[43].mxu0  ;;  %v4481_v1 = vsel %vm1109_vm2, %v4477_v63, -inf }
0x1cbd   : > { %4482 = vmax.xlane.f32.xlu0 %v4481_v1 }
0x1d4a   : > { %v4483_v2 = vpop.xlane.xlu0 %4482 }
0x1d4b   : > { %v4484_v4 = vsub.f32 %v4477_v63, %v4483_v2 }
0x1d4d   : > { %v4485_v5 = vmul.f32 1.442695, %v4484_v4 }
0x1d4f   : > { %6147 = vpow2.f32 %v4485_v5 }
0x1d59   : > { %v6148_v6 = vpop.eup %6147 }
0x1d5a   : > { %v4487_v7 = vsel %vm1109_vm2, %v6148_v6, 0.0 }
0x1d5b   : > { %4488 = vadd.xlane.f32.xlu1 %v4487_v7 }
0x1de8   : > { %v4489_v10 = vpop.xlane.xlu1 %4488 }
0x1de9   : > { %6149 = vrcp.f32 %v4489_v10 }
0x1df3   : > { %v6150_v12 = vpop.eup %6149 }
0x1df4   : > { %v4491_v13 = vmul.f32 %v6150_v12, %v4489_v10 }
0x1df6   : > { %v4492_v14 = vsub.f32 2.0, %v4491_v13 }
0x1df8   : > { %v4493_v15 = vmul.f32 %v6150_v12, %v4492_v14 }
0x1dfa   : > { %v4494_v17 = vmul.f32 %v6148_v6, %v4493_v15 }
0x1dfc   : > { %5265 = vst.msk [vmem:[%s6946_s7 + $0x18] sm:$0xff] %vm1109_vm2, %v4494_v17  ;;  %5848 = vmatmul.mubr.msk.f32.vlgmr.msra.gmra.mrb[44].mxu0 %vm1109_vm2, %v4494_v17 }
0x1dfd   : > { %5863 = vmatprep.mubr.msk.f32.mxu0 %vm6296_vm0, %v6297_v11 }
0x1ecf   : > { %v4566_v19 = vpop.f32.mrb[44].mxu0 }
0x1ed0   : > { %v5849_v16 = vpop.f32.mrb[45].mxu0  ;;  %5853 = vmatmul.mubr.msk.f32.vlgmr.msra.gmra.mrb[48].mxu1 %vm1109_vm2, %v4566_v19 }
0x1ed1   : > { %5882 = vmatprep.mubr.msk.f32.mxu1 %vm6296_vm0, %v6297_v11  ;;  %v4677_v11 = vld [vmem:[%s7377_s17 + $0x8] sm:$0xff]  ;;  %6037 = vmatpush3.bf16.msra.mxu1 %v6036_v39 }
0x1ed2   : > { %v6030_v33 = vpack.c.bf16 %v4677_v11, %v4676_v31  ;;  %6038 = vmatprep.subr.bf16.mxu1 %v6295_v3 }
0x1ed4   : > { %6031 = vmatpush3.bf16.msra.mxu0 %v6030_v33 }
0x1ed5   : > { %6032 = vmatprep.subr.bf16.mxu0 %v6295_v3  ;;  %6040 = vmatpush3.bf16.msra.mxu1 %v6039_v41 }
0x1ed6   : > { %6041 = vmatprep.subr.bf16.mxu1 %v6295_v3 }
0x1ed9   : > { %6043 = vmatpush3.bf16.msra.mxu1 %v6042_v45 }
0x1eda   : > { %6044 = vmatprep.subr.bf16.mxu1 %v6295_v3  ;;  %v4767_v3 = vld [vmem:[%s7379_s19 + $0x30] sm:$0xff] }
0x1edb   : > { %v6045_v56 = vpack.c.bf16 %v4768_v55, %v4767_v3 }
0x1edd   : > { %6046 = vmatpush3.bf16.msra.mxu1 %v6045_v56 }
0x1fa3   : > { %v4641_v20 = vpop.f32.mrb[48].mxu1 }
0x1fa4   : > { %v4645_v21 = vadd.f32 %v4641_v20, %v4178_v54  ;;  %v5854_v22 = vpop.f32.mrb[49].mxu1 }
0x1fa6   : > { %v4646_v23 = vadd.f32 %v4645_v21, %v6888_v42  ;;  %v4678_v42 = vld [vmem:[%s7377_s17 + $0x10] sm:$0xff] }
0x1fa7   : > { %v6033_v35 = vpack.c.bf16 %v4679_v34, %v4678_v42 }
0x1fa8   : > { %v4649_v24 = vsel %vm883_vm1, %v4646_v23, 0.0 }
0x1fa9   : > { %4650 = vadd.xlane.f32.xlu0 %v4649_v24  ;;  %6034 = vmatpush3.bf16.msra.mxu0 %v6033_v35 }
0x2036   : > { %v4651_v25 = vpop.xlane.xlu0 %4650 }
0x2037   : > { %v4652_v26 = vmul.f32 0.03125, %v4651_v25 }
0x2039   : > { %v4653_v27 = vsub.f32 %v4646_v23, %v4652_v26 }
0x203b   : > { %v4654_v28 = vmul.f32 %v4653_v27, %v4653_v27 }
0x203d   : > { %v4655_v30 = vsel %vm883_vm1, %v4654_v28, 0.0 }
0x203e   : > { %4656 = vadd.xlane.f32.xlu1 %v4655_v30 }
0x20cb   : > { %v4657_v46 = vpop.xlane.xlu1 %4656 }
0x20cc   : > { %v4658_v47 = vmul.f32 0.03125, %v4657_v46 }
0x20ce   : > { %v4659_v48 = vadd.f32 1e-06, %v4658_v47 }
0x20d0   : > { %6151 = vrsqrt.f32 %v4659_v48 }
0x20da   : > { %v6152_v49 = vpop.eup %6151 }
0x20db   : > { %v4661_v51 = vmul.f32 %v6152_v49, %v4653_v27 }
0x20dd   : > { %v4668_v53 = vmul.f32 %v5269_v50, %v4661_v51 }
0x20df   : > { %v4675_v54 = vadd.f32 %v5270_v52, %v4668_v53 }
0x20e1   : > { %5864 = vmatmul.mubr.msk.f32.vlgmr.msra.gmra.mrb[46].mxu0 %vm883_vm1, %v4675_v54 }
0x21b4   : > { %v4756_v58 = vpop.f32.mrb[46].mxu0 }
0x21b5   : > { %v4757_v18 = vadd.f32 %v5271_v57, %v4756_v58  ;;  %v5865_v59 = vpop.f32.mrb[47].mxu0 }
0x21b7   : > { %v4760_v32 = vmax.f32 %v4757_v18, 0.0 }
0x21b9   : > { %5883 = vmatmul.mubr.msk.f32.vlgmr.msra.gmra.mrb[50].mxu1 %vm4776_vm4, %v4760_v32 }
0x228c   : > { %v4846_v61 = vpop.f32.mrb[50].mxu1 }
0x228d   : > { %v4847_v62 = vadd.f32 %v5273_v60, %v4846_v61  ;;  %v5884_v63 = vpop.f32.mrb[51].mxu1 }
0x228f   : > { %v4850_v0 = vadd.f32 %v4847_v62, %v4675_v54 }
0x2291   : > { %v4853_v1 = vsel %vm883_vm1, %v4850_v0, 0.0 }
0x2292   : > { %4854 = vadd.xlane.f32.xlu0 %v4853_v1 }
0x231f   : > { %v4855_v2 = vpop.xlane.xlu0 %4854 }
0x2320   : > { %v4856_v4 = vmul.f32 0.03125, %v4855_v2 }
0x2322   : > { %v7212_v5 = vsub.f32 %v4850_v0, %v4856_v4 }
0x2324   : > { %v4858_v6 = vmul.f32 %v7212_v5, %v7212_v5 }
0x2326   : > { %v4859_v7 = vsel %vm883_vm1, %v4858_v6, 0.0 }
0x2327   : > { %4860 = vadd.xlane.f32.xlu1 %v4859_v7 }
0x2328   : > { %6168 = shalt.err (!%p6165_p5)
}
0x2329   : > { %s6169_s28 = scalar_lea.hbm %s7228_s29, 512  ;;  %s6173_s21 = scalar_lea.hbm %s7455_s24, 1024 }
0x232a   : > { %p6170_p6 = scmp.ne.s32.totalorder %s7228_s29, %s6169_s28  ;;  %p6174_p10 = scmp.lt.u32.totalorder %s7228_s29, %s7455_s24 }
0x232b   : > { %p6175_p11 = scmp.lt.u32.totalorder %s6173_s21, %s6169_s28  ;;  %p6177_p13 = scmp.lt.u32.totalorder %s6169_s28, %s7228_s29 }
0x232c   : > { %p6171_p7 = pnand %p6170_p6, %p6475_p4 }
0x232d   : > { %p6176_p12 = por %p6175_p11, %p6174_p10 }
0x232e   : > { %p6172_p9 = pneg %p6171_p7 }
0x232f   : > { %p6178_p0 = por %p6177_p13, %p6176_p12 }
0x2331   : > { %p6179_p1 = pnand %p6178_p0, %p6172_p9 }
0x2333   : > { %6182 = shalt.err (!%p6179_p1)
}
0x2334   : > { %s6299_s10 = smov 128   ;;  %s6300_s8 = smov 8  }
0x2335   : > { %6048 = dma.vmem_to_hbm [thread:$0]  (%p6475_p4), %s7231_s25, 512, %s7228_s29, %s4887_s0, %s6299_s10, %s6299_s10, %s6300_s8  }
0x2336   : > { %s7456_s27 = sshll.u32 %s6946_s7, 4  ;;  %s7457_s28 = sshll.u32 %s7452_s30, 9  ;;  %s7262_s27 = int_to_ptr.vmem [resolvable:$true] %s7456_s27 }
0x2337   : > { %s7458_s21 = sld [smem:[#allocation35_spill]]  ;;  %s6183_s11 = scalar_lea.vmem %s7262_s27, 512 }
0x2338   : > { %p6184_p2 = scmp.ne.s32.totalorder %s7262_s27, %s6183_s11  ;;  %s6301_s12 = smov [#allocation7]  }
0x2339   : > { %s6187_s13 = sshll.u32 %s6301_s12, 4  ;;  %s6188_s13 = int_to_ptr.vmem [resolvable:$false] %s6187_s13 }
0x233a   : > { %p6185_p3 = pnand %p6184_p2, %p6475_p4  ;;  %s6189_s7 = scalar_lea.vmem %s6188_s13, 1024 }
0x233b   : > { %p6190_p6 = scmp.lt.s32.totalorder %s7262_s27, %s6188_s13  ;;  %p6191_p7 = scmp.lt.s32.totalorder %s6189_s7, %s6183_s11 }
0x233c   : > { %p6186_p5 = pneg %p6185_p3 }
0x233d   : > { %s7269_s9 = scalar_lea.hbm %s7458_s21, %s7457_s28  ;;  %p6192_p9 = por %p6191_p7, %p6190_p6 }
0x233f   : > { %p6193_p10 = pnand %p6192_p9, %p6186_p5 }
0x2341   : > { %6196 = shalt.err (!%p6193_p10)
}
0x2342   : > { %s6197_s29 = scalar_lea.hbm %s7269_s9, 512  ;;  %s6201_s12 = scalar_lea.hbm %s7458_s21, 1024 }
0x2343   : > { %p6198_p11 = scmp.ne.s32.totalorder %s7269_s9, %s6197_s29  ;;  %p6202_p0 = scmp.lt.u32.totalorder %s7269_s9, %s7458_s21 }
0x2344   : > { %p6203_p1 = scmp.lt.u32.totalorder %s6201_s12, %s6197_s29  ;;  %p6205_p3 = scmp.lt.u32.totalorder %s6197_s29, %s7269_s9 }
0x2345   : > { %p6199_p12 = pnand %p6198_p11, %p6475_p4 }
0x2346   : > { %p6204_p2 = por %p6203_p1, %p6202_p0 }
0x2347   : > { %p6200_p13 = pneg %p6199_p12 }
0x2348   : > { %p6206_p5 = por %p6205_p3, %p6204_p2 }
0x234a   : > { %p6207_p6 = pnand %p6206_p5, %p6200_p13 }
0x234c   : > { %6210 = shalt.err (!%p6207_p6)
}
0x234d   : > { %6049 = dma.vmem_to_hbm [thread:$0]  (%p6475_p4), %s7262_s27, 512, %s7269_s9, %s4887_s0, %s6299_s10, %s6299_s10, %s6300_s8  }
0x234e   : > { %s5120_s11 = sshll.u32 %s6606_s6, 3  ;;  %s7459_s29 = sld [smem:[#allocation31_spill]] }
0x234f   : > { %s7460_s28 = sld [smem:[#allocation32_spill]]  ;;  %s5280_s12 = sshll.u32 %s7452_s30, 7 }
0x2350   : > { %s834_s0 = scalar_lea.vmem [#allocation3], %s5120_s11  ;;  %s7461_s9 = sld [smem:[#allocation33_spill]] }
0x2351   : > { %s4906_s10 = sshll.u32 %s834_s0, 4  ;;  %s4882_s13 = scalar_lea.sflag [#allocation4], %s6606_s6  ;;  %s7311_s10 = int_to_ptr.vmem [resolvable:$true] %s4906_s10 }
0x2352   : > { %s6211_s1 = scalar_lea.vmem %s7311_s10, 128  ;;  %s6302_s30 = smov [#allocation3]  }
0x2353   : > { %p6212_p7 = scmp.ne.s32.totalorder %s7311_s10, %s6211_s1  ;;  %s6215_s11 = sshll.u32 %s6302_s30, 4  ;;  %s6216_s11 = int_to_ptr.vmem [resolvable:$false] %s6215_s11 }
0x2354   : > { %v5275_v12 = vld [vmem:[%s7459_s29] ss:$0 sm:$0xff]  ;;  %s6217_s7 = scalar_lea.vmem %s6216_s11, 256  ;;  %p6218_p11 = scmp.lt.s32.totalorder %s7311_s10, %s6216_s11 }
0x2355   : > { %v5276_v14 = vld [vmem:[%s7460_s28] ss:$0 sm:$0xff]  ;;  %p6213_p9 = pnand %p6212_p7, %p6475_p4  ;;  %p6219_p12 = scmp.lt.s32.totalorder %s6217_s7, %s6211_s1 }
0x2356   : > { %s7309_s5 = scalar_lea.hbm %s7461_s9, %s5280_s12 }
0x2357   : > { %p6214_p10 = pneg %p6213_p9  ;;  %p6220_p13 = por %p6219_p12, %p6218_p11 }
0x2359   : > { %p6221_p0 = pnand %p6220_p13, %p6214_p10 }
0x23b4   : > { %v4861_v8 = vpop.xlane.xlu1 %4860 }
0x23b5   : > { %v4862_v9 = vmul.f32 0.03125, %v4861_v8 }
0x23b7   : > { %v4863_v29 = vadd.f32 1e-06, %v4862_v9 }
0x23b9   : > { %6153 = vrsqrt.f32 %v4863_v29 }
0x23c3   : > { %v6154_v10 = vpop.eup %6153 }
0x23c4   : > { %v4865_v13 = vmul.f32 %v6154_v10, %v7212_v5 }
0x23c6   : > { %v4872_v15 = vmul.f32 %v5275_v12, %v4865_v13 }
0x23c8   : > { %v4879_v17 = vadd.f32 %v5276_v14, %v4872_v15 }
0x23ca   : > { %4880 = vst.msk [vmem:[%s834_s0] sm:$0xff] %vm883_vm1, %v4879_v17 }
0x23cb   : > { %6224 = shalt.err (!%p6221_p0)
}
0x23cc   : > { %s6225_s6 = scalar_lea.hbm %s7309_s5, 128  ;;  %s6229_s25 = scalar_lea.hbm %s7461_s9, 256 }
0x23cd   : > { %p6226_p1 = scmp.ne.s32.totalorder %s7309_s5, %s6225_s6  ;;  %p6230_p5 = scmp.lt.u32.totalorder %s7309_s5, %s7461_s9 }
0x23ce   : > { %p6231_p6 = scmp.lt.u32.totalorder %s6229_s25, %s6225_s6  ;;  %p6233_p9 = scmp.lt.u32.totalorder %s6225_s6, %s7309_s5 }
0x23cf   : > { %p6227_p2 = pnand %p6226_p1, %p6475_p4 }
0x23d0   : > { %p6232_p7 = por %p6231_p6, %p6230_p5 }
0x23d1   : > { %p6228_p3 = pneg %p6227_p2 }
0x23d2   : > { %p6234_p10 = por %p6233_p9, %p6232_p7 }
0x23d4   : > { %p6235_p11 = pnand %p6234_p10, %p6228_p3 }
0x23d6   : > { %6238 = shalt.err (!%p6235_p11)
}
0x23d7   : > { %6047 = dma.vmem_to_hbm [thread:$0]  (%p6475_p4), %s7311_s10, 128, %s7309_s5, %s4882_s13  }
0x23d8 PF: > { %s7462_s0 = sld [smem:[#allocation10_spill]]  ;;  %p6063_p12 = scmp.ge.s32.totalorder %s6293_s3, 2 }
0x23da   : > { %p6054_p13 = pnand %p6063_p12, %p6484_p8 }
0x23de   : > { %s4952_s27 = sand.u32 1, %s7462_s0  }
0x23df   : > { %s4953_s1 = scalar_lea.sflag [#allocation4], %s4952_s27 }
0x23e0   : > { %6264 = dma.done.wait (!%p6054_p13), %s4953_s1, 128  }
0x23e1   : > { %6266 = vsyncadd (!%p6054_p13), %s4953_s1, 4294967168  ;;  %s7464_s30 = sadd.s32 4294967294, %s6293_s3  }
0x23e2   : > { %s4961_s11 = sand.u32 1, %s7464_s30  }
0x23e3   : > { %s4962_s7 = scalar_lea.sflag [#allocation6], %s4961_s11 }
0x23e4   : > { %6268 = dma.done.wait (!%p6054_p13), %s4962_s7, 1024  }
0x23e5   : > { %6270 = vsyncadd (!%p6054_p13), %s4962_s7, 4294966272  ;;  %s44_s3 = sadd.s32 1, %s6293_s3   ;;  %s7465_s4 = sld [smem:[#allocation11_spill]] }
0x23e6   : > { %p41_p4 = scmp.ge.s32.totalorder %s44_s3, 4   ;;  %s7466_s6 = sld [smem:[#allocation17_spill]] }
0x23e7   : > { %s7467_s30 = sld [smem:[#allocation13_spill]]  ;;  %s7468_s7 = sld [smem:[#allocation14_spill]] }
0x23e8   : > { %s7469_s29 = smov %s6277_s2  ;;  %43 = sbr.rel (!%p41_p4) target bundleno = 25 (0x19), region = 218 }
0x23eb   : > { %s7470_s2 = smov %s7465_s4 }
0x23ef   :  { %4976 = vsyncpa [#allocation4], 1 }
0x23f0   :  { %4978 = vsyncpa [#allocation4 + $0x1], 1 }
0x23f1   :  { %4979 = vsyncpa [#allocation6], 1 }
0x23f2   :  { %4981 = vsyncpa [#allocation6 + $0x1], 1 }

// kernel: tpu_custom_call.1
= control target key start
LH: loop header
LB: loop body
LE: loop exit
PB: predicated region body
PF: predicated region fallthrough
CT: control target
= control target key end

     0   :  { %s7360_s0 = inlined_call_operand.vmem [shape: f32[2,8,32], index: 0, kind: input, shape index: {}]   ;;  %s7361_s1 = inlined_call_operand.vmem [shape: f32[2,8,32], index: 1, kind: input, shape index: {}]   ;;  %s7362_s2 = inlined_call_operand.vmem [shape: f32[2,8,32], index: 2, kind: input, shape index: {}]   ;;  %s7363_s3 = inlined_call_operand.vmem [shape: s8[2,8,8], index: 3, kind: input, shape index: {}]   ;;  %s7364_s4 = inlined_call_operand.<no memory space> [shape: s8[1,1,1], index: 4, kind: input, shape index: {}]   ;;  %s7365_s5 = inlined_call_operand.vmem [shape: f32[4,32,8], index: 5, kind: input, shape index: {}]   ;;  %s7366_s6 = inlined_call_operand.vmem [shape: f32[4,32,8], index: 6, kind: input, shape index: {}]   ;;  %s7367_s7 = inlined_call_operand.vmem [shape: f32[4,32,8], index: 7, kind: input, shape index: {}]   ;;  %s7368_s8 = inlined_call_operand.vmem [shape: f32[4,8,32], index: 8, kind: input, shape index: {}]   ;;  %s7369_s9 = inlined_call_operand.vmem [shape: f32[1,32], index: 9, kind: input, shape index: {}]   ;;  %s7370_s10 = inlined_call_operand.vmem [shape: f32[1,32], index: 10, kind: input, shape index: {}]   ;;  %s7371_s11 = inlined_call_operand.vmem [shape: f32[4,32,8], index: 11, kind: input, shape index: {}]   ;;  %s7372_s12 = inlined_call_operand.vmem [shape: f32[4,32,8], index: 12, kind: input, shape index: {}]   ;;  %s7373_s13 = inlined_call_operand.vmem [shape: f32[4,32,8], index: 13, kind: input, shape index: {}]   ;;  %s7374_s14 = inlined_call_operand.vmem [shape: f32[4,8,32], index: 14, kind: input, shape index: {}]   ;;  %s7375_s15 = inlined_call_operand.vmem [shape: f32[1,32], index: 15, kind: input, shape index: {}]   ;;  %s7376_s16 = inlined_call_operand.vmem [shape: f32[1,32], index: 16, kind: input, shape index: {}]   ;;  %s7377_s17 = inlined_call_operand.vmem [shape: f32[32,64], index: 17, kind: input, shape index: {}]   ;;  %s7378_s18 = inlined_call_operand.vmem [shape: f32[1,64], index: 18, kind: input, shape index: {}]   ;;  %s7379_s19 = inlined_call_operand.vmem [shape: f32[64,32], index: 19, kind: input, shape index: {}]   ;;  %s7380_s20 = inlined_call_operand.vmem [shape: f32[1,32], index: 20, kind: input, shape index: {}]   ;;  %s7381_s21 = inlined_call_operand.vmem [shape: f32[1,32], index: 21, kind: input, shape index: {}]   ;;  %s7382_s22 = inlined_call_operand.vmem [shape: f32[1,32], index: 22, kind: input, shape index: {}]   ;;  %s7383_s23 = inlined_call_operand.hbm [shape: f32[2,8,32], index: 23, kind: output, shape index: {0}]   ;;  %s7384_s24 = inlined_call_operand.hbm [shape: f32[2,4,8,8], index: 24, kind: output, shape index: {1}]   ;;  %s7385_s25 = inlined_call_operand.hbm [shape: f32[2,4,8,8], index: 25, kind: output, shape index: {2}]  }
   0x1   :  { %7408 = sst [smem:[#allocation18_spill]] %s7360_s0 }
   0x2   :  { %7409 = sst [smem:[#allocation19_spill]] %s7361_s1 }
   0x3   :  { %7410 = sst [smem:[#allocation20_spill]] %s7362_s2 }
   0x4   :  { %7411 = sst [smem:[#allocation21_spill]] %s7363_s3 }
   0x5   :  { %7412 = sst [smem:[#allocation22_spill]] %s7365_s5 }
   0x6   :  { %7413 = sst [smem:[#allocation23_spill]] %s7366_s6 }
   0x7   :  { %7414 = sst [smem:[#allocation24_spill]] %s7367_s7 }
   0x8   :  { %7415 = sst [smem:[#allocation25_spill]] %s7368_s8 }
   0x9   :  { %7416 = sst [smem:[#allocation26_spill]] %s7369_s9 }
   0xa   :  { %7417 = sst [smem:[#allocation27_spill]] %s7370_s10 }
   0xb   :  { %7418 = sst [smem:[#allocation28_spill]] %s7371_s11 }
   0xc   :  { %7419 = sst [smem:[#allocation29_spill]] %s7372_s12 }
   0xd   :  { %7420 = sst [smem:[#allocation30_spill]] %s7373_s13 }
   0xe   :  { %7421 = sst [smem:[#allocation31_spill]] %s7381_s21 }
   0xf   :  { %7422 = sst [smem:[#allocation32_spill]] %s7382_s22 }
  0x10   :  { %7423 = sst [smem:[#allocation33_spill]] %s7383_s23 }
  0x11   :  { %7424 = sst [smem:[#allocation34_spill]] %s7384_s24 }
  0x12   :  { %7425 = sst [smem:[#allocation35_spill]] %s7385_s25 }
  0x13   :  { %33 = vsyncpa [#allocation4], 0 }
  0x14   :  { %35 = vsyncpa [#allocation4 + $0x1], 0 }
  0x15   :  { %36 = vsyncpa [#allocation6], 0 }
  0x16   :  { %38 = vsyncpa [#allocation6 + $0x1], 0  ;;  %s6433_s29 = smov 0   ;;  %s6435_s2 = smov 0  }
  0x17   :  { %s6437_s6 = smov 0   ;;  %s6439_s30 = smov 0  }
  0x18   :  { %s6441_s7 = smov 0   ;;  %s6443_s3 = smov 0  }
  0x19 LB: > { %7426 = sst [smem:[#allocation10_spill]] %s6273_s29  ;;  %s7390_s26 = sadd.s32 4294967295, %s6293_s3   ;;  %s6293_s3 = sphi %s6443_s3, %s44_s3   ;;  %s6289_s7 = sphi %s6441_s7, %s7468_s7   ;;  %s6285_s30 = sphi %s6439_s30, %s7467_s30   ;;  %s6281_s6 = sphi %s6437_s6, %s7466_s6   ;;  %s6277_s2 = sphi %s6435_s2, %s7470_s2   ;;  %s6273_s29 = sphi %s6433_s29, %s7469_s29  }
  0x1a   : > { %7427 = sst [smem:[#allocation11_spill]] %s6281_s6  ;;  %s7393_s1 = sadd.s32 4294967294, %s6293_s3  }
  0x1b   : > { %7428 = sst [smem:[#allocation12_spill]] %s6285_s30  ;;  %s56_s8 = sadd.s32 1, %s6289_s7 }
  0x1c   : > { %7429 = sst [smem:[#allocation13_spill]] %s6289_s7  ;;  %s572_s27 = sadd.s32 1, %s6281_s6 }
  0x1d   : > { %p58_p0 = scmp.ge.s32.totalorder %s56_s8, 2  ;;  %p582_p1 = scmp.ne.s32.totalorder %s6281_s6, %s6277_s2 }
  0x1e   : > { %p583_p2 = scmp.eq.s32.totalorder %s7390_s26, 1  ;;  %p588_p3 = scmp.ne.s32.totalorder %s6277_s2, %s6273_s29 }
  0x1f   : > { %s7472_s8 = smov (%p58_p0, %s56_s8), 0  ;;  %p589_p5 = scmp.eq.s32.totalorder %s7393_s1, 1 }
  0x20   : > { %7430 = sst [smem:[#allocation14_spill]] %s7472_s8  ;;  %p6475_p4 = por %p583_p2, %p582_p1 }
  0x21   : > { %s567_s28 = ssub.s32 %s6289_s7, %s7472_s8  ;;  %p5119_p6 = scmp.ge.s32.totalorder %s6293_s3, 1 }
  0x22   : > { %s7431_s4 = scalar_select %p6475_p4, 1, 0 }
  0x23   : > { %p570_p7 = scmp.eq.s32.totalorder %s567_s28, 0  ;;  %p6484_p8 = por %p589_p5, %p588_p3 }
  0x24   : > { %7432 = sst [smem:[#allocation15_spill]] %s7431_s4  ;;  %p754_p9 = scmp.lt.s32.totalorder %s6293_s3, 3 }
  0x25   : > { %s7433_s9 = scalar_select %p6484_p8, 1, 0 }
  0x26   : > { %s6490_s5 = scalar_select %p570_p7, %s6281_s6, %s572_s27  }
  0x27   : > { %7434 = sst [smem:[#allocation16_spill]] %s7433_s9  ;;  %p755_p10 = pnand %p5119_p6, %p754_p9 }
  0x28   : > { %7435 = sst [smem:[#allocation17_spill]] %s6490_s5  ;;  %s7436_s29 = sld [smem:[#allocation22_spill]] (!%p755_p10)  ;;  %v6295_v3 = vmov (!%p755_p10), 0.0|0.0   ;;  %vm6296_vm0 = vmmov (!%p755_p10), 0   ;;  %v6297_v11 = vmov (!%p755_p10), 0.0   ;;  %vm883_vm1 = vcmask (!%p755_p10), 261120  }
  0x29   : > { %758 = sbr.rel (%p755_p10) target bundleno = 9176 (0x23d8), region = 112  ;;  %s7438_s8 = sld [smem:[#allocation23_spill]] (!%p755_p10)  ;;  %5885 = vmatprep.subr.bf16.mxu0 (!%p755_p10), %v6295_v3  ;;  %5891 = vmatprep.subr.bf16.mxu1 (!%p755_p10), %v6295_v3  ;;  %vm1109_vm2 = vcmask (!%p755_p10), 64512   ;;  %vm4776_vm4 = vcmask (!%p755_p10), 523264  }
  0x2a   : > { %p849_p11 = scmp.lt.s32.totalorder (!%p755_p10), %s6285_s30, 1  ;;  %5479 = vmatprep.mubr.msk.f32.mxu0 (!%p755_p10), %vm6296_vm0, %v6297_v11  ;;  %5490 = vmatprep.mubr.msk.f32.mxu1 (!%p755_p10), %vm6296_vm0, %v6297_v11  ;;  %s7441_s6 = sld [smem:[#allocation18_spill]] (!%p755_p10) }
  0x2b   : > { %s7442_s4 = sld [smem:[#allocation19_spill]] (!%p755_p10)  ;;  %s7444_s0 = sld [smem:[#allocation25_spill]] (!%p755_p10) }
  0x2c   : > { %s7445_s12 = sld [smem:[#allocation29_spill]] (!%p755_p10)  ;;  %s7446_s11 = sld [smem:[#allocation28_spill]] (!%p755_p10) }
  0x2d   : > { %s7448_s25 = sld [smem:[#allocation26_spill]] (!%p755_p10)  ;;  %s7449_s13 = sld [smem:[#allocation30_spill]] (!%p755_p10) }
  0x2e   : > { %s7437_s23 = smov (!%p755_p10), %s7436_s29  ;;  %v879_v0 = vld [vmem:[%s7436_s29] sm:$0xff] (!%p755_p10)  ;;  %s7439_s29 = sld [smem:[#allocation24_spill]] (!%p755_p10) }
  0x2f   : > { %v880_v1 = vld [vmem:[%s7437_s23 + $0x8] sm:$0xff] (!%p755_p10)  ;;  %v958_v2 = vld [vmem:[%s7438_s8] sm:$0xff] (!%p755_p10)  ;;  %v881_v6 = vld [vmem:[%s7437_s23 + $0x10] sm:$0xff] (!%p755_p10)  ;;  %s7450_s10 = sld [smem:[#allocation27_spill]] (!%p755_p10)  ;;  %s7454_s21 = sadd.s32 (!%p755_p10), 4294967295, %s6293_s3  }
  0x30   : > { %v5886_v4 = vpack.c.bf16 %v880_v1, %v879_v0  ;;  %v959_v5 = vld [vmem:[%s7438_s8 + $0x8] sm:$0xff]  ;;  %v882_v7 = vld [vmem:[%s7437_s23 + $0x18] sm:$0xff]  ;;  %v960_v9 = vld [vmem:[%s7438_s8 + $0x10] sm:$0xff]  ;;  %s6524_s7 = scalar_select %p849_p11, %s6285_s30, 1 }
  0x31   : > { %v5892_v8 = vpack.c.bf16 %v959_v5, %v958_v2  ;;  %v961_v10 = vld [vmem:[%s7438_s8 + $0x18] sm:$0xff]  ;;  %v5889_v12 = vpack.c.bf16 %v882_v7, %v881_v6  ;;  %v5133_v42 = vld [vmem:[%s7437_s23 + $0x20] sm:$0xff]  ;;  %v5134_v43 = vld [vmem:[%s7437_s23 + $0x28] sm:$0xff]  ;;  %s7220_s22 = sand.u32 1, %s7454_s21   ;;  %s6298_s21 = smov [#allocation5]  }
  0x32   : > { %5887 = vmatpush3.bf16.msra.mxu0 %v5886_v4  ;;  %v5895_v13 = vpack.c.bf16 %v961_v10, %v960_v9  ;;  %s6535_s1 = sshll.u32 %s6524_s7, 3  ;;  %s5126_s24 = sshll.u32 %s6524_s7, 1  ;;  %v5904_v44 = vpack.c.bf16 %v5134_v43, %v5133_v42  ;;  %v5135_v45 = vld [vmem:[%s7437_s23 + $0x30] sm:$0xff]  ;;  %v5136_v46 = vld [vmem:[%s7437_s23 + $0x38] sm:$0xff]  ;;  %v5138_v52 = vld [vmem:[%s7438_s8 + $0x20] sm:$0xff] }
  0x33   : > { %5893 = vmatpush3.bf16.msra.mxu1 %v5892_v8  ;;  %5888 = vmatprep.subr.bf16.mxu0 %v6295_v3  ;;  %s855_s9 = scalar_lea.vmem %s7441_s6, %s6535_s1  ;;  %s859_s30 = scalar_lea.vmem %s7442_s4, %s6535_s1  ;;  %v5907_v47 = vpack.c.bf16 %v5136_v46, %v5135_v45  ;;  %v5139_v53 = vld [vmem:[%s7438_s8 + $0x28] sm:$0xff]  ;;  %v5140_v57 = vld [vmem:[%s7438_s8 + $0x30] sm:$0xff]  ;;  %v5141_v58 = vld [vmem:[%s7438_s8 + $0x38] sm:$0xff] }
  0x34   : > { %s7440_s26 = smov %s7439_s29  ;;  %v1035_v14 = vld [vmem:[%s7439_s29] sm:$0xff]  ;;  %5894 = vmatprep.subr.bf16.mxu1 %v6295_v3  ;;  %s7443_s4 = sld [smem:[#allocation21_spill]]  ;;  %v5910_v55 = vpack.c.bf16 %v5139_v53, %v5138_v52  ;;  %v5913_v59 = vpack.c.bf16 %v5141_v58, %v5140_v57  ;;  %v5157_v42 = vld [vmem:[%s7437_s23 + $0x50] sm:$0xff]  ;;  %v5158_v43 = vld [vmem:[%s7437_s23 + $0x58] sm:$0xff] }
  0x35   : > { %v1036_v15 = vld [vmem:[%s7440_s26 + $0x8] sm:$0xff]  ;;  %v6545_v16 = vld [vmem:[%s855_s9] sm:$0xff]  ;;  %v1037_v19 = vld [vmem:[%s7440_s26 + $0x10] sm:$0xff]  ;;  %s6606_s6 = sand.u32 1, %s6277_s2   ;;  %v5925_v46 = vpack.c.bf16 %v5158_v43, %v5157_v42 }
  0x36   : > { %5890 = vmatpush3.bf16.msra.mxu0 %v5889_v12  ;;  %v5898_v17 = vpack.c.bf16 %v1036_v15, %v1035_v14  ;;  %v6547_v18 = vld [vmem:[%s859_s30] sm:$0xff]  ;;  %v1038_v20 = vld [vmem:[%s7440_s26 + $0x18] sm:$0xff]  ;;  %v5144_v5 = vld [vmem:[%s7440_s26 + $0x28] sm:$0xff] }
  0x37   : > { %5896 = vmatpush3.bf16.msra.mxu1 %v5895_v13  ;;  %5897 = vmatprep.subr.bf16.mxu0 %v6295_v3  ;;  %v5901_v21 = vpack.c.bf16 %v1038_v20, %v1037_v19  ;;  %v5143_v4 = vld [vmem:[%s7440_s26 + $0x20] sm:$0xff]  ;;  %v5145_v6 = vld [vmem:[%s7440_s26 + $0x30] sm:$0xff]  ;;  %v5146_v8 = vld [vmem:[%s7440_s26 + $0x38] sm:$0xff] }
  0x38   : > { %5509 = vmatprep.subr.mxu1 %v6297_v11  ;;  %v5916_v7 = vpack.c.bf16 %v5144_v5, %v5143_v4  ;;  %v5919_v9 = vpack.c.bf16 %v5146_v8, %v5145_v6  ;;  %v5165_v57 = vld [vmem:[%s7440_s26 + $0x40] sm:$0xff]  ;;  %v5166_v58 = vld [vmem:[%s7440_s26 + $0x48] sm:$0xff] }
  0x39   : > { %5480 = vmatmul.mubr.msk.f32.vlgmr.msra.gmra.mrb[0].mxu0 %vm883_vm1, %v6545_v16 }
  0x3a   : > { %5491 = vmatmul.mubr.msk.f32.vlgmr.msra.gmra.mrb[0].mxu1 %vm883_vm1, %v6547_v18  ;;  %5899 = vmatpush3.bf16.msra.mxu0 %v5898_v17  ;;  %s870_s9 = scalar_lea.vmem %s7443_s4, %s5126_s24  ;;  %s7404_s24 = sshll.u32 %s6606_s6, 5 }
  0x3b   : > { %5900 = vmatprep.subr.bf16.mxu0 %v6295_v3  ;;  %5501 = vmatprep.mubr.msk.f32.mxu0 %vm6296_vm0, %v6297_v11  ;;  %v874_v29 = vld [vmem:[%s870_s9] sm:$0x3]  ;;  %s6623_s28 = scalar_lea.vmem [#allocation5], %s7404_s24  ;;  %s7447_s24 = sld [smem:[#allocation20_spill]] }
  0x3c   : > { %5511 = vmatprep.mubr.msk.f32.mxu1 %vm6296_vm0, %v6297_v11  ;;  %v875_v30 = vunpack.c.0.s8 %v874_v29  ;;  %s7451_s9 = sshll.u32 %s6606_s6, 5 }
  0x3d   : > { %s6946_s7 = scalar_lea.vmem [#allocation7], %s7451_s9  ;;  %s6159_s9 = sshll.u32 %s6298_s21, 4  ;;  %s6160_s9 = int_to_ptr.vmem [resolvable:$false] %s6159_s9 }
  0x3e   : > { %5902 = vmatpush3.bf16.msra.mxu0 %v5901_v21  ;;  %v876_v31 = vcvt.s32.f32 %v875_v30 }
  0x3f   : > { %5504 = vmatprep.subr.mxu0 %v6297_v11 }
  0x40   : > { %vm877_vm3 = vcmp.eq.f32.partialorder %v876_v31, 0.0  ;;  %v1274_v31 = vld [vmem:[%s7444_s0] sm:$0xff] }
  0x41   : > { %5502 = vmatmul.mubr.msk.f32.vlgmr.msra.gmra.mrb[2].mxu0 %vm883_vm1, %v6547_v18  ;;  %v6582_v32 = vsel %vm877_vm3, -1e+09, %v6297_v11  ;;  %s863_s30 = scalar_lea.vmem %s7447_s24, %s6535_s1  ;;  %s7455_s24 = sld [smem:[#allocation34_spill]] }
  0x42   : > { %5506 = vmatprep.mubr.msk.f32.mxu0 %vm6296_vm0, %v6297_v11 }
 0x10c   : > { %v953_v22 = vpop.f32.mrb[0].mxu0 }
 0x10d   : > { %v957_v23 = vmul.f32 0.35355338, %v953_v22  ;;  %v1031_v24 = vpop.f32.mrb[0].mxu1  ;;  %v5481_v25 = vpop.f32.mrb[1].mxu0 }
 0x10e   : > { %v5492_v26 = vpop.f32.mrb[1].mxu1  ;;  %5505 = vmatpush3.xpose.msk.msra.mxu0 %vm1109_vm2, %v1031_v24  ;;  %v5152_v24 = vld [vmem:[%s7444_s0 + $0x8] sm:$0xff] }
 0x10f   : > { %5903 = vmatprep.subr.bf16.mxu0 %v6295_v3 }
 0x111   : > { %5507 = vmatmul.mubr.msk.f32.vlgmr.msra.gmra.mrb[4].mxu0 %vm1109_vm2, %v957_v23 }
 0x112   : > { %5522 = vmatprep.mubr.msk.f32.mxu0 %vm6296_vm0, %v6297_v11  ;;  %5905 = vmatpush3.bf16.msra.mxu0 %v5904_v44 }
 0x113   : > { %5906 = vmatprep.subr.bf16.mxu0 %v6295_v3 }
 0x114   : > { %v1105_v27 = vpop.f32.mrb[2].mxu0 }
 0x115   : > { %v5503_v28 = vpop.f32.mrb[3].mxu0  ;;  %5510 = vmatpush3.msra.mxu1 %v1105_v27 }
 0x116   : > { %5909 = vmatprep.subr.bf16.mxu1 %v6295_v3  ;;  %5908 = vmatpush3.bf16.msra.mxu0 %v5907_v47 }
 0x117   : > { %5915 = vmatprep.subr.bf16.mxu0 %v6295_v3 }
 0x119   : > { %5523 = vmatmul.mubr.msk.f32.vlgmr.msra.gmra.mrb[6].mxu0 %vm883_vm1, %v6545_v16 }
 0x11a   : > { %5544 = vmatprep.mubr.msk.f32.mxu0 %vm6296_vm0, %v6297_v11  ;;  %5917 = vmatpush3.bf16.msra.mxu0 %v5916_v7 }
 0x11b   : > { %5918 = vmatprep.subr.bf16.mxu0 %v6295_v3 }
 0x11e   : > { %5920 = vmatpush3.bf16.msra.mxu0 %v5919_v9 }
 0x11f   : > { %5557 = vmatprep.subr.mxu0 %v6297_v11 }
 0x121   : > { %5545 = vmatmul.mubr.msk.f32.vlgmr.msra.gmra.mrb[8].mxu0 %vm883_vm1, %v6547_v18 }
 0x122   : > { %5559 = vmatprep.mubr.msk.f32.mxu0 %vm6296_vm0, %v6297_v11  ;;  %5558 = vmatpush3.msra.mxu0 %v5152_v24  ;;  %v5178_v24 = vld [vmem:[%s7437_s23 + $0x70] sm:$0xff] }
 0x123   : > { %5921 = vmatprep.subr.bf16.mxu0 %v6295_v3 }
 0x1e4   : > { %v1182_v33 = vpop.f32.mrb[4].mxu0 }
 0x1e5   : > { %v1183_v34 = vadd.f32 %v1182_v33, %v6582_v32  ;;  %v5508_v35 = vpop.f32.mrb[5].mxu0  ;;  %v5160_v33 = vld [vmem:[%s7438_s8 + $0x40] sm:$0xff] }
 0x1e7   : > { %v1186_v36 = vsel %vm1109_vm2, %v1183_v34, -inf }
 0x1e8   : > { %1187 = vmax.xlane.f32.xlu0 %v1186_v36  ;;  %v5162_v36 = vld [vmem:[%s7438_s8 + $0x50] sm:$0xff] }
 0x1ec   : > { %v1346_v60 = vpop.f32.mrb[6].mxu0 }
 0x1ed   : > { %v5524_v61 = vpop.f32.mrb[7].mxu0  ;;  %v1350_v0 = vmul.f32 0.35355338, %v1346_v60  ;;  %v5934_v60 = vpack.c.bf16 %v5166_v58, %v5165_v57 }
 0x1ee   : > { %v5168_v61 = vld [vmem:[%s7440_s26 + $0x58] sm:$0xff] }
 0x1f4   : > { %v1497_v22 = vpop.f32.mrb[8].mxu0 }
 0x1f5   : > { %v5546_v23 = vpop.f32.mrb[9].mxu0 }
 0x275   : > { %v1188_v37 = vpop.xlane.xlu0 %1187 }
 0x276   : > { %v1189_v38 = vsub.f32 %v1183_v34, %v1188_v37  ;;  %v5161_v34 = vld [vmem:[%s7438_s8 + $0x48] sm:$0xff]  ;;  %v5163_v37 = vld [vmem:[%s7438_s8 + $0x58] sm:$0xff] }
 0x277   : > { %v5928_v35 = vpack.c.bf16 %v5161_v34, %v5160_v33 }
 0x278   : > { %v1190_v39 = vmul.f32 1.442695, %v1189_v38  ;;  %v5931_v38 = vpack.c.bf16 %v5163_v37, %v5162_v36 }
 0x27a   : > { %6117 = vpow2.f32 %v1190_v39  ;;  %v5155_v39 = vld [vmem:[%s7437_s23 + $0x40] sm:$0xff] }
 0x284   : > { %v6118_v40 = vpop.eup %6117 }
 0x285   : > { %v1192_v41 = vsel %vm1109_vm2, %v6118_v40, 0.0 }
 0x286   : > { %1193 = vadd.xlane.f32.xlu0 %v1192_v41 }
 0x313   : > { %v1194_v48 = vpop.xlane.xlu0 %1193 }
 0x314   : > { %6119 = vrcp.f32 %v1194_v48 }
 0x31e   : > { %v6120_v49 = vpop.eup %6119 }
 0x31f   : > { %v1196_v50 = vmul.f32 %v6120_v49, %v1194_v48 }
 0x321   : > { %v1197_v51 = vsub.f32 2.0, %v1196_v50 }
 0x323   : > { %v1198_v54 = vmul.f32 %v6120_v49, %v1197_v51 }
 0x325   : > { %v1199_v56 = vmul.f32 %v6118_v40, %v1198_v54  ;;  %v5156_v40 = vld [vmem:[%s7437_s23 + $0x48] sm:$0xff] }
 0x326   : > { %v5922_v41 = vpack.c.bf16 %v5156_v40, %v5155_v39 }
 0x327   : > { %1200 = vst.msk [vmem:[%s6623_s28] sm:$0xff] %vm1109_vm2, %v1199_v56  ;;  %5512 = vmatmul.mubr.msk.f32.vlgmr.msra.gmra.mrb[2].mxu1 %vm1109_vm2, %v1199_v56 }
 0x328   : > { %5911 = vmatpush3.bf16.msra.mxu1 %v5910_v55  ;;  %5533 = vmatprep.mubr.msk.f32.mxu1 %vm6296_vm0, %v6297_v11 }
 0x329   : > { %5912 = vmatprep.subr.bf16.mxu1 %v6295_v3 }
 0x32c   : > { %5914 = vmatpush3.bf16.msra.mxu1 %v5913_v59  ;;  %v5167_v59 = vld [vmem:[%s7440_s26 + $0x50] sm:$0xff] }
 0x32d   : > { %5547 = vmatprep.subr.mxu1 %v6297_v11 }
 0x32f   : > { %5534 = vmatmul.mubr.msk.f32.vlgmr.msra.gmra.mrb[4].mxu1 %vm883_vm1, %v6547_v18 }
 0x330   : > { %5549 = vmatprep.mubr.msk.f32.mxu1 %vm6296_vm0, %v6297_v11 }
 0x3fa   : > { %v1270_v62 = vpop.f32.mrb[2].mxu1 }
 0x3fb   : > { %v5513_v63 = vpop.f32.mrb[3].mxu1 }
 0x402   : > { %v1422_v1 = vpop.f32.mrb[4].mxu1 }
 0x403   : > { %v5535_v2 = vpop.f32.mrb[5].mxu1  ;;  %5548 = vmatpush3.xpose.msk.msra.mxu1 %vm1109_vm2, %v1422_v1 }
 0x404   : > { %5552 = vmatprep.subr.mxu1 %v6297_v11 }
 0x406   : > { %5550 = vmatmul.mubr.msk.f32.vlgmr.msra.gmra.mrb[6].mxu1 %vm1109_vm2, %v1350_v0 }
 0x407   : > { %5554 = vmatprep.mubr.msk.f32.mxu1 %vm6296_vm0, %v6297_v11  ;;  %5553 = vmatpush3.msra.mxu1 %v1497_v22  ;;  %v5177_v22 = vld [vmem:[%s7437_s23 + $0x68] sm:$0xff] }
 0x408   : > { %5562 = vmatprep.subr.mxu1 %v6297_v11 }
 0x4d9   : > { %v1573_v10 = vpop.f32.mrb[6].mxu1 }
 0x4da   : > { %v1574_v12 = vadd.f32 %v1573_v10, %v6582_v32  ;;  %v5551_v13 = vpop.f32.mrb[7].mxu1 }
 0x4dc   : > { %v1577_v14 = vsel %vm1109_vm2, %v1574_v12, -inf }
 0x4dd   : > { %1578 = vmax.xlane.f32.xlu1 %v1577_v14 }
 0x56a   : > { %v1579_v15 = vpop.xlane.xlu1 %1578 }
 0x56b   : > { %v1580_v17 = vsub.f32 %v1574_v12, %v1579_v15  ;;  %v5174_v12 = vld [vmem:[%s7444_s0 + $0x10] sm:$0xff] }
 0x56d   : > { %v1581_v19 = vmul.f32 1.442695, %v1580_v17 }
 0x56f   : > { %6121 = vpow2.f32 %v1581_v19 }
 0x579   : > { %v6122_v20 = vpop.eup %6121 }
 0x57a   : > { %v1583_v21 = vsel %vm1109_vm2, %v6122_v20, 0.0 }
 0x57b   : > { %1584 = vadd.xlane.f32.xlu1 %v1583_v21  ;;  %v5176_v21 = vld [vmem:[%s7437_s23 + $0x60] sm:$0xff] }
 0x57c   : > { %v5940_v23 = vpack.c.bf16 %v5177_v22, %v5176_v21  ;;  %v2780_v21 = vld [vmem:[%s7446_s11 + $0x8] sm:$0xff] }
 0x608   : > { %v1585_v25 = vpop.xlane.xlu1 %1584 }
 0x609   : > { %6123 = vrcp.f32 %v1585_v25 }
 0x613   : > { %v6124_v26 = vpop.eup %6123 }
 0x614   : > { %v1587_v27 = vmul.f32 %v6124_v26, %v1585_v25  ;;  %v5179_v25 = vld [vmem:[%s7437_s23 + $0x78] sm:$0xff] }
 0x616   : > { %v1588_v28 = vsub.f32 2.0, %v1587_v27  ;;  %v5181_v27 = vld [vmem:[%s7438_s8 + $0x60] sm:$0xff] }
 0x618   : > { %v1589_v29 = vmul.f32 %v6124_v26, %v1588_v28  ;;  %v5943_v26 = vpack.c.bf16 %v5179_v25, %v5178_v24  ;;  %v5182_v28 = vld [vmem:[%s7438_s8 + $0x68] sm:$0xff]  ;;  %v2860_v24 = vld [vmem:[%s7445_s12 + $0x18] sm:$0xff] }
 0x61a   : > { %v1590_v30 = vmul.f32 %v6122_v20, %v1589_v29  ;;  %v5946_v29 = vpack.c.bf16 %v5182_v28, %v5181_v27  ;;  %v2782_v27 = vld [vmem:[%s7446_s11 + $0x18] sm:$0xff] }
 0x61c   : > { %5150 = vst.msk [vmem:[%s6623_s28 + $0x8] sm:$0xff] %vm1109_vm2, %v1590_v30  ;;  %5555 = vmatmul.mubr.msk.f32.vlgmr.msra.gmra.mrb[8].mxu1 %vm1109_vm2, %v1590_v30  ;;  %v5183_v30 = vld [vmem:[%s7438_s8 + $0x70] sm:$0xff] }
 0x61d   : > { %5563 = vmatpush3.msra.mxu1 %v1274_v31  ;;  %5564 = vmatprep.mubr.msk.f32.mxu1 %vm6296_vm0, %v6297_v11  ;;  %v5184_v31 = vld [vmem:[%s7438_s8 + $0x78] sm:$0xff] }
 0x61e   : > { %5927 = vmatprep.subr.bf16.mxu1 %v6295_v3 }
 0x620   : > { %5565 = vmatmul.mubr.msk.f32.vlgmr.msra.gmra.mrb[10].mxu1 %vm1109_vm2, %v1270_v62  ;;  %v5937_v62 = vpack.c.bf16 %v5168_v61, %v5167_v59 }
 0x621   : > { %5929 = vmatpush3.bf16.msra.mxu1 %v5928_v35  ;;  %5586 = vmatprep.mubr.msk.f32.mxu1 %vm6296_vm0, %v6297_v11  ;;  %v5949_v35 = vpack.c.bf16 %v5184_v31, %v5183_v30 }
 0x622   : > { %5930 = vmatprep.subr.bf16.mxu1 %v6295_v3 }
 0x625   : > { %5932 = vmatpush3.bf16.msra.mxu1 %v5931_v38 }
 0x626   : > { %5600 = vmatprep.subr.mxu1 %v6297_v11 }
 0x628   : > { %5587 = vmatmul.mubr.msk.f32.vlgmr.msra.gmra.mrb[12].mxu1 %vm883_vm1, %v6547_v18 }
 0x629   : > { %5602 = vmatprep.mubr.msk.f32.mxu1 %vm6296_vm0, %v6297_v11 }
 0x6ef   : > { %v1662_v44 = vpop.f32.mrb[8].mxu1 }
 0x6f0   : > { %v5556_v45 = vpop.f32.mrb[9].mxu1  ;;  %5560 = vmatmul.mubr.msk.f32.vlgmr.msra.gmra.mrb[10].mxu0 %vm1109_vm2, %v1662_v44  ;;  %v5186_v44 = vld [vmem:[%s7440_s26 + $0x60] sm:$0xff] }
 0x6f1   : > { %5923 = vmatpush3.bf16.msra.mxu0 %v5922_v41  ;;  %5575 = vmatprep.mubr.msk.f32.mxu0 %vm6296_vm0, %v6297_v11  ;;  %v5187_v45 = vld [vmem:[%s7440_s26 + $0x68] sm:$0xff] }
 0x6f2   : > { %5924 = vmatprep.subr.bf16.mxu0 %v6295_v3 }
 0x6f3   : > { %v1810_v47 = vpop.f32.mrb[10].mxu1 }
 0x6f4   : > { %v5566_v48 = vpop.f32.mrb[11].mxu1 }
 0x6f5   : > { %5926 = vmatpush3.bf16.msra.mxu0 %v5925_v46  ;;  %v5188_v46 = vld [vmem:[%s7440_s26 + $0x70] sm:$0xff]  ;;  %v5189_v48 = vld [vmem:[%s7440_s26 + $0x78] sm:$0xff] }
 0x6f6   : > { %5933 = vmatprep.subr.bf16.mxu0 %v6295_v3 }
 0x6f8   : > { %5576 = vmatmul.mubr.msk.f32.vlgmr.msra.gmra.mrb[12].mxu0 %vm883_vm1, %v6545_v16 }
 0x6f9   : > { %5597 = vmatprep.mubr.msk.f32.mxu0 %vm6296_vm0, %v6297_v11  ;;  %5935 = vmatpush3.bf16.msra.mxu0 %v5934_v60 }
 0x6fa   : > { %5936 = vmatprep.subr.bf16.mxu0 %v6295_v3 }
 0x6fb   : > { %v1961_v49 = vpop.f32.mrb[12].mxu1 }
 0x6fc   : > { %v5588_v50 = vpop.f32.mrb[13].mxu1  ;;  %5601 = vmatpush3.xpose.msk.msra.mxu1 %vm1109_vm2, %v1961_v49  ;;  %v5955_v49 = vpack.c.bf16 %v5189_v48, %v5188_v46  ;;  %v5205_v46 = vld [vmem:[%s7446_s11 + $0x20] sm:$0xff] }
 0x6fd   : > { %5605 = vmatprep.subr.mxu1 %v6297_v11  ;;  %5938 = vmatpush3.bf16.msra.mxu0 %v5937_v62 }
 0x6fe   : > { %5610 = vmatprep.subr.mxu0 %v6297_v11 }
 0x700   : > { %5598 = vmatmul.mubr.msk.f32.vlgmr.msra.gmra.mrb[14].mxu0 %vm883_vm1, %v6547_v18 }
 0x701   : > { %5612 = vmatprep.mubr.msk.f32.mxu0 %vm6296_vm0, %v6297_v11  ;;  %5611 = vmatpush3.msra.mxu0 %v5174_v12 }
 0x702   : > { %5945 = vmatprep.subr.bf16.mxu0 %v6295_v3 }
 0x7c3   : > { %v1737_v51 = vpop.f32.mrb[10].mxu0 }
 0x7c4   : > { %v6720_v52 = vadd.f32 %v1810_v47, %v1737_v51  ;;  %v5561_v53 = vpop.f32.mrb[11].mxu0  ;;  %v5952_v47 = vpack.c.bf16 %v5187_v45, %v5186_v44  ;;  %v2937_v44 = vld [vmem:[%s7449_s13 + $0x18] sm:$0xff] }
 0x7cb   : > { %v1885_v54 = vpop.f32.mrb[12].mxu0 }
 0x7cc   : > { %v1889_v55 = vmul.f32 0.35355338, %v1885_v54  ;;  %v5577_v56 = vpop.f32.mrb[13].mxu0 }
 0x7ce   : > { %5603 = vmatmul.mubr.msk.f32.vlgmr.msra.gmra.mrb[14].mxu1 %vm1109_vm2, %v1889_v55 }
 0x7cf   : > { %5607 = vmatprep.mubr.msk.f32.mxu1 %vm6296_vm0, %v6297_v11 }
 0x7d3   : > { %v2036_v9 = vpop.f32.mrb[14].mxu0 }
 0x7d4   : > { %v5599_v10 = vpop.f32.mrb[15].mxu0  ;;  %5606 = vmatpush3.msra.mxu1 %v2036_v9 }
 0x7d5   : > { %5939 = vmatprep.subr.bf16.mxu1 %v6295_v3 }
 0x8a1   : > { %v2112_v63 = vpop.f32.mrb[14].mxu1 }
 0x8a2   : > { %v2113_v0 = vadd.f32 %v2112_v63, %v6582_v32  ;;  %v5604_v1 = vpop.f32.mrb[15].mxu1 }
 0x8a4   : > { %v2116_v2 = vsel %vm1109_vm2, %v2113_v0, -inf }
 0x8a5   : > { %2117 = vmax.xlane.f32.xlu0 %v2116_v2 }
 0x932   : > { %v2118_v4 = vpop.xlane.xlu0 %2117 }
 0x933   : > { %v2119_v5 = vsub.f32 %v2113_v0, %v2118_v4 }
 0x935   : > { %v2120_v6 = vmul.f32 1.442695, %v2119_v5 }
 0x937   : > { %6125 = vpow2.f32 %v2120_v6 }
 0x941   : > { %v6126_v7 = vpop.eup %6125 }
 0x942   : > { %v2122_v8 = vsel %vm1109_vm2, %v6126_v7, 0.0 }
 0x943   : > { %2123 = vadd.xlane.f32.xlu1 %v2122_v8 }
 0x9d0   : > { %v2124_v13 = vpop.xlane.xlu1 %2123 }
 0x9d1   : > { %6127 = vrcp.f32 %v2124_v13 }
 0x9db   : > { %v6128_v14 = vpop.eup %6127 }
 0x9dc   : > { %v2126_v15 = vmul.f32 %v6128_v14, %v2124_v13 }
 0x9de   : > { %v2127_v17 = vsub.f32 2.0, %v2126_v15 }
 0x9e0   : > { %v2128_v19 = vmul.f32 %v6128_v14, %v2127_v17  ;;  %v2857_v17 = vld [vmem:[%s7445_s12] sm:$0xff] }
 0x9e2   : > { %v2129_v20 = vmul.f32 %v6126_v7, %v2128_v19  ;;  %v2858_v19 = vld [vmem:[%s7445_s12 + $0x8] sm:$0xff] }
 0x9e4   : > { %5172 = vst.msk [vmem:[%s6623_s28 + $0x10] sm:$0xff] %vm1109_vm2, %v2129_v20  ;;  %5608 = vmatmul.mubr.msk.f32.vlgmr.msra.gmra.mrb[16].mxu1 %vm1109_vm2, %v2129_v20  ;;  %v2779_v20 = vld [vmem:[%s7446_s11] sm:$0xff] }
 0x9e5   : > { %5623 = vmatprep.mubr.msk.f32.mxu1 %vm6296_vm0, %v6297_v11  ;;  %5941 = vmatpush3.bf16.msra.mxu1 %v5940_v23  ;;  %v5958_v22 = vpack.c.bf16 %v2780_v21, %v2779_v20  ;;  %v2859_v23 = vld [vmem:[%s7445_s12 + $0x10] sm:$0xff] }
 0x9e6   : > { %5942 = vmatprep.subr.bf16.mxu1 %v6295_v3  ;;  %v5967_v25 = vpack.c.bf16 %v2860_v24, %v2859_v23  ;;  %v5215_v23 = vld [vmem:[%s7449_s13 + $0x20] sm:$0xff]  ;;  %v5216_v24 = vld [vmem:[%s7449_s13 + $0x28] sm:$0xff] }
 0x9e9   : > { %5944 = vmatpush3.bf16.msra.mxu1 %v5943_v26  ;;  %v2781_v26 = vld [vmem:[%s7446_s11 + $0x10] sm:$0xff] }
 0x9ea   : > { %5951 = vmatprep.subr.bf16.mxu1 %v6295_v3  ;;  %v5961_v28 = vpack.c.bf16 %v2782_v27, %v2781_v26  ;;  %v5988_v26 = vpack.c.bf16 %v5216_v24, %v5215_v23  ;;  %v5218_v27 = vld [vmem:[%s7449_s13 + $0x38] sm:$0xff] }
 0x9ec   : > { %5624 = vmatmul.mubr.msk.f32.vlgmr.msra.gmra.mrb[18].mxu1 %vm883_vm1, %v6545_v16 }
 0x9ed   : > { %5645 = vmatprep.mubr.msk.f32.mxu1 %vm6296_vm0, %v6297_v11  ;;  %5953 = vmatpush3.bf16.msra.mxu1 %v5952_v47  ;;  %v5206_v47 = vld [vmem:[%s7446_s11 + $0x28] sm:$0xff] }
 0x9ee   : > { %5954 = vmatprep.subr.bf16.mxu1 %v6295_v3  ;;  %v5976_v48 = vpack.c.bf16 %v5206_v47, %v5205_v46 }
 0x9f1   : > { %5956 = vmatpush3.bf16.msra.mxu1 %v5955_v49  ;;  %v5207_v49 = vld [vmem:[%s7446_s11 + $0x30] sm:$0xff] }
 0x9f2   : > { %5658 = vmatprep.subr.mxu1 %v6297_v11 }
 0x9f4   : > { %5646 = vmatmul.mubr.msk.f32.vlgmr.msra.gmra.mrb[20].mxu1 %vm883_vm1, %v6547_v18 }
 0x9f5   : > { %5660 = vmatprep.mubr.msk.f32.mxu1 %vm6296_vm0, %v6297_v11 }
 0xab7   : > { %v2201_v33 = vpop.f32.mrb[16].mxu1 }
 0xab8   : > { %v5609_v34 = vpop.f32.mrb[17].mxu1  ;;  %5613 = vmatmul.mubr.msk.f32.vlgmr.msra.gmra.mrb[16].mxu0 %vm1109_vm2, %v2201_v33 }
 0xab9   : > { %5947 = vmatpush3.bf16.msra.mxu0 %v5946_v29  ;;  %5634 = vmatprep.mubr.msk.f32.mxu0 %vm6296_vm0, %v6297_v11  ;;  %v6868_v29 = vld [vmem:[%s863_s30] sm:$0xff]  ;;  %s7452_s30 = sld [smem:[#allocation12_spill]] }
 0xaba   : > { %5948 = vmatprep.subr.bf16.mxu0 %v6295_v3 }
 0xabd   : > { %5950 = vmatpush3.bf16.msra.mxu0 %v5949_v35  ;;  %v5197_v35 = vld [vmem:[%s7448_s25] ss:$0 sm:$0xff]  ;;  %s4920_s25 = sshll.u32 %s6623_s28, 4  ;;  %s7231_s25 = int_to_ptr.vmem [resolvable:$true] %s4920_s25 }
 0xabe   : > { %5648 = vmatprep.subr.mxu0 %v6297_v11  ;;  %s6155_s8 = scalar_lea.vmem %s7231_s25, 512  ;;  %p6162_p1 = scmp.lt.s32.totalorder %s7231_s25, %s6160_s9 }
 0xabf   : > { %v2352_v36 = vpop.f32.mrb[18].mxu1  ;;  %s7407_s27 = sshll.u32 %s7452_s30, 9  ;;  %p6156_p12 = scmp.ne.s32.totalorder %s7231_s25, %s6155_s8 }
 0xac0   : > { %5635 = vmatmul.mubr.msk.f32.vlgmr.msra.gmra.mrb[18].mxu0 %vm883_vm1, %v6547_v18  ;;  %v5625_v37 = vpop.f32.mrb[19].mxu1  ;;  %v2356_v41 = vmul.f32 0.35355338, %v2352_v36  ;;  %s7228_s29 = scalar_lea.hbm %s7455_s24, %s7407_s27 }
 0xac1   : > { %5650 = vmatprep.mubr.msk.f32.mxu0 %vm6296_vm0, %v6297_v11  ;;  %v2934_v37 = vld [vmem:[%s7449_s13] sm:$0xff]  ;;  %p6157_p13 = pnand %p6156_p12, %p6475_p4 }
 0xac3   : > { %p6158_p0 = pneg %p6157_p13 }
 0xac7   : > { %v2503_v18 = vpop.f32.mrb[20].mxu1 }
 0xac8   : > { %v5647_v59 = vpop.f32.mrb[21].mxu1 }
 0xb8b   : > { %v2276_v38 = vpop.f32.mrb[16].mxu0 }
 0xb8c   : > { %v2280_v39 = vadd.f32 %v2276_v38, %v6720_v52  ;;  %v5614_v40 = vpop.f32.mrb[17].mxu0  ;;  %v2935_v38 = vld [vmem:[%s7449_s13 + $0x8] sm:$0xff] }
 0xb93   : > { %v2428_v42 = vpop.f32.mrb[18].mxu0 }
 0xb94   : > { %v5636_v43 = vpop.f32.mrb[19].mxu0  ;;  %5649 = vmatpush3.xpose.msk.msra.mxu0 %vm1109_vm2, %v2428_v42 }
 0xb95   : > { %5653 = vmatprep.subr.mxu0 %v6297_v11  ;;  %v2936_v43 = vld [vmem:[%s7449_s13 + $0x10] sm:$0xff] }
 0xb96   : > { %v5973_v45 = vpack.c.bf16 %v2937_v44, %v2936_v43 }
 0xb97   : > { %5651 = vmatmul.mubr.msk.f32.vlgmr.msra.gmra.mrb[20].mxu0 %vm1109_vm2, %v2356_v41  ;;  %v5970_v41 = vpack.c.bf16 %v2935_v38, %v2934_v37 }
 0xb98   : > { %5655 = vmatprep.mubr.msk.f32.mxu0 %vm6296_vm0, %v6297_v11  ;;  %5654 = vmatpush3.msra.mxu0 %v2503_v18 }
 0xb99   : > { %5957 = vmatprep.subr.bf16.mxu0 %v6295_v3 }
 0xc6a   : > { %v2579_v50 = vpop.f32.mrb[20].mxu0 }
 0xc6b   : > { %v2580_v51 = vadd.f32 %v2579_v50, %v6582_v32  ;;  %v5652_v52 = vpop.f32.mrb[21].mxu0  ;;  %v5195_v32 = vld [vmem:[%s7444_s0 + $0x18] sm:$0xff]  ;;  %s4887_s0 = scalar_lea.sflag [#allocation6], %s7220_s22 }
 0xc6c   : > { %5659 = vmatpush3.msra.mxu1 %v5195_v32  ;;  %v5208_v50 = vld [vmem:[%s7446_s11 + $0x38] sm:$0xff] }
 0xc6d   : > { %v2583_v53 = vsel %vm1109_vm2, %v2580_v51, -inf  ;;  %5963 = vmatprep.subr.bf16.mxu1 %v6295_v3 }
 0xc6e   : > { %2584 = vmax.xlane.f32.xlu0 %v2583_v53 }
 0xcfb   : > { %v2585_v54 = vpop.xlane.xlu0 %2584 }
 0xcfc   : > { %v2586_v55 = vsub.f32 %v2580_v51, %v2585_v54  ;;  %v5979_v51 = vpack.c.bf16 %v5208_v50, %v5207_v49  ;;  %v3172_v49 = vld [vmem:[%s7374_s14] sm:$0xff] }
 0xcfd   : > { %v5232_v50 = vld [vmem:[%s7445_s12 + $0x40] sm:$0xff] }
 0xcfe   : > { %v2587_v56 = vmul.f32 1.442695, %v2586_v55 }
 0xd00   : > { %6129 = vpow2.f32 %v2587_v56 }
 0xd0a   : > { %v6130_v57 = vpop.eup %6129 }
 0xd0b   : > { %v2589_v58 = vsel %vm1109_vm2, %v6130_v57, 0.0 }
 0xd0c   : > { %2590 = vadd.xlane.f32.xlu1 %v2589_v58 }
 0xd99   : > { %v2591_v60 = vpop.xlane.xlu1 %2590 }
 0xd9a   : > { %6131 = vrcp.f32 %v2591_v60 }
 0xda4   : > { %v6132_v61 = vpop.eup %6131 }
 0xda5   : > { %v2593_v62 = vmul.f32 %v6132_v61, %v2591_v60 }
 0xda7   : > { %v2594_v63 = vsub.f32 2.0, %v2593_v62 }
 0xda9   : > { %v2595_v0 = vmul.f32 %v6132_v61, %v2594_v63 }
 0xdab   : > { %v2596_v1 = vmul.f32 %v6130_v57, %v2595_v0 }
 0xdad   : > { %5193 = vst.msk [vmem:[%s6623_s28 + $0x18] sm:$0xff] %vm1109_vm2, %v2596_v1  ;;  %5656 = vmatmul.mubr.msk.f32.vlgmr.msra.gmra.mrb[22].mxu0 %vm1109_vm2, %v2596_v1 }
 0xdae   : > { %5671 = vmatprep.mubr.msk.f32.mxu0 %vm6296_vm0, %v6297_v11  ;;  %5959 = vmatpush3.bf16.msra.mxu0 %v5958_v22 }
 0xdaf   : > { %5960 = vmatprep.subr.bf16.mxu0 %v6295_v3 }
 0xdb2   : > { %5962 = vmatpush3.bf16.msra.mxu0 %v5961_v28 }
 0xdb3   : > { %5969 = vmatprep.subr.bf16.mxu0 %v6295_v3 }
 0xe80   : > { %v2668_v2 = vpop.f32.mrb[22].mxu0 }
 0xe81   : > { %v5657_v4 = vpop.f32.mrb[23].mxu0  ;;  %5661 = vmatmul.mubr.msk.f32.vlgmr.msra.gmra.mrb[22].mxu1 %vm1109_vm2, %v2668_v2 }
 0xe82   : > { %5682 = vmatprep.mubr.msk.f32.mxu1 %vm6296_vm0, %v6297_v11 }
 0xf54   : > { %v2743_v5 = vpop.f32.mrb[22].mxu1 }
 0xf55   : > { %v2747_v6 = vadd.f32 %v2743_v5, %v2280_v39  ;;  %v5662_v7 = vpop.f32.mrb[23].mxu1  ;;  %v5198_v39 = vld [vmem:[%s7450_s10] ss:$0 sm:$0xff]  ;;  %s6161_s10 = scalar_lea.vmem %s6160_s9, 1024 }
 0xf56   : > { %p6163_p2 = scmp.lt.s32.totalorder %s6161_s10, %s6155_s8 }
 0xf57   : > { %v2748_v8 = vadd.f32 %v2747_v6, %v6545_v16  ;;  %v5964_v16 = vpack.c.bf16 %v2858_v19, %v2857_v17 }
 0xf58   : > { %p6164_p3 = por %p6163_p2, %p6162_p1 }
 0xf59   : > { %v2751_v9 = vsel %vm883_vm1, %v2748_v8, 0.0  ;;  %5965 = vmatpush3.bf16.msra.mxu1 %v5964_v16 }
 0xf5a   : > { %2752 = vadd.xlane.f32.xlu0 %v2751_v9  ;;  %5966 = vmatprep.subr.bf16.mxu1 %v6295_v3  ;;  %v5211_v9 = vld [vmem:[%s7445_s12 + $0x28] sm:$0xff]  ;;  %p6165_p5 = pnand %p6164_p3, %p6158_p0 }
 0xf5d   : > { %5968 = vmatpush3.bf16.msra.mxu1 %v5967_v25  ;;  %v5217_v25 = vld [vmem:[%s7449_s13 + $0x30] sm:$0xff] }
 0xf5e   : > { %5696 = vmatprep.subr.mxu1 %v6297_v11  ;;  %v5991_v28 = vpack.c.bf16 %v5218_v27, %v5217_v25  ;;  %v5246_v27 = vld [vmem:[%s7374_s14 + $0x10] sm:$0xff] }
 0xf60   : > { %5683 = vmatmul.mubr.msk.f32.vlgmr.msra.gmra.mrb[24].mxu1 %vm883_vm1, %v6868_v29 }
 0xf61   : > { %5698 = vmatprep.mubr.msk.f32.mxu1 %vm6296_vm0, %v6297_v11 }
 0xfe7   : > { %v2753_v10 = vpop.xlane.xlu0 %2752 }
 0xfe8   : > { %v2755_v12 = vmul.f32 0.03125, %v2753_v10 }
 0xfea   : > { %v2756_v13 = vsub.f32 %v2748_v8, %v2755_v12  ;;  %v5210_v8 = vld [vmem:[%s7445_s12 + $0x20] sm:$0xff] }
 0xfeb   : > { %v5982_v12 = vpack.c.bf16 %v5211_v9, %v5210_v8  ;;  %v5237_v9 = vld [vmem:[%s7449_s13 + $0x40] sm:$0xff] }
 0xfec   : > { %v2757_v14 = vmul.f32 %v2756_v13, %v2756_v13 }
 0xfee   : > { %v2758_v15 = vsel %vm883_vm1, %v2757_v14, 0.0  ;;  %v5212_v14 = vld [vmem:[%s7445_s12 + $0x30] sm:$0xff] }
 0xfef   : > { %2759 = vadd.xlane.f32.xlu1 %v2758_v15  ;;  %v5213_v15 = vld [vmem:[%s7445_s12 + $0x38] sm:$0xff] }
 0xff0   : > { %v5985_v17 = vpack.c.bf16 %v5213_v15, %v5212_v14  ;;  %v5240_v14 = vld [vmem:[%s7449_s13 + $0x58] sm:$0xff] }
0x1033   : > { %v2930_v52 = vpop.f32.mrb[24].mxu1 }
0x1034   : > { %v5684_v53 = vpop.f32.mrb[25].mxu1  ;;  %5697 = vmatpush3.xpose.msk.msra.mxu1 %vm1109_vm2, %v2930_v52 }
0x1035   : > { %5701 = vmatprep.subr.mxu1 %v6297_v11  ;;  %v5234_v53 = vld [vmem:[%s7445_s12 + $0x50] sm:$0xff] }
0x107c   : > { %v2760_v30 = vpop.xlane.xlu1 %2759 }
0x107d   : > { %v2761_v31 = vmul.f32 0.03125, %v2760_v30 }
0x107f   : > { %v2762_v33 = vadd.f32 1e-06, %v2761_v31 }
0x1081   : > { %6133 = vrsqrt.f32 %v2762_v33 }
0x108b   : > { %v6134_v34 = vpop.eup %6133 }
0x108c   : > { %v2764_v36 = vmul.f32 %v6134_v34, %v2756_v13 }
0x108e   : > { %v2771_v40 = vmul.f32 %v5197_v35, %v2764_v36 }
0x1090   : > { %v6888_v42 = vadd.f32 %v5198_v39, %v2771_v40 }
0x1092   : > { %5672 = vmatmul.mubr.msk.f32.vlgmr.msra.gmra.mrb[24].mxu0 %vm883_vm1, %v6888_v42 }
0x1093   : > { %5971 = vmatpush3.bf16.msra.mxu0 %v5970_v41  ;;  %5693 = vmatprep.mubr.msk.f32.mxu0 %vm6296_vm0, %v6297_v11  ;;  %v5224_v41 = vld [vmem:[%s7374_s14 + $0x8] sm:$0xff] }
0x1094   : > { %5972 = vmatprep.subr.bf16.mxu0 %v6295_v3 }
0x1097   : > { %5974 = vmatpush3.bf16.msra.mxu0 %v5973_v45 }
0x1098   : > { %5975 = vmatprep.subr.bf16.mxu0 %v6295_v3 }
0x109a   : > { %5694 = vmatmul.mubr.msk.f32.vlgmr.msra.gmra.mrb[26].mxu0 %vm883_vm1, %v6868_v29 }
0x109b   : > { %5977 = vmatpush3.bf16.msra.mxu0 %v5976_v48  ;;  %5714 = vmatprep.mubr.msk.f32.mxu0 %vm6296_vm0, %v6297_v11 }
0x109c   : > { %5978 = vmatprep.subr.bf16.mxu0 %v6295_v3 }
0x109f   : > { %5980 = vmatpush3.bf16.msra.mxu0 %v5979_v51  ;;  %v5233_v51 = vld [vmem:[%s7445_s12 + $0x48] sm:$0xff] }
0x10a0   : > { %5987 = vmatprep.subr.bf16.mxu0 %v6295_v3  ;;  %v6000_v52 = vpack.c.bf16 %v5233_v51, %v5232_v50 }
0x10a2   : > { %5715 = vmatmul.mubr.msk.f32.vlgmr.msra.gmra.mrb[28].mxu0 %vm883_vm1, %v6888_v42 }
0x10a3   : > { %5736 = vmatprep.mubr.msk.f32.mxu0 %vm6296_vm0, %v6297_v11  ;;  %5989 = vmatpush3.bf16.msra.mxu0 %v5988_v26 }
0x10a4   : > { %5990 = vmatprep.subr.bf16.mxu0 %v6295_v3 }
0x10a7   : > { %5992 = vmatpush3.bf16.msra.mxu0 %v5991_v28 }
0x10a8   : > { %5749 = vmatprep.subr.mxu0 %v6297_v11 }
0x10aa   : > { %5737 = vmatmul.mubr.msk.f32.vlgmr.msra.gmra.mrb[30].mxu0 %vm883_vm1, %v6868_v29 }
0x10ab   : > { %5751 = vmatprep.mubr.msk.f32.mxu0 %vm6296_vm0, %v6297_v11  ;;  %5750 = vmatpush3.msra.mxu0 %v5224_v41 }
0x10ac   : > { %5993 = vmatprep.subr.bf16.mxu0 %v6295_v3 }
0x1165   : > { %v2852_v54 = vpop.f32.mrb[24].mxu0 }
0x1166   : > { %v2856_v55 = vmul.f32 0.35355338, %v2852_v54  ;;  %v5673_v56 = vpop.f32.mrb[25].mxu0  ;;  %v5235_v54 = vld [vmem:[%s7445_s12 + $0x58] sm:$0xff] }
0x1167   : > { %v5227_v56 = vld [vmem:[%s7446_s11 + $0x40] sm:$0xff] }
0x1168   : > { %5699 = vmatmul.mubr.msk.f32.vlgmr.msra.gmra.mrb[26].mxu1 %vm1109_vm2, %v2856_v55  ;;  %v6003_v55 = vpack.c.bf16 %v5235_v54, %v5234_v53 }
0x1169   : > { %5703 = vmatprep.mubr.msk.f32.mxu1 %vm6296_vm0, %v6297_v11 }
0x116d   : > { %v3004_v57 = vpop.f32.mrb[26].mxu0 }
0x116e   : > { %v5695_v58 = vpop.f32.mrb[27].mxu0  ;;  %5702 = vmatpush3.msra.mxu1 %v3004_v57  ;;  %v5228_v57 = vld [vmem:[%s7446_s11 + $0x48] sm:$0xff] }
0x116f   : > { %5981 = vmatprep.subr.bf16.mxu1 %v6295_v3  ;;  %v5994_v58 = vpack.c.bf16 %v5228_v57, %v5227_v56 }
0x1175   : > { %v3244_v18 = vpop.f32.mrb[28].mxu0 }
0x1176   : > { %v5716_v59 = vpop.f32.mrb[29].mxu0  ;;  %v3248_v22 = vmul.f32 0.35355338, %v3244_v18  ;;  %v5229_v18 = vld [vmem:[%s7446_s11 + $0x50] sm:$0xff] }
0x1177   : > { %v5230_v59 = vld [vmem:[%s7446_s11 + $0x58] sm:$0xff] }
0x117d   : > { %v3395_v39 = vpop.f32.mrb[30].mxu0 }
0x117e   : > { %v5738_v40 = vpop.f32.mrb[31].mxu0 }
0x117f   : > { %v5251_v40 = vld [vmem:[%s7446_s11 + $0x78] sm:$0xff] }
0x123b   : > { %v3080_v32 = vpop.f32.mrb[26].mxu1 }
0x123c   : > { %v5700_v60 = vpop.f32.mrb[27].mxu1  ;;  %v3084_v61 = vsel %vm1109_vm2, %v3080_v32, -inf }
0x123d   : > { %3085 = vmax.xlane.f32.xlu0 %v3084_v61  ;;  %v5997_v61 = vpack.c.bf16 %v5230_v59, %v5229_v18  ;;  %v5258_v18 = vld [vmem:[%s7449_s13 + $0x60] sm:$0xff]  ;;  %v5259_v59 = vld [vmem:[%s7449_s13 + $0x68] sm:$0xff] }
0x12ca   : > { %v3086_v62 = vpop.xlane.xlu0 %3085 }
0x12cb   : > { %v3087_v63 = vsub.f32 %v3080_v32, %v3086_v62 }
0x12cd   : > { %v3088_v0 = vmul.f32 1.442695, %v3087_v63 }
0x12cf   : > { %6135 = vpow2.f32 %v3088_v0 }
0x12d9   : > { %v6136_v1 = vpop.eup %6135 }
0x12da   : > { %v3090_v2 = vsel %vm1109_vm2, %v6136_v1, 0.0 }
0x12db   : > { %3091 = vadd.xlane.f32.xlu1 %v3090_v2 }
0x1368   : > { %v3092_v4 = vpop.xlane.xlu1 %3091 }
0x1369   : > { %6137 = vrcp.f32 %v3092_v4 }
0x1373   : > { %v6138_v5 = vpop.eup %6137 }
0x1374   : > { %v3094_v6 = vmul.f32 %v6138_v5, %v3092_v4 }
0x1376   : > { %v3095_v7 = vsub.f32 2.0, %v3094_v6 }
0x1378   : > { %v3096_v10 = vmul.f32 %v6138_v5, %v3095_v7 }
0x137a   : > { %v3097_v13 = vmul.f32 %v6136_v1, %v3096_v10  ;;  %v5238_v10 = vld [vmem:[%s7449_s13 + $0x48] sm:$0xff] }
0x137c   : > { %3098 = vst.msk [vmem:[%s6946_s7] sm:$0xff] %vm1109_vm2, %v3097_v13  ;;  %5704 = vmatmul.mubr.msk.f32.vlgmr.msra.gmra.mrb[28].mxu1 %vm1109_vm2, %v3097_v13  ;;  %v6006_v13 = vpack.c.bf16 %v5238_v10, %v5237_v9 }
0x137d   : > { %5983 = vmatpush3.bf16.msra.mxu1 %v5982_v12  ;;  %5725 = vmatprep.mubr.msk.f32.mxu1 %vm6296_vm0, %v6297_v11  ;;  %v5239_v12 = vld [vmem:[%s7449_s13 + $0x50] sm:$0xff] }
0x137e   : > { %5984 = vmatprep.subr.bf16.mxu1 %v6295_v3  ;;  %v6009_v15 = vpack.c.bf16 %v5240_v14, %v5239_v12 }
0x1381   : > { %5986 = vmatpush3.bf16.msra.mxu1 %v5985_v17 }
0x1382   : > { %5739 = vmatprep.subr.mxu1 %v6297_v11 }
0x1384   : > { %5726 = vmatmul.mubr.msk.f32.vlgmr.msra.gmra.mrb[30].mxu1 %vm883_vm1, %v6868_v29 }
0x1385   : > { %5741 = vmatprep.mubr.msk.f32.mxu1 %vm6296_vm0, %v6297_v11 }
0x144f   : > { %v3168_v19 = vpop.f32.mrb[28].mxu1 }
0x1450   : > { %v5705_v16 = vpop.f32.mrb[29].mxu1 }
0x1457   : > { %v3320_v20 = vpop.f32.mrb[30].mxu1 }
0x1458   : > { %v5727_v21 = vpop.f32.mrb[31].mxu1  ;;  %5740 = vmatpush3.xpose.msk.msra.mxu1 %vm1109_vm2, %v3320_v20 }
0x1459   : > { %5744 = vmatprep.subr.mxu1 %v6297_v11 }
0x145b   : > { %5742 = vmatmul.mubr.msk.f32.vlgmr.msra.gmra.mrb[32].mxu1 %vm1109_vm2, %v3248_v22 }
0x145c   : > { %5746 = vmatprep.mubr.msk.f32.mxu1 %vm6296_vm0, %v6297_v11  ;;  %5745 = vmatpush3.msra.mxu1 %v3395_v39  ;;  %v5250_v39 = vld [vmem:[%s7446_s11 + $0x70] sm:$0xff] }
0x145d   : > { %5754 = vmatprep.subr.mxu1 %v6297_v11  ;;  %v6015_v41 = vpack.c.bf16 %v5251_v40, %v5250_v39  ;;  %v4764_v40 = vld [vmem:[%s7379_s19 + $0x18] sm:$0xff] }
0x152e   : > { %v3471_v30 = vpop.f32.mrb[32].mxu1 }
0x152f   : > { %v5743_v31 = vpop.f32.mrb[33].mxu1  ;;  %v3475_v33 = vsel %vm1109_vm2, %v3471_v30, -inf }
0x1530   : > { %3476 = vmax.xlane.f32.xlu0 %v3475_v33 }
0x15bd   : > { %v3477_v34 = vpop.xlane.xlu0 %3476 }
0x15be   : > { %v3478_v35 = vsub.f32 %v3471_v30, %v3477_v34  ;;  %v5248_v34 = vld [vmem:[%s7446_s11 + $0x60] sm:$0xff] }
0x15c0   : > { %v3479_v36 = vmul.f32 1.442695, %v3478_v35  ;;  %v5249_v35 = vld [vmem:[%s7446_s11 + $0x68] sm:$0xff] }
0x15c2   : > { %6139 = vpow2.f32 %v3479_v36 }
0x15cc   : > { %v6140_v37 = vpop.eup %6139 }
0x15cd   : > { %v3481_v38 = vsel %vm1109_vm2, %v6140_v37, 0.0 }
0x15ce   : > { %3482 = vadd.xlane.f32.xlu1 %v3481_v38 }
0x165b   : > { %v3483_v43 = vpop.xlane.xlu1 %3482 }
0x165c   : > { %6141 = vrcp.f32 %v3483_v43 }
0x1666   : > { %v6142_v44 = vpop.eup %6141 }
0x1667   : > { %v3485_v45 = vmul.f32 %v6142_v44, %v3483_v43  ;;  %v5253_v43 = vld [vmem:[%s7445_s12 + $0x60] sm:$0xff] }
0x1669   : > { %v3486_v46 = vsub.f32 2.0, %v3485_v45 }
0x166b   : > { %v3487_v47 = vmul.f32 %v6142_v44, %v3486_v46  ;;  %v5254_v44 = vld [vmem:[%s7445_s12 + $0x68] sm:$0xff]  ;;  %v5255_v46 = vld [vmem:[%s7445_s12 + $0x70] sm:$0xff] }
0x166c   : > { %v6018_v45 = vpack.c.bf16 %v5254_v44, %v5253_v43  ;;  %v4765_v43 = vld [vmem:[%s7379_s19 + $0x20] sm:$0xff]  ;;  %v4766_v44 = vld [vmem:[%s7379_s19 + $0x28] sm:$0xff] }
0x166d   : > { %v3488_v48 = vmul.f32 %v6140_v37, %v3487_v47  ;;  %v6012_v37 = vpack.c.bf16 %v5249_v35, %v5248_v34  ;;  %v5256_v47 = vld [vmem:[%s7445_s12 + $0x78] sm:$0xff] }
0x166e   : > { %v6021_v50 = vpack.c.bf16 %v5256_v47, %v5255_v46  ;;  %v4679_v34 = vld [vmem:[%s7377_s17 + $0x18] sm:$0xff] }
0x166f   : > { %5222 = vst.msk [vmem:[%s6946_s7 + $0x8] sm:$0xff] %vm1109_vm2, %v3488_v48  ;;  %5747 = vmatmul.mubr.msk.f32.vlgmr.msra.gmra.mrb[34].mxu1 %vm1109_vm2, %v3488_v48 }
0x1670   : > { %5755 = vmatpush3.msra.mxu1 %v3172_v49  ;;  %5756 = vmatprep.mubr.msk.f32.mxu1 %vm6296_vm0, %v6297_v11 }
0x1671   : > { %5999 = vmatprep.subr.bf16.mxu1 %v6295_v3 }
0x1673   : > { %5757 = vmatmul.mubr.msk.f32.vlgmr.msra.gmra.mrb[36].mxu1 %vm1109_vm2, %v3168_v19 }
0x1674   : > { %6001 = vmatpush3.bf16.msra.mxu1 %v6000_v52  ;;  %5778 = vmatprep.mubr.msk.f32.mxu1 %vm6296_vm0, %v6297_v11 }
0x1675   : > { %6002 = vmatprep.subr.bf16.mxu1 %v6295_v3 }
0x1678   : > { %6004 = vmatpush3.bf16.msra.mxu1 %v6003_v55 }
0x1679   : > { %5792 = vmatprep.subr.mxu1 %v6297_v11 }
0x167b   : > { %5779 = vmatmul.mubr.msk.f32.vlgmr.msra.gmra.mrb[38].mxu1 %vm883_vm1, %v6868_v29 }
0x167c   : > { %5794 = vmatprep.mubr.msk.f32.mxu1 %vm6296_vm0, %v6297_v11 }
0x1742   : > { %v3560_v32 = vpop.f32.mrb[34].mxu1 }
0x1743   : > { %v5748_v60 = vpop.f32.mrb[35].mxu1  ;;  %5752 = vmatmul.mubr.msk.f32.vlgmr.msra.gmra.mrb[32].mxu0 %vm1109_vm2, %v3560_v32  ;;  %v5260_v32 = vld [vmem:[%s7449_s13 + $0x70] sm:$0xff] }
0x1744   : > { %5995 = vmatpush3.bf16.msra.mxu0 %v5994_v58  ;;  %5767 = vmatprep.mubr.msk.f32.mxu0 %vm6296_vm0, %v6297_v11  ;;  %v6024_v60 = vpack.c.bf16 %v5259_v59, %v5258_v18 }
0x1745   : > { %5996 = vmatprep.subr.bf16.mxu0 %v6295_v3 }
0x1746   : > { %v3708_v62 = vpop.f32.mrb[36].mxu1 }
0x1747   : > { %v5758_v63 = vpop.f32.mrb[37].mxu1 }
0x1748   : > { %5998 = vmatpush3.bf16.msra.mxu0 %v5997_v61  ;;  %v5261_v61 = vld [vmem:[%s7449_s13 + $0x78] sm:$0xff] }
0x1749   : > { %6005 = vmatprep.subr.bf16.mxu0 %v6295_v3 }
0x174b   : > { %5768 = vmatmul.mubr.msk.f32.vlgmr.msra.gmra.mrb[34].mxu0 %vm883_vm1, %v6888_v42 }
0x174c   : > { %5789 = vmatprep.mubr.msk.f32.mxu0 %vm6296_vm0, %v6297_v11  ;;  %6007 = vmatpush3.bf16.msra.mxu0 %v6006_v13 }
0x174d   : > { %6008 = vmatprep.subr.bf16.mxu0 %v6295_v3 }
0x174e   : > { %v3859_v0 = vpop.f32.mrb[38].mxu1 }
0x174f   : > { %v5780_v1 = vpop.f32.mrb[39].mxu1  ;;  %5793 = vmatpush3.xpose.msk.msra.mxu1 %vm1109_vm2, %v3859_v0 }
0x1750   : > { %5797 = vmatprep.subr.mxu1 %v6297_v11  ;;  %6010 = vmatpush3.bf16.msra.mxu0 %v6009_v15 }
0x1751   : > { %5802 = vmatprep.subr.mxu0 %v6297_v11 }
0x1753   : > { %5790 = vmatmul.mubr.msk.f32.vlgmr.msra.gmra.mrb[36].mxu0 %vm883_vm1, %v6868_v29 }
0x1754   : > { %5804 = vmatprep.mubr.msk.f32.mxu0 %vm6296_vm0, %v6297_v11  ;;  %5803 = vmatpush3.msra.mxu0 %v5246_v27 }
0x1755   : > { %6017 = vmatprep.subr.bf16.mxu0 %v6295_v3 }
0x1816   : > { %v3635_v2 = vpop.f32.mrb[32].mxu0 }
0x1817   : > { %v7042_v4 = vadd.f32 %v3708_v62, %v3635_v2  ;;  %v5753_v5 = vpop.f32.mrb[33].mxu0  ;;  %v6027_v62 = vpack.c.bf16 %v5261_v61, %v5260_v32 }
0x181e   : > { %v3783_v6 = vpop.f32.mrb[34].mxu0 }
0x181f   : > { %v3787_v7 = vmul.f32 0.35355338, %v3783_v6  ;;  %v5769_v8 = vpop.f32.mrb[35].mxu0 }
0x1821   : > { %5795 = vmatmul.mubr.msk.f32.vlgmr.msra.gmra.mrb[40].mxu1 %vm1109_vm2, %v3787_v7 }
0x1822   : > { %5799 = vmatprep.mubr.msk.f32.mxu1 %vm6296_vm0, %v6297_v11 }
0x1826   : > { %v3934_v25 = vpop.f32.mrb[36].mxu0 }
0x1827   : > { %v5791_v26 = vpop.f32.mrb[37].mxu0  ;;  %5798 = vmatpush3.msra.mxu1 %v3934_v25 }
0x1828   : > { %6011 = vmatprep.subr.bf16.mxu1 %v6295_v3 }
0x18f4   : > { %v4010_v17 = vpop.f32.mrb[40].mxu1 }
0x18f5   : > { %v5796_v19 = vpop.f32.mrb[41].mxu1  ;;  %v4014_v16 = vsel %vm1109_vm2, %v4010_v17, -inf }
0x18f6   : > { %4015 = vmax.xlane.f32.xlu0 %v4014_v16 }
0x1983   : > { %v4016_v20 = vpop.xlane.xlu0 %4015 }
0x1984   : > { %v4017_v21 = vsub.f32 %v4010_v17, %v4016_v20 }
0x1986   : > { %v4018_v22 = vmul.f32 1.442695, %v4017_v21 }
0x1988   : > { %6143 = vpow2.f32 %v4018_v22 }
0x1992   : > { %v6144_v23 = vpop.eup %6143 }
0x1993   : > { %v4020_v24 = vsel %vm1109_vm2, %v6144_v23, 0.0 }
0x1994   : > { %4021 = vadd.xlane.f32.xlu1 %v4020_v24 }
0x1a21   : > { %v4022_v28 = vpop.xlane.xlu1 %4021 }
0x1a22   : > { %6145 = vrcp.f32 %v4022_v28 }
0x1a2c   : > { %v6146_v30 = vpop.eup %6145 }
0x1a2d   : > { %v4024_v31 = vmul.f32 %v6146_v30, %v4022_v28 }
0x1a2f   : > { %v4025_v33 = vsub.f32 2.0, %v4024_v31  ;;  %v4676_v31 = vld [vmem:[%s7377_s17] sm:$0xff] }
0x1a31   : > { %v4026_v36 = vmul.f32 %v6146_v30, %v4025_v33 }
0x1a33   : > { %v4027_v38 = vmul.f32 %v6144_v23, %v4026_v36  ;;  %v4761_v36 = vld [vmem:[%s7379_s19] sm:$0xff] }
0x1a35   : > { %5244 = vst.msk [vmem:[%s6946_s7 + $0x10] sm:$0xff] %vm1109_vm2, %v4027_v38  ;;  %5800 = vmatmul.mubr.msk.f32.vlgmr.msra.gmra.mrb[42].mxu1 %vm1109_vm2, %v4027_v38  ;;  %v4763_v38 = vld [vmem:[%s7379_s19 + $0x10] sm:$0xff] }
0x1a36   : > { %6013 = vmatpush3.bf16.msra.mxu1 %v6012_v37  ;;  %5815 = vmatprep.mubr.msk.f32.mxu1 %vm6296_vm0, %v6297_v11  ;;  %v4762_v37 = vld [vmem:[%s7379_s19 + $0x8] sm:$0xff] }
0x1a37   : > { %6014 = vmatprep.subr.bf16.mxu1 %v6295_v3  ;;  %v6036_v39 = vpack.c.bf16 %v4762_v37, %v4761_v36 }
0x1a3a   : > { %6016 = vmatpush3.bf16.msra.mxu1 %v6015_v41  ;;  %v6039_v41 = vpack.c.bf16 %v4764_v40, %v4763_v38 }
0x1a3b   : > { %6023 = vmatprep.subr.bf16.mxu1 %v6295_v3 }
0x1a3d   : > { %5816 = vmatmul.mubr.msk.f32.vlgmr.msra.gmra.mrb[44].mxu1 %vm883_vm1, %v6888_v42 }
0x1a3e   : > { %5837 = vmatprep.mubr.msk.f32.mxu1 %vm6296_vm0, %v6297_v11  ;;  %6025 = vmatpush3.bf16.msra.mxu1 %v6024_v60  ;;  %v5273_v60 = vld [vmem:[%s7380_s20] ss:$0 sm:$0xff] }
0x1a3f   : > { %6026 = vmatprep.subr.bf16.mxu1 %v6295_v3 }
0x1a42   : > { %6028 = vmatpush3.bf16.msra.mxu1 %v6027_v62 }
0x1a43   : > { %5850 = vmatprep.subr.mxu1 %v6297_v11 }
0x1a45   : > { %5838 = vmatmul.mubr.msk.f32.vlgmr.msra.gmra.mrb[46].mxu1 %vm883_vm1, %v6868_v29 }
0x1a46   : > { %5852 = vmatprep.mubr.msk.f32.mxu1 %vm6296_vm0, %v6297_v11 }
0x1b08   : > { %v4099_v48 = vpop.f32.mrb[42].mxu1 }
0x1b09   : > { %v5801_v49 = vpop.f32.mrb[43].mxu1  ;;  %5805 = vmatmul.mubr.msk.f32.vlgmr.msra.gmra.mrb[38].mxu0 %vm1109_vm2, %v4099_v48 }
0x1b0a   : > { %6019 = vmatpush3.bf16.msra.mxu0 %v6018_v45  ;;  %5826 = vmatprep.mubr.msk.f32.mxu0 %vm6296_vm0, %v6297_v11  ;;  %v6042_v45 = vpack.c.bf16 %v4766_v44, %v4765_v43 }
0x1b0b   : > { %6020 = vmatprep.subr.bf16.mxu0 %v6295_v3 }
0x1b0e   : > { %6022 = vmatpush3.bf16.msra.mxu0 %v6021_v50  ;;  %v5269_v50 = vld [vmem:[%s7375_s15] ss:$0 sm:$0xff] }
0x1b0f   : > { %5840 = vmatprep.subr.mxu0 %v6297_v11 }
0x1b10   : > { %v4250_v51 = vpop.f32.mrb[44].mxu1 }
0x1b11   : > { %v5817_v52 = vpop.f32.mrb[45].mxu1  ;;  %5827 = vmatmul.mubr.msk.f32.vlgmr.msra.gmra.mrb[40].mxu0 %vm883_vm1, %v6868_v29  ;;  %v4254_v58 = vmul.f32 0.35355338, %v4250_v51  ;;  %v5267_v29 = vld [vmem:[%s7374_s14 + $0x18] sm:$0xff] }
0x1b12   : > { %5842 = vmatprep.mubr.msk.f32.mxu0 %vm6296_vm0, %v6297_v11  ;;  %5851 = vmatpush3.msra.mxu1 %v5267_v29  ;;  %v5270_v52 = vld [vmem:[%s7376_s16] ss:$0 sm:$0xff] }
0x1b13   : > { %6035 = vmatprep.subr.bf16.mxu1 %v6295_v3 }
0x1b18   : > { %v4401_v8 = vpop.f32.mrb[46].mxu1 }
0x1b19   : > { %v5839_v9 = vpop.f32.mrb[47].mxu1 }
0x1bdc   : > { %v4174_v53 = vpop.f32.mrb[38].mxu0 }
0x1bdd   : > { %v4178_v54 = vadd.f32 %v4174_v53, %v7042_v4  ;;  %v5806_v55 = vpop.f32.mrb[39].mxu0 }
0x1bde   : > { %v4768_v55 = vld [vmem:[%s7379_s19 + $0x38] sm:$0xff] }
0x1be4   : > { %v4326_v56 = vpop.f32.mrb[40].mxu0 }
0x1be5   : > { %v5828_v57 = vpop.f32.mrb[41].mxu0  ;;  %5841 = vmatpush3.xpose.msk.msra.mxu0 %vm1109_vm2, %v4326_v56 }
0x1be6   : > { %5845 = vmatprep.subr.mxu0 %v6297_v11  ;;  %v5271_v57 = vld [vmem:[%s7378_s18] ss:$0 sm:$0xff] }
0x1be8   : > { %5843 = vmatmul.mubr.msk.f32.vlgmr.msra.gmra.mrb[42].mxu0 %vm1109_vm2, %v4254_v58 }
0x1be9   : > { %5847 = vmatprep.mubr.msk.f32.mxu0 %vm6296_vm0, %v6297_v11  ;;  %5846 = vmatpush3.msra.mxu0 %v4401_v8 }
0x1bea   : > { %6029 = vmatprep.subr.bf16.mxu0 %v6295_v3 }
0x1cbb   : > { %v4477_v63 = vpop.f32.mrb[42].mxu0 }
0x1cbc   : > { %v5844_v0 = vpop.f32.mrb[43].mxu0  ;;  %v4481_v1 = vsel %vm1109_vm2, %v4477_v63, -inf }
0x1cbd   : > { %4482 = vmax.xlane.f32.xlu0 %v4481_v1 }
0x1d4a   : > { %v4483_v2 = vpop.xlane.xlu0 %4482 }
0x1d4b   : > { %v4484_v4 = vsub.f32 %v4477_v63, %v4483_v2 }
0x1d4d   : > { %v4485_v5 = vmul.f32 1.442695, %v4484_v4 }
0x1d4f   : > { %6147 = vpow2.f32 %v4485_v5 }
0x1d59   : > { %v6148_v6 = vpop.eup %6147 }
0x1d5a   : > { %v4487_v7 = vsel %vm1109_vm2, %v6148_v6, 0.0 }
0x1d5b   : > { %4488 = vadd.xlane.f32.xlu1 %v4487_v7 }
0x1de8   : > { %v4489_v10 = vpop.xlane.xlu1 %4488 }
0x1de9   : > { %6149 = vrcp.f32 %v4489_v10 }
0x1df3   : > { %v6150_v12 = vpop.eup %6149 }
0x1df4   : > { %v4491_v13 = vmul.f32 %v6150_v12, %v4489_v10 }
0x1df6   : > { %v4492_v14 = vsub.f32 2.0, %v4491_v13 }
0x1df8   : > { %v4493_v15 = vmul.f32 %v6150_v12, %v4492_v14 }
0x1dfa   : > { %v4494_v17 = vmul.f32 %v6148_v6, %v4493_v15 }
0x1dfc   : > { %5265 = vst.msk [vmem:[%s6946_s7 + $0x18] sm:$0xff] %vm1109_vm2, %v4494_v17  ;;  %5848 = vmatmul.mubr.msk.f32.vlgmr.msra.gmra.mrb[44].mxu0 %vm1109_vm2, %v4494_v17 }
0x1dfd   : > { %5863 = vmatprep.mubr.msk.f32.mxu0 %vm6296_vm0, %v6297_v11 }
0x1ecf   : > { %v4566_v19 = vpop.f32.mrb[44].mxu0 }
0x1ed0   : > { %v5849_v16 = vpop.f32.mrb[45].mxu0  ;;  %5853 = vmatmul.mubr.msk.f32.vlgmr.msra.gmra.mrb[48].mxu1 %vm1109_vm2, %v4566_v19 }
0x1ed1   : > { %5882 = vmatprep.mubr.msk.f32.mxu1 %vm6296_vm0, %v6297_v11  ;;  %v4677_v11 = vld [vmem:[%s7377_s17 + $0x8] sm:$0xff]  ;;  %6037 = vmatpush3.bf16.msra.mxu1 %v6036_v39 }
0x1ed2   : > { %v6030_v33 = vpack.c.bf16 %v4677_v11, %v4676_v31  ;;  %6038 = vmatprep.subr.bf16.mxu1 %v6295_v3 }
0x1ed4   : > { %6031 = vmatpush3.bf16.msra.mxu0 %v6030_v33 }
0x1ed5   : > { %6032 = vmatprep.subr.bf16.mxu0 %v6295_v3  ;;  %6040 = vmatpush3.bf16.msra.mxu1 %v6039_v41 }
0x1ed6   : > { %6041 = vmatprep.subr.bf16.mxu1 %v6295_v3 }
0x1ed9   : > { %6043 = vmatpush3.bf16.msra.mxu1 %v6042_v45 }
0x1eda   : > { %6044 = vmatprep.subr.bf16.mxu1 %v6295_v3  ;;  %v4767_v3 = vld [vmem:[%s7379_s19 + $0x30] sm:$0xff] }
0x1edb   : > { %v6045_v56 = vpack.c.bf16 %v4768_v55, %v4767_v3 }
0x1edd   : > { %6046 = vmatpush3.bf16.msra.mxu1 %v6045_v56 }
0x1fa3   : > { %v4641_v20 = vpop.f32.mrb[48].mxu1 }
0x1fa4   : > { %v4645_v21 = vadd.f32 %v4641_v20, %v4178_v54  ;;  %v5854_v22 = vpop.f32.mrb[49].mxu1 }
0x1fa6   : > { %v4646_v23 = vadd.f32 %v4645_v21, %v6888_v42  ;;  %v4678_v42 = vld [vmem:[%s7377_s17 + $0x10] sm:$0xff] }
0x1fa7   : > { %v6033_v35 = vpack.c.bf16 %v4679_v34, %v4678_v42 }
0x1fa8   : > { %v4649_v24 = vsel %vm883_vm1, %v4646_v23, 0.0 }
0x1fa9   : > { %4650 = vadd.xlane.f32.xlu0 %v4649_v24  ;;  %6034 = vmatpush3.bf16.msra.mxu0 %v6033_v35 }
0x2036   : > { %v4651_v25 = vpop.xlane.xlu0 %4650 }
0x2037   : > { %v4652_v26 = vmul.f32 0.03125, %v4651_v25 }
0x2039   : > { %v4653_v27 = vsub.f32 %v4646_v23, %v4652_v26 }
0x203b   : > { %v4654_v28 = vmul.f32 %v4653_v27, %v4653_v27 }
0x203d   : > { %v4655_v30 = vsel %vm883_vm1, %v4654_v28, 0.0 }
0x203e   : > { %4656 = vadd.xlane.f32.xlu1 %v4655_v30 }
0x20cb   : > { %v4657_v46 = vpop.xlane.xlu1 %4656 }
0x20cc   : > { %v4658_v47 = vmul.f32 0.03125, %v4657_v46 }
0x20ce   : > { %v4659_v48 = vadd.f32 1e-06, %v4658_v47 }
0x20d0   : > { %6151 = vrsqrt.f32 %v4659_v48 }
0x20da   : > { %v6152_v49 = vpop.eup %6151 }
0x20db   : > { %v4661_v51 = vmul.f32 %v6152_v49, %v4653_v27 }
0x20dd   : > { %v4668_v53 = vmul.f32 %v5269_v50, %v4661_v51 }
0x20df   : > { %v4675_v54 = vadd.f32 %v5270_v52, %v4668_v53 }
0x20e1   : > { %5864 = vmatmul.mubr.msk.f32.vlgmr.msra.gmra.mrb[46].mxu0 %vm883_vm1, %v4675_v54 }
0x21b4   : > { %v4756_v58 = vpop.f32.mrb[46].mxu0 }
0x21b5   : > { %v4757_v18 = vadd.f32 %v5271_v57, %v4756_v58  ;;  %v5865_v59 = vpop.f32.mrb[47].mxu0 }
0x21b7   : > { %v4760_v32 = vmax.f32 %v4757_v18, 0.0 }
0x21b9   : > { %5883 = vmatmul.mubr.msk.f32.vlgmr.msra.gmra.mrb[50].mxu1 %vm4776_vm4, %v4760_v32 }
0x228c   : > { %v4846_v61 = vpop.f32.mrb[50].mxu1 }
0x228d   : > { %v4847_v62 = vadd.f32 %v5273_v60, %v4846_v61  ;;  %v5884_v63 = vpop.f32.mrb[51].mxu1 }
0x228f   : > { %v4850_v0 = vadd.f32 %v4847_v62, %v4675_v54 }
0x2291   : > { %v4853_v1 = vsel %vm883_vm1, %v4850_v0, 0.0 }
0x2292   : > { %4854 = vadd.xlane.f32.xlu0 %v4853_v1 }
0x231f   : > { %v4855_v2 = vpop.xlane.xlu0 %4854 }
0x2320   : > { %v4856_v4 = vmul.f32 0.03125, %v4855_v2 }
0x2322   : > { %v7212_v5 = vsub.f32 %v4850_v0, %v4856_v4 }
0x2324   : > { %v4858_v6 = vmul.f32 %v7212_v5, %v7212_v5 }
0x2326   : > { %v4859_v7 = vsel %vm883_vm1, %v4858_v6, 0.0 }
0x2327   : > { %4860 = vadd.xlane.f32.xlu1 %v4859_v7 }
0x2328   : > { %6168 = shalt.err (!%p6165_p5)
}
0x2329   : > { %s6169_s28 = scalar_lea.hbm %s7228_s29, 512  ;;  %s6173_s21 = scalar_lea.hbm %s7455_s24, 1024 }
0x232a   : > { %p6170_p6 = scmp.ne.s32.totalorder %s7228_s29, %s6169_s28  ;;  %p6174_p10 = scmp.lt.u32.totalorder %s7228_s29, %s7455_s24 }
0x232b   : > { %p6175_p11 = scmp.lt.u32.totalorder %s6173_s21, %s6169_s28  ;;  %p6177_p13 = scmp.lt.u32.totalorder %s6169_s28, %s7228_s29 }
0x232c   : > { %p6171_p7 = pnand %p6170_p6, %p6475_p4 }
0x232d   : > { %p6176_p12 = por %p6175_p11, %p6174_p10 }
0x232e   : > { %p6172_p9 = pneg %p6171_p7 }
0x232f   : > { %p6178_p0 = por %p6177_p13, %p6176_p12 }
0x2331   : > { %p6179_p1 = pnand %p6178_p0, %p6172_p9 }
0x2333   : > { %6182 = shalt.err (!%p6179_p1)
}
0x2334   : > { %s6299_s10 = smov 128   ;;  %s6300_s8 = smov 8  }
0x2335   : > { %6048 = dma.vmem_to_hbm [thread:$0]  (%p6475_p4), %s7231_s25, 512, %s7228_s29, %s4887_s0, %s6299_s10, %s6299_s10, %s6300_s8  }
0x2336   : > { %s7456_s27 = sshll.u32 %s6946_s7, 4  ;;  %s7457_s28 = sshll.u32 %s7452_s30, 9  ;;  %s7262_s27 = int_to_ptr.vmem [resolvable:$true] %s7456_s27 }
0x2337   : > { %s7458_s21 = sld [smem:[#allocation35_spill]]  ;;  %s6183_s11 = scalar_lea.vmem %s7262_s27, 512 }
0x2338   : > { %p6184_p2 = scmp.ne.s32.totalorder %s7262_s27, %s6183_s11  ;;  %s6301_s12 = smov [#allocation7]  }
0x2339   : > { %s6187_s13 = sshll.u32 %s6301_s12, 4  ;;  %s6188_s13 = int_to_ptr.vmem [resolvable:$false] %s6187_s13 }
0x233a   : > { %p6185_p3 = pnand %p6184_p2, %p6475_p4  ;;  %s6189_s7 = scalar_lea.vmem %s6188_s13, 1024 }
0x233b   : > { %p6190_p6 = scmp.lt.s32.totalorder %s7262_s27, %s6188_s13  ;;  %p6191_p7 = scmp.lt.s32.totalorder %s6189_s7, %s6183_s11 }
0x233c   : > { %p6186_p5 = pneg %p6185_p3 }
0x233d   : > { %s7269_s9 = scalar_lea.hbm %s7458_s21, %s7457_s28  ;;  %p6192_p9 = por %p6191_p7, %p6190_p6 }
0x233f   : > { %p6193_p10 = pnand %p6192_p9, %p6186_p5 }
0x2341   : > { %6196 = shalt.err (!%p6193_p10)
}
0x2342   : > { %s6197_s29 = scalar_lea.hbm %s7269_s9, 512  ;;  %s6201_s12 = scalar_lea.hbm %s7458_s21, 1024 }
0x2343   : > { %p6198_p11 = scmp.ne.s32.totalorder %s7269_s9, %s6197_s29  ;;  %p6202_p0 = scmp.lt.u32.totalorder %s7269_s9, %s7458_s21 }
0x2344   : > { %p6203_p1 = scmp.lt.u32.totalorder %s6201_s12, %s6197_s29  ;;  %p6205_p3 = scmp.lt.u32.totalorder %s6197_s29, %s7269_s9 }
0x2345   : > { %p6199_p12 = pnand %p6198_p11, %p6475_p4 }
0x2346   : > { %p6204_p2 = por %p6203_p1, %p6202_p0 }
0x2347   : > { %p6200_p13 = pneg %p6199_p12 }
0x2348   : > { %p6206_p5 = por %p6205_p3, %p6204_p2 }
0x234a   : > { %p6207_p6 = pnand %p6206_p5, %p6200_p13 }
0x234c   : > { %6210 = shalt.err (!%p6207_p6)
}
0x234d   : > { %6049 = dma.vmem_to_hbm [thread:$0]  (%p6475_p4), %s7262_s27, 512, %s7269_s9, %s4887_s0, %s6299_s10, %s6299_s10, %s6300_s8  }
0x234e   : > { %s5120_s11 = sshll.u32 %s6606_s6, 3  ;;  %s7459_s29 = sld [smem:[#allocation31_spill]] }
0x234f   : > { %s7460_s28 = sld [smem:[#allocation32_spill]]  ;;  %s5280_s12 = sshll.u32 %s7452_s30, 7 }
0x2350   : > { %s834_s0 = scalar_lea.vmem [#allocation3], %s5120_s11  ;;  %s7461_s9 = sld [smem:[#allocation33_spill]] }
0x2351   : > { %s4906_s10 = sshll.u32 %s834_s0, 4  ;;  %s4882_s13 = scalar_lea.sflag [#allocation4], %s6606_s6  ;;  %s7311_s10 = int_to_ptr.vmem [resolvable:$true] %s4906_s10 }
0x2352   : > { %s6211_s1 = scalar_lea.vmem %s7311_s10, 128  ;;  %s6302_s30 = smov [#allocation3]  }
0x2353   : > { %p6212_p7 = scmp.ne.s32.totalorder %s7311_s10, %s6211_s1  ;;  %s6215_s11 = sshll.u32 %s6302_s30, 4  ;;  %s6216_s11 = int_to_ptr.vmem [resolvable:$false] %s6215_s11 }
0x2354   : > { %v5275_v12 = vld [vmem:[%s7459_s29] ss:$0 sm:$0xff]  ;;  %s6217_s7 = scalar_lea.vmem %s6216_s11, 256  ;;  %p6218_p11 = scmp.lt.s32.totalorder %s7311_s10, %s6216_s11 }
0x2355   : > { %v5276_v14 = vld [vmem:[%s7460_s28] ss:$0 sm:$0xff]  ;;  %p6213_p9 = pnand %p6212_p7, %p6475_p4  ;;  %p6219_p12 = scmp.lt.s32.totalorder %s6217_s7, %s6211_s1 }
0x2356   : > { %s7309_s5 = scalar_lea.hbm %s7461_s9, %s5280_s12 }
0x2357   : > { %p6214_p10 = pneg %p6213_p9  ;;  %p6220_p13 = por %p6219_p12, %p6218_p11 }
0x2359   : > { %p6221_p0 = pnand %p6220_p13, %p6214_p10 }
0x23b4   : > { %v4861_v8 = vpop.xlane.xlu1 %4860 }
0x23b5   : > { %v4862_v9 = vmul.f32 0.03125, %v4861_v8 }
0x23b7   : > { %v4863_v29 = vadd.f32 1e-06, %v4862_v9 }
0x23b9   : > { %6153 = vrsqrt.f32 %v4863_v29 }
0x23c3   : > { %v6154_v10 = vpop.eup %6153 }
0x23c4   : > { %v4865_v13 = vmul.f32 %v6154_v10, %v7212_v5 }
0x23c6   : > { %v4872_v15 = vmul.f32 %v5275_v12, %v4865_v13 }
0x23c8   : > { %v4879_v17 = vadd.f32 %v5276_v14, %v4872_v15 }
0x23ca   : > { %4880 = vst.msk [vmem:[%s834_s0] sm:$0xff] %vm883_vm1, %v4879_v17 }
0x23cb   : > { %6224 = shalt.err (!%p6221_p0)
}
0x23cc   : > { %s6225_s6 = scalar_lea.hbm %s7309_s5, 128  ;;  %s6229_s25 = scalar_lea.hbm %s7461_s9, 256 }
0x23cd   : > { %p6226_p1 = scmp.ne.s32.totalorder %s7309_s5, %s6225_s6  ;;  %p6230_p5 = scmp.lt.u32.totalorder %s7309_s5, %s7461_s9 }
0x23ce   : > { %p6231_p6 = scmp.lt.u32.totalorder %s6229_s25, %s6225_s6  ;;  %p6233_p9 = scmp.lt.u32.totalorder %s6225_s6, %s7309_s5 }
0x23cf   : > { %p6227_p2 = pnand %p6226_p1, %p6475_p4 }
0x23d0   : > { %p6232_p7 = por %p6231_p6, %p6230_p5 }
0x23d1   : > { %p6228_p3 = pneg %p6227_p2 }
0x23d2   : > { %p6234_p10 = por %p6233_p9, %p6232_p7 }
0x23d4   : > { %p6235_p11 = pnand %p6234_p10, %p6228_p3 }
0x23d6   : > { %6238 = shalt.err (!%p6235_p11)
}
0x23d7   : > { %6047 = dma.vmem_to_hbm [thread:$0]  (%p6475_p4), %s7311_s10, 128, %s7309_s5, %s4882_s13  }
0x23d8 PF: > { %s7462_s0 = sld [smem:[#allocation10_spill]]  ;;  %p6063_p12 = scmp.ge.s32.totalorder %s6293_s3, 2 }
0x23da   : > { %p6054_p13 = pnand %p6063_p12, %p6484_p8 }
0x23de   : > { %s4952_s27 = sand.u32 1, %s7462_s0  }
0x23df   : > { %s4953_s1 = scalar_lea.sflag [#allocation4], %s4952_s27 }
0x23e0   : > { %6264 = dma.done.wait (!%p6054_p13), %s4953_s1, 128  }
0x23e1   : > { %6266 = vsyncadd (!%p6054_p13), %s4953_s1, 4294967168  ;;  %s7464_s30 = sadd.s32 4294967294, %s6293_s3  }
0x23e2   : > { %s4961_s11 = sand.u32 1, %s7464_s30  }
0x23e3   : > { %s4962_s7 = scalar_lea.sflag [#allocation6], %s4961_s11 }
0x23e4   : > { %6268 = dma.done.wait (!%p6054_p13), %s4962_s7, 1024  }
0x23e5   : > { %6270 = vsyncadd (!%p6054_p13), %s4962_s7, 4294966272  ;;  %s44_s3 = sadd.s32 1, %s6293_s3   ;;  %s7465_s4 = sld [smem:[#allocation11_spill]] }
0x23e6   : > { %p41_p4 = scmp.ge.s32.totalorder %s44_s3, 4   ;;  %s7466_s6 = sld [smem:[#allocation17_spill]] }
0x23e7   : > { %s7467_s30 = sld [smem:[#allocation13_spill]]  ;;  %s7468_s7 = sld [smem:[#allocation14_spill]] }
0x23e8   : > { %s7469_s29 = smov %s6277_s2  ;;  %43 = sbr.rel (!%p41_p4) target bundleno = 25 (0x19), region = 218 }
0x23eb   : > { %s7470_s2 = smov %s7465_s4 }
0x23ef   :  { %4976 = vsyncpa [#allocation4], 1 }
0x23f0   :  { %4978 = vsyncpa [#allocation4 + $0x1], 1 }
0x23f1   :  { %4979 = vsyncpa [#allocation6], 1 }
0x23f2   :  { %4981 = vsyncpa [#allocation6 + $0x1], 1 }

</bundles_post_ra>
